<compile_context>
chip_gen: v5e
topology: v5e:2x2
jax: 0.10.0
libtpu: 0.0.40
codegen_flags: <defaults>
</compile_context>

<pallas_src>
import numpy as np
import jax
import jax.numpy as jnp
from jax import lax
from jax.experimental import pallas as pl
from jax.experimental.pallas import tpu as pltpu

LANE = 128  # lanes per in-kernel batch group (one f32 vreg row)


def _cdiv(a, b):
    return (a + b - 1) // b


# ---------------------------------------------------------------------------
# In-kernel helpers: batch-on-lanes "matrix" algebra.
# A batched matrix is (rows, cols, L); a batched vector is (dim, L).
# All loops below are over tiny static S/M dims and fully unrolled.
# ---------------------------------------------------------------------------
def _mm(a, b):
    """Per-lane-batch matmul: a (I, K, L) @ b (K, J, L) -> (I, J, L)."""
    k_dim = a.shape[1]
    acc = a[:, 0:1, :] * b[0:1, :, :]
    for k in range(1, k_dim):
        acc = acc + a[:, k:k + 1, :] * b[k:k + 1, :, :]
    return acc


def _mm_t(a, b):
    """Per-lane-batch A @ B^T: a (I, K, L), b (J, K, L) -> (I, J, L)."""
    j_dim = b.shape[0]
    cols = [jnp.sum(a * b[j:j + 1, :, :], axis=1, keepdims=True)
            for j in range(j_dim)]
    return jnp.concatenate(cols, axis=1)


def _mtm(a, b):
    """Per-lane-batch A^T @ B: a (K, I, L), b (K, J, L) -> (I, J, L)."""
    k_dim, i_dim, _ = a.shape
    rows = []
    for i in range(i_dim):
        acc = a[0:1, i:i + 1, :] * b[0:1, :, :]
        for k in range(1, k_dim):
            acc = acc + a[k:k + 1, i:i + 1, :] * b[k:k + 1, :, :]
        rows.append(acc)                       # (1, J, L)
    return jnp.concatenate(rows, axis=0)


def _mv(a, v):
    """Per-lane-batch matrix-vector: a (I, K, L) @ v (K, L) -> (I, L)."""
    i_dim = a.shape[0]
    rows = [jnp.sum(a[i] * v, axis=0, keepdims=True) for i in range(i_dim)]
    return jnp.concatenate(rows, axis=0)


def _mtv(a, v):
    """Per-lane-batch A^T @ v: a (K, J, L), v (K, L) -> (J, L)."""
    k_dim = a.shape[0]
    acc = a[0] * v[0:1, :]
    for k in range(1, k_dim):
        acc = acc + a[k] * v[k:k + 1, :]
    return acc


def _tril_from_packed(packed, n):
    """Expand packed row-major tril elements (T, L) -> lower-tri (n, n, L).

    Packing order matches torch.tril_indices(n, n): (0,0),(1,0),(1,1),(2,0),...
    Row i of L is the contiguous slice packed[i(i+1)/2 : i(i+1)/2 + i + 1].
    """
    bt = packed.shape[-1]
    rows = []
    for i in range(n):
        start = i * (i + 1) // 2
        filled = packed[start:start + i + 1, :]          # (i+1, L)
        if i + 1 < n:
            row = jnp.concatenate(
                [filled, jnp.zeros((n - 1 - i, bt), packed.dtype)], axis=0)
        else:
            row = filled
        rows.append(row)                                  # (n, L)
    return jnp.stack(rows, axis=0)                        # (n, n, L)


def _cholesky_solve(a, rhs):
    """Solve A @ X = rhs for per-lane SPD A without forming A^-1.

    a: (N, N, L) SPD per lane.  rhs: (N, J, L).  Returns X: (N, J, L).
    Fully unrolled Cholesky A = C C^T followed by forward/back substitution.
    Diagonal reciprocals use lax.rsqrt (EUP slot, off the VALU critical path).
    """
    n = a.shape[0]
    c = [[None] * n for _ in range(n)]        # lower-factor entries, (1, L)
    inv_d = [None] * n                        # 1 / C[k, k]
    for k in range(n):
        d = a[k, k:k + 1, :]
        for t in range(k):
            d = d - c[k][t] * c[k][t]
        r = lax.rsqrt(d)
        inv_d[k] = r
        c[k][k] = d * r                       # sqrt(d)
        for i in range(k + 1, n):
            e = a[i, k:k + 1, :]
            for t in range(k):
                e = e - c[i][t] * c[k][t]
            c[i][k] = e * r
    # forward substitution: C y = rhs
    y = [None] * n
    for i in range(n):
        acc = rhs[i]                          # (J, L)
        for t in range(i):
            acc = acc - c[i][t] * y[t]
        y[i] = acc * inv_d[i]
    # back substitution: C^T x = y
    xs = [None] * n
    for i in reversed(range(n)):
        acc = y[i]
        for t in range(i + 1, n):
            acc = acc - c[t][i] * xs[t]
        xs[i] = acc * inv_d[i]
    return jnp.stack(xs, axis=0)              # (N, J, L)


# ---------------------------------------------------------------------------
# Pallas kernel: one EKF predict + update step for g_tile 128-lane groups.
# ---------------------------------------------------------------------------
def ekf_kernel(z_ref, x_ref, p_ref, f_ref, h_ref, qp_ref, rp_ref,
               pred_ref, xnew_ref, pnew_ref):
    g_tile, m, _ = z_ref.shape
    s = x_ref.shape[1]

    def step(j, carry):
        z = z_ref[j]     # (M, L)        measurements
        x = x_ref[j]     # (S, L)        states
        p = p_ref[j]     # (S, S, L)     state covariance
        f = f_ref[j]     # (S, S, L)     motion-model Jacobian
        h = h_ref[j]     # (M, S, L)     measurement-model Jacobian
        qp = qp_ref[j]   # (S(S+1)/2, L) packed process-noise tril
        rp = rp_ref[j]   # (M(M+1)/2, L) packed measurement-noise tril

        # ---- predict -----------------------------------------------------
        x_pred = _mv(f, x)                           # F x            (S, L)
        pred = _mv(h, x_pred)                        # H x_pred       (M, L)
        res = z - pred                               # innovation     (M, L)

        fp = _mm(f, p)                               # F P            (S, S, L)
        lq = _tril_from_packed(qp, s)
        p_pred = _mm_t(fp, f) + _mm_t(lq, lq)        # F P F^T + Q

        # ---- update ------------------------------------------------------
        hp = _mm(h, p_pred)                          # H P_pred       (M, S, L)
        lr = _tril_from_packed(rp, m)
        s_cov = _mm_t(hp, h) + _mm_t(lr, lr)         # H P H^T + R    (M, M, L)

        # Kalman gain carried transposed: solve S K^T = H P_pred
        kt = _cholesky_solve(s_cov, hp)              # (M, S, L)

        x_new = x_pred + _mtv(kt, res)               # x_pred + K res (S, L)
        p_new = p_pred - _mtm(kt, hp)                # (I - K H) P_pred

        pred_ref[j] = pred
        xnew_ref[j] = x_new
        pnew_ref[j] = p_new
        return carry

    if g_tile == 1:
        step(0, 0)
    else:
        lax.fori_loop(0, g_tile, step, 0)


# ---------------------------------------------------------------------------
# Hot-path entry point: lane-blocked batch-last layout (no transposes).
# ---------------------------------------------------------------------------
def ekf_cell_forward_blocked(z_b, x_b, p_b, f_b, h_b, qp_b, rp_b, *, g_tile=4):
    """EKF step on lane-blocked batch-last inputs.

    Shapes (all float32, G = padded_batch / 128, LANE = 128):
      z_b  (G, M, LANE), x_b (G, S, LANE), p_b (G, S, S, LANE),
      f_b  (G, S, S, LANE), h_b (G, M, S, LANE),
      qp_b (G, S(S+1)/2, LANE), rp_b (G, M(M+1)/2, LANE)
    Returns (pred_b (G,M,LANE), xnew_b (G,S,LANE), pnew_b (G,S,S,LANE)).
    """
    g, m, lane = z_b.shape
    s = x_b.shape[1]
    tq = qp_b.shape[1]
    tr = rp_b.shape[1]
    assert lane == LANE
    g_tile = max(1, min(g_tile, g))
    assert g % g_tile == 0, (g, g_tile)
    grid = (g // g_tile,)
    f32 = jnp.float32

    rows_in = m + s + s * s + s * s + m * s + tq + tr
    rows_out = m + s + s * s
    block_bytes = 4 * g_tile * LANE * (rows_in + rows_out)
    vmem_limit = int(min(max(4 * block_bytes, 32 * 2 ** 20), 48 * 2 ** 20))

    def spec(*rows):
        shape = (g_tile,) + rows + (LANE,)
        zeros = (0,) * (len(rows) + 1)
        return pl.BlockSpec(shape, lambda i, _z=zeros: (i,) + _z)

    pred_b, xnew_b, pnew_b = pl.pallas_call(
        ekf_kernel,
        out_shape=(
            jax.ShapeDtypeStruct((g, m, LANE), f32),
            jax.ShapeDtypeStruct((g, s, LANE), f32),
            jax.ShapeDtypeStruct((g, s, s, LANE), f32),
        ),
        grid=grid,
        in_specs=[
            spec(m), spec(s), spec(s, s), spec(s, s), spec(m, s),
            spec(tq), spec(tr),
        ],
        out_specs=(spec(m), spec(s), spec(s, s)),
        compiler_params=pltpu.CompilerParams(
            dimension_semantics=("parallel",),
            vmem_limit_bytes=vmem_limit),
    )(z_b, x_b, p_b, f_b, h_b, qp_b, rp_b)
    return pred_b, xnew_b, pnew_b


# ---------------------------------------------------------------------------
# PyTorch-interface-compatible wrapper (batch-first tensors, one-time relayout)
# ---------------------------------------------------------------------------
def ekf_cell_forward(measurement, state, state_cov, f_jac, h_jac,
                     process_noise, measurement_noise, *, batch_tile=512):
    """Returns (prediction (B,M), new_state (B,S), new_state_cov (B,S,S)).

    Production users should keep data in the lane-blocked layout and call
    ekf_cell_forward_blocked directly; the transposes here are interface
    plumbing, not part of the hot path.
    """
    b, s = state.shape
    m = measurement.shape[1]
    tr = m * (m + 1) // 2
    f32 = jnp.float32

    # tile selection: multiple of 128 lanes; keep grid >= 2 when possible (v7x)
    groups = _cdiv(b, LANE)
    g_tile = max(1, min(batch_tile // LANE, groups))
    if groups >= 2:
        g_tile = max(1, min(g_tile, groups // 2))
    g = _cdiv(groups, g_tile) * g_tile
    b_pad = g * LANE
    pad = b_pad - b

    def to_blocked(a, pad_row=None):
        a = a.astype(f32)
        if pad:
            if pad_row is None:
                a = jnp.pad(a, [(0, pad)] + [(0, 0)] * (a.ndim - 1))
            else:
                fill = jnp.broadcast_to(jnp.asarray(pad_row, f32),
                                        (pad,) + a.shape[1:])
                a = jnp.concatenate([a, fill], axis=0)
        a = a.reshape((g, LANE) + a.shape[1:])
        perm = (0,) + tuple(range(2, a.ndim)) + (1,)
        return jnp.transpose(a, perm)

    # Pad measurement-noise lanes with a packed identity so the innovation
    # covariance stays SPD (Cholesky-safe) in dead lanes.
    eye_packed = np.zeros((tr,), np.float32)
    eye_packed[[i * (i + 1) // 2 + i for i in range(m)]] = 1.0

    z_b = to_blocked(measurement)
    x_b = to_blocked(state)
    p_b = to_blocked(state_cov)
    f_b = to_blocked(f_jac)
    h_b = to_blocked(h_jac)
    qp_b = to_blocked(process_noise)
    rp_b = to_blocked(measurement_noise, pad_row=eye_packed)

    pred_b, xnew_b, pnew_b = ekf_cell_forward_blocked(
        z_b, x_b, p_b, f_b, h_b, qp_b, rp_b, g_tile=g_tile)

    def from_blocked(a_b):
        perm = (0, a_b.ndim - 1) + tuple(range(1, a_b.ndim - 1))
        a = jnp.transpose(a_b, perm)
        return a.reshape((b_pad,) + a.shape[2:])[:b]

    return from_blocked(pred_b), from_blocked(xnew_b), from_blocked(pnew_b)


# ---------------------------------------------------------------------------
# Pure-JAX reference (same math, jnp.linalg.inv) for verification
# ---------------------------------------------------------------------------
def _tril_expand_ref(packed, n):
    rows, cols = jnp.tril_indices(n)
    bsz = packed.shape[0]
    out = jnp.zeros((bsz, n, n), packed.dtype)
    return out.at[:, rows, cols].set(packed)


def ekf_reference(measurement, state, state_cov, f, h, process_noise,
                  measurement_noise):
    s = state.shape[1]
    m = measurement.shape[1]
    lq = _tril_expand_ref(process_noise, s)
    lr = _tril_expand_ref(measurement_noise, m)
    q = lq @ jnp.swapaxes(lq, 1, 2)
    r = lr @ jnp.swapaxes(lr, 1, 2)
    x_pred = jnp.einsum("bij,bj->bi", f, state)
    p_pred = f @ state_cov @ jnp.swapaxes(f, 1, 2) + q
    pred = jnp.einsum("bij,bj->bi", h, x_pred)
    res = measurement - pred
    s_cov = h @ p_pred @ jnp.swapaxes(h, 1, 2) + r
    k = p_pred @ jnp.swapaxes(h, 1, 2) @ jnp.linalg.inv(s_cov)
    x_new = x_pred + jnp.einsum("bij,bj->bi", k, res)
    p_new = (jnp.eye(s, dtype=f.dtype)[None] - k @ h) @ p_pred
    return pred, x_new, p_new


# ---------------------------------------------------------------------------
def _make_inputs(key, b, s, m):
    k1, k2, k3, k4, k5, k6, k7 = jax.random.split(key, 7)
    measurement = jax.random.normal(k1, (b, m), jnp.float32)
    state = jax.random.normal(k2, (b, s), jnp.float32)
    a = 0.3 * jax.random.normal(k3, (b, s, s), jnp.float32)
    state_cov = a @ jnp.swapaxes(a, 1, 2) + 0.5 * jnp.eye(s, dtype=jnp.float32)[None]
    # deterministic synthetic Jacobians (base class leaves them undefined)
    f_jac = jnp.eye(s, dtype=jnp.float32)[None] + 0.1 * jax.random.normal(
        k4, (b, s, s), jnp.float32)
    h_jac = 0.5 * jax.random.normal(k5, (b, m, s), jnp.float32)
    # deterministic "trained" noise parameters (module inits them to zeros;
    # nonzero values exercise the tril_square path and keep S well conditioned)
    process_noise = 0.1 * jax.random.normal(k6, (b, s * (s + 1) // 2), jnp.float32)
    measurement_noise = 0.1 * jax.random.normal(k7, (b, m * (m + 1) // 2), jnp.float32)
    return (measurement, state, state_cov, f_jac, h_jac,
            process_noise, measurement_noise)


if __name__ == "__main__":
    S, M = 8, 4  # state_size, measurement_size
    names = ("prediction", "new_state", "new_state_cov")

    # small case (grid=1, single lane group) and a larger case that exercises
    # padding, the in-kernel group loop, and a multi-block grid.
    for b in (4, 520):
        inputs = _make_inputs(jax.random.PRNGKey(0), b, S, M)
        out = jax.block_until_ready(ekf_cell_forward(*inputs, batch_tile=512))
        ref = ekf_reference(*inputs)
        for name, got, want in zip(names, out, ref):
            assert got.shape == want.shape, (name, got.shape, want.shape)
            assert jnp.allclose(got, want, rtol=2e-3, atol=2e-3), (
                name, b, float(jnp.max(jnp.abs(got - want))))

    print("KERNEL_OK")
</pallas_src>

<mosaic_0001>
module attributes {stable_mosaic.version = 11 : i64} {
  func.func @ekf_kernel(%arg0: i32, %arg1: memref<1x4x128xf32, #tpu.memory_space<vmem>>, %arg2: memref<1x8x128xf32, #tpu.memory_space<vmem>>, %arg3: memref<1x8x8x128xf32, #tpu.memory_space<vmem>>, %arg4: memref<1x8x8x128xf32, #tpu.memory_space<vmem>>, %arg5: memref<1x4x8x128xf32, #tpu.memory_space<vmem>>, %arg6: memref<1x36x128xf32, #tpu.memory_space<vmem>>, %arg7: memref<1x10x128xf32, #tpu.memory_space<vmem>>, %arg8: memref<1x4x128xf32, #tpu.memory_space<vmem>>, %arg9: memref<1x8x128xf32, #tpu.memory_space<vmem>>, %arg10: memref<1x8x8x128xf32, #tpu.memory_space<vmem>>) attributes {dimension_semantics = [#tpu.dimension_semantics<parallel>], iteration_bounds = array<i64: 1>, scalar_prefetch = 0 : i64, scratch_operands = 0 : i64, tpu.core_type = #tpu.core_type<tc>, window_params = [{transform_indices = @transform_0, window_bounds = array<i64: 1, 4, 128>}, {transform_indices = @transform_1, window_bounds = array<i64: 1, 8, 128>}, {transform_indices = @transform_2, window_bounds = array<i64: 1, 8, 8, 128>}, {transform_indices = @transform_3, window_bounds = array<i64: 1, 8, 8, 128>}, {transform_indices = @transform_4, window_bounds = array<i64: 1, 4, 8, 128>}, {transform_indices = @transform_5, window_bounds = array<i64: 1, 36, 128>}, {transform_indices = @transform_6, window_bounds = array<i64: 1, 10, 128>}, {transform_indices = @transform_7, window_bounds = array<i64: 1, 4, 128>}, {transform_indices = @transform_8, window_bounds = array<i64: 1, 8, 128>}, {transform_indices = @transform_9, window_bounds = array<i64: 1, 8, 8, 128>}]} {
    %c0 = arith.constant 0 : index
    %c0_0 = arith.constant 0 : index
    %c0_1 = arith.constant 0 : index
    %0 = vector.load %arg1[%c0, %c0_0, %c0_1] : memref<1x4x128xf32, #tpu.memory_space<vmem>>, vector<1x4x128xf32>
    %1 = vector.shape_cast %0 : vector<1x4x128xf32> to vector<4x128xf32>
    %c0_2 = arith.constant 0 : index
    %c0_3 = arith.constant 0 : index
    %c0_4 = arith.constant 0 : index
    %2 = vector.load %arg2[%c0_2, %c0_3, %c0_4] : memref<1x8x128xf32, #tpu.memory_space<vmem>>, vector<1x8x128xf32>
    %3 = vector.shape_cast %2 : vector<1x8x128xf32> to vector<8x128xf32>
    %c0_5 = arith.constant 0 : index
    %c0_6 = arith.constant 0 : index
    %c0_7 = arith.constant 0 : index
    %c0_8 = arith.constant 0 : index
    %4 = vector.load %arg3[%c0_5, %c0_6, %c0_7, %c0_8] : memref<1x8x8x128xf32, #tpu.memory_space<vmem>>, vector<1x8x8x128xf32>
    %5 = vector.shape_cast %4 : vector<1x8x8x128xf32> to vector<8x8x128xf32>
    %c0_9 = arith.constant 0 : index
    %c0_10 = arith.constant 0 : index
    %c0_11 = arith.constant 0 : index
    %c0_12 = arith.constant 0 : index
    %6 = vector.load %arg4[%c0_9, %c0_10, %c0_11, %c0_12] : memref<1x8x8x128xf32, #tpu.memory_space<vmem>>, vector<1x8x8x128xf32>
    %7 = vector.shape_cast %6 : vector<1x8x8x128xf32> to vector<8x8x128xf32>
    %c0_13 = arith.constant 0 : index
    %c0_14 = arith.constant 0 : index
    %c0_15 = arith.constant 0 : index
    %c0_16 = arith.constant 0 : index
    %8 = vector.load %arg5[%c0_13, %c0_14, %c0_15, %c0_16] : memref<1x4x8x128xf32, #tpu.memory_space<vmem>>, vector<1x4x8x128xf32>
    %9 = vector.shape_cast %8 : vector<1x4x8x128xf32> to vector<4x8x128xf32>
    %c0_17 = arith.constant 0 : index
    %c0_18 = arith.constant 0 : index
    %c0_19 = arith.constant 0 : index
    %10 = vector.load %arg6[%c0_17, %c0_18, %c0_19] : memref<1x36x128xf32, #tpu.memory_space<vmem>>, vector<1x36x128xf32>
    %11 = vector.shape_cast %10 : vector<1x36x128xf32> to vector<36x128xf32>
    %c0_20 = arith.constant 0 : index
    %c0_21 = arith.constant 0 : index
    %c0_22 = arith.constant 0 : index
    %12 = vector.load %arg7[%c0_20, %c0_21, %c0_22] : memref<1x10x128xf32, #tpu.memory_space<vmem>>, vector<1x10x128xf32>
    %13 = vector.shape_cast %12 : vector<1x10x128xf32> to vector<10x128xf32>
    %14 = vector.extract_strided_slice %7 {offsets = [0, 0, 0], sizes = [1, 8, 128], strides = [1, 1, 1]} : vector<8x8x128xf32> to vector<1x8x128xf32>
    %15 = vector.shape_cast %14 : vector<1x8x128xf32> to vector<8x128xf32>
    %16 = arith.mulf %15, %3 : vector<8x128xf32>
    %cst = arith.constant dense<0.000000e+00> : vector<128xf32>
    %17 = vector.multi_reduction <add>, %16, %cst [0] : vector<8x128xf32> to vector<128xf32>
    %18 = vector.shape_cast %17 : vector<128xf32> to vector<1x128xf32>
    %19 = vector.extract_strided_slice %7 {offsets = [1, 0, 0], sizes = [1, 8, 128], strides = [1, 1, 1]} : vector<8x8x128xf32> to vector<1x8x128xf32>
    %20 = vector.shape_cast %19 : vector<1x8x128xf32> to vector<8x128xf32>
    %21 = arith.mulf %20, %3 : vector<8x128xf32>
    %cst_23 = arith.constant dense<0.000000e+00> : vector<128xf32>
    %22 = vector.multi_reduction <add>, %21, %cst_23 [0] : vector<8x128xf32> to vector<128xf32>
    %23 = vector.shape_cast %22 : vector<128xf32> to vector<1x128xf32>
    %24 = vector.extract_strided_slice %7 {offsets = [2, 0, 0], sizes = [1, 8, 128], strides = [1, 1, 1]} : vector<8x8x128xf32> to vector<1x8x128xf32>
    %25 = vector.shape_cast %24 : vector<1x8x128xf32> to vector<8x128xf32>
    %26 = arith.mulf %25, %3 : vector<8x128xf32>
    %cst_24 = arith.constant dense<0.000000e+00> : vector<128xf32>
    %27 = vector.multi_reduction <add>, %26, %cst_24 [0] : vector<8x128xf32> to vector<128xf32>
    %28 = vector.shape_cast %27 : vector<128xf32> to vector<1x128xf32>
    %29 = vector.extract_strided_slice %7 {offsets = [3, 0, 0], sizes = [1, 8, 128], strides = [1, 1, 1]} : vector<8x8x128xf32> to vector<1x8x128xf32>
    %30 = vector.shape_cast %29 : vector<1x8x128xf32> to vector<8x128xf32>
    %31 = arith.mulf %30, %3 : vector<8x128xf32>
    %cst_25 = arith.constant dense<0.000000e+00> : vector<128xf32>
    %32 = vector.multi_reduction <add>, %31, %cst_25 [0] : vector<8x128xf32> to vector<128xf32>
    %33 = vector.shape_cast %32 : vector<128xf32> to vector<1x128xf32>
    %34 = vector.extract_strided_slice %7 {offsets = [4, 0, 0], sizes = [1, 8, 128], strides = [1, 1, 1]} : vector<8x8x128xf32> to vector<1x8x128xf32>
    %35 = vector.shape_cast %34 : vector<1x8x128xf32> to vector<8x128xf32>
    %36 = arith.mulf %35, %3 : vector<8x128xf32>
    %cst_26 = arith.constant dense<0.000000e+00> : vector<128xf32>
    %37 = vector.multi_reduction <add>, %36, %cst_26 [0] : vector<8x128xf32> to vector<128xf32>
    %38 = vector.shape_cast %37 : vector<128xf32> to vector<1x128xf32>
    %39 = vector.extract_strided_slice %7 {offsets = [5, 0, 0], sizes = [1, 8, 128], strides = [1, 1, 1]} : vector<8x8x128xf32> to vector<1x8x128xf32>
    %40 = vector.shape_cast %39 : vector<1x8x128xf32> to vector<8x128xf32>
    %41 = arith.mulf %40, %3 : vector<8x128xf32>
    %cst_27 = arith.constant dense<0.000000e+00> : vector<128xf32>
    %42 = vector.multi_reduction <add>, %41, %cst_27 [0] : vector<8x128xf32> to vector<128xf32>
    %43 = vector.shape_cast %42 : vector<128xf32> to vector<1x128xf32>
    %44 = vector.extract_strided_slice %7 {offsets = [6, 0, 0], sizes = [1, 8, 128], strides = [1, 1, 1]} : vector<8x8x128xf32> to vector<1x8x128xf32>
    %45 = vector.shape_cast %44 : vector<1x8x128xf32> to vector<8x128xf32>
    %46 = arith.mulf %45, %3 : vector<8x128xf32>
    %cst_28 = arith.constant dense<0.000000e+00> : vector<128xf32>
    %47 = vector.multi_reduction <add>, %46, %cst_28 [0] : vector<8x128xf32> to vector<128xf32>
    %48 = vector.shape_cast %47 : vector<128xf32> to vector<1x128xf32>
    %49 = vector.extract_strided_slice %7 {offsets = [7, 0, 0], sizes = [1, 8, 128], strides = [1, 1, 1]} : vector<8x8x128xf32> to vector<1x8x128xf32>
    %50 = vector.shape_cast %49 : vector<1x8x128xf32> to vector<8x128xf32>
    %51 = arith.mulf %50, %3 : vector<8x128xf32>
    %cst_29 = arith.constant dense<0.000000e+00> : vector<128xf32>
    %52 = vector.multi_reduction <add>, %51, %cst_29 [0] : vector<8x128xf32> to vector<128xf32>
    %53 = vector.shape_cast %52 : vector<128xf32> to vector<1x128xf32>
    %54 = tpu.concatenate %18, %23, %28, %33, %38, %43, %48, %53 in 0 : vector<1x128xf32>, vector<1x128xf32>, vector<1x128xf32>, vector<1x128xf32>, vector<1x128xf32>, vector<1x128xf32>, vector<1x128xf32>, vector<1x128xf32> -> vector<8x128xf32>
    %55 = vector.extract_strided_slice %9 {offsets = [0, 0, 0], sizes = [1, 8, 128], strides = [1, 1, 1]} : vector<4x8x128xf32> to vector<1x8x128xf32>
    %56 = vector.shape_cast %55 : vector<1x8x128xf32> to vector<8x128xf32>
    %57 = arith.mulf %56, %54 : vector<8x128xf32>
    %cst_30 = arith.constant dense<0.000000e+00> : vector<128xf32>
    %58 = vector.multi_reduction <add>, %57, %cst_30 [0] : vector<8x128xf32> to vector<128xf32>
    %59 = vector.shape_cast %58 : vector<128xf32> to vector<1x128xf32>
    %60 = vector.extract_strided_slice %9 {offsets = [1, 0, 0], sizes = [1, 8, 128], strides = [1, 1, 1]} : vector<4x8x128xf32> to vector<1x8x128xf32>
    %61 = vector.shape_cast %60 : vector<1x8x128xf32> to vector<8x128xf32>
    %62 = arith.mulf %61, %54 : vector<8x128xf32>
    %cst_31 = arith.constant dense<0.000000e+00> : vector<128xf32>
    %63 = vector.multi_reduction <add>, %62, %cst_31 [0] : vector<8x128xf32> to vector<128xf32>
    %64 = vector.shape_cast %63 : vector<128xf32> to vector<1x128xf32>
    %65 = vector.extract_strided_slice %9 {offsets = [2, 0, 0], sizes = [1, 8, 128], strides = [1, 1, 1]} : vector<4x8x128xf32> to vector<1x8x128xf32>
    %66 = vector.shape_cast %65 : vector<1x8x128xf32> to vector<8x128xf32>
    %67 = arith.mulf %66, %54 : vector<8x128xf32>
    %cst_32 = arith.constant dense<0.000000e+00> : vector<128xf32>
    %68 = vector.multi_reduction <add>, %67, %cst_32 [0] : vector<8x128xf32> to vector<128xf32>
    %69 = vector.shape_cast %68 : vector<128xf32> to vector<1x128xf32>
    %70 = vector.extract_strided_slice %9 {offsets = [3, 0, 0], sizes = [1, 8, 128], strides = [1, 1, 1]} : vector<4x8x128xf32> to vector<1x8x128xf32>
    %71 = vector.shape_cast %70 : vector<1x8x128xf32> to vector<8x128xf32>
    %72 = arith.mulf %71, %54 : vector<8x128xf32>
    %cst_33 = arith.constant dense<0.000000e+00> : vector<128xf32>
    %73 = vector.multi_reduction <add>, %72, %cst_33 [0] : vector<8x128xf32> to vector<128xf32>
    %74 = vector.shape_cast %73 : vector<128xf32> to vector<1x128xf32>
    %75 = tpu.concatenate %59, %64, %69, %74 in 0 : vector<1x128xf32>, vector<1x128xf32>, vector<1x128xf32>, vector<1x128xf32> -> vector<4x128xf32>
    %76 = arith.subf %1, %75 : vector<4x128xf32>
    %77 = vector.extract_strided_slice %7 {offsets = [0, 0, 0], sizes = [8, 1, 128], strides = [1, 1, 1]} : vector<8x8x128xf32> to vector<8x1x128xf32>
    %78 = vector.extract_strided_slice %5 {offsets = [0, 0, 0], sizes = [1, 8, 128], strides = [1, 1, 1]} : vector<8x8x128xf32> to vector<1x8x128xf32>
    %79 = vector.broadcast %77 : vector<8x1x128xf32> to vector<8x8x128xf32>
    %80 = vector.broadcast %78 : vector<1x8x128xf32> to vector<8x8x128xf32>
    %81 = arith.mulf %79, %80 : vector<8x8x128xf32>
    %82 = vector.extract_strided_slice %7 {offsets = [0, 1, 0], sizes = [8, 1, 128], strides = [1, 1, 1]} : vector<8x8x128xf32> to vector<8x1x128xf32>
    %83 = vector.extract_strided_slice %5 {offsets = [1, 0, 0], sizes = [1, 8, 128], strides = [1, 1, 1]} : vector<8x8x128xf32> to vector<1x8x128xf32>
    %84 = vector.broadcast %82 : vector<8x1x128xf32> to vector<8x8x128xf32>
    %85 = vector.broadcast %83 : vector<1x8x128xf32> to vector<8x8x128xf32>
    %86 = arith.mulf %84, %85 : vector<8x8x128xf32>
    %87 = arith.addf %81, %86 : vector<8x8x128xf32>
    %88 = vector.extract_strided_slice %7 {offsets = [0, 2, 0], sizes = [8, 1, 128], strides = [1, 1, 1]} : vector<8x8x128xf32> to vector<8x1x128xf32>
    %89 = vector.extract_strided_slice %5 {offsets = [2, 0, 0], sizes = [1, 8, 128], strides = [1, 1, 1]} : vector<8x8x128xf32> to vector<1x8x128xf32>
    %90 = vector.broadcast %88 : vector<8x1x128xf32> to vector<8x8x128xf32>
    %91 = vector.broadcast %89 : vector<1x8x128xf32> to vector<8x8x128xf32>
    %92 = arith.mulf %90, %91 : vector<8x8x128xf32>
    %93 = arith.addf %87, %92 : vector<8x8x128xf32>
    %94 = vector.extract_strided_slice %7 {offsets = [0, 3, 0], sizes = [8, 1, 128], strides = [1, 1, 1]} : vector<8x8x128xf32> to vector<8x1x128xf32>
    %95 = vector.extract_strided_slice %5 {offsets = [3, 0, 0], sizes = [1, 8, 128], strides = [1, 1, 1]} : vector<8x8x128xf32> to vector<1x8x128xf32>
    %96 = vector.broadcast %94 : vector<8x1x128xf32> to vector<8x8x128xf32>
    %97 = vector.broadcast %95 : vector<1x8x128xf32> to vector<8x8x128xf32>
    %98 = arith.mulf %96, %97 : vector<8x8x128xf32>
    %99 = arith.addf %93, %98 : vector<8x8x128xf32>
    %100 = vector.extract_strided_slice %7 {offsets = [0, 4, 0], sizes = [8, 1, 128], strides = [1, 1, 1]} : vector<8x8x128xf32> to vector<8x1x128xf32>
    %101 = vector.extract_strided_slice %5 {offsets = [4, 0, 0], sizes = [1, 8, 128], strides = [1, 1, 1]} : vector<8x8x128xf32> to vector<1x8x128xf32>
    %102 = vector.broadcast %100 : vector<8x1x128xf32> to vector<8x8x128xf32>
    %103 = vector.broadcast %101 : vector<1x8x128xf32> to vector<8x8x128xf32>
    %104 = arith.mulf %102, %103 : vector<8x8x128xf32>
    %105 = arith.addf %99, %104 : vector<8x8x128xf32>
    %106 = vector.extract_strided_slice %7 {offsets = [0, 5, 0], sizes = [8, 1, 128], strides = [1, 1, 1]} : vector<8x8x128xf32> to vector<8x1x128xf32>
    %107 = vector.extract_strided_slice %5 {offsets = [5, 0, 0], sizes = [1, 8, 128], strides = [1, 1, 1]} : vector<8x8x128xf32> to vector<1x8x128xf32>
    %108 = vector.broadcast %106 : vector<8x1x128xf32> to vector<8x8x128xf32>
    %109 = vector.broadcast %107 : vector<1x8x128xf32> to vector<8x8x128xf32>
    %110 = arith.mulf %108, %109 : vector<8x8x128xf32>
    %111 = arith.addf %105, %110 : vector<8x8x128xf32>
    %112 = vector.extract_strided_slice %7 {offsets = [0, 6, 0], sizes = [8, 1, 128], strides = [1, 1, 1]} : vector<8x8x128xf32> to vector<8x1x128xf32>
    %113 = vector.extract_strided_slice %5 {offsets = [6, 0, 0], sizes = [1, 8, 128], strides = [1, 1, 1]} : vector<8x8x128xf32> to vector<1x8x128xf32>
    %114 = vector.broadcast %112 : vector<8x1x128xf32> to vector<8x8x128xf32>
    %115 = vector.broadcast %113 : vector<1x8x128xf32> to vector<8x8x128xf32>
    %116 = arith.mulf %114, %115 : vector<8x8x128xf32>
    %117 = arith.addf %111, %116 : vector<8x8x128xf32>
    %118 = vector.extract_strided_slice %7 {offsets = [0, 7, 0], sizes = [8, 1, 128], strides = [1, 1, 1]} : vector<8x8x128xf32> to vector<8x1x128xf32>
    %119 = vector.extract_strided_slice %5 {offsets = [7, 0, 0], sizes = [1, 8, 128], strides = [1, 1, 1]} : vector<8x8x128xf32> to vector<1x8x128xf32>
    %120 = vector.broadcast %118 : vector<8x1x128xf32> to vector<8x8x128xf32>
    %121 = vector.broadcast %119 : vector<1x8x128xf32> to vector<8x8x128xf32>
    %122 = arith.mulf %120, %121 : vector<8x8x128xf32>
    %123 = arith.addf %117, %122 : vector<8x8x128xf32>
    %124 = vector.extract_strided_slice %11 {offsets = [0, 0], sizes = [1, 128], strides = [1, 1]} : vector<36x128xf32> to vector<1x128xf32>
    %cst_34 = arith.constant 0.000000e+00 : f32
    %125 = vector.broadcast %cst_34 : f32 to vector<7x128xf32>
    %126 = tpu.concatenate %124, %125 in 0 : vector<1x128xf32>, vector<7x128xf32> -> vector<8x128xf32>
    %127 = vector.extract_strided_slice %11 {offsets = [1, 0], sizes = [2, 128], strides = [1, 1]} : vector<36x128xf32> to vector<2x128xf32>
    %cst_35 = arith.constant 0.000000e+00 : f32
    %128 = vector.broadcast %cst_35 : f32 to vector<6x128xf32>
    %129 = tpu.concatenate %127, %128 in 0 : vector<2x128xf32>, vector<6x128xf32> -> vector<8x128xf32>
    %130 = vector.extract_strided_slice %11 {offsets = [3, 0], sizes = [3, 128], strides = [1, 1]} : vector<36x128xf32> to vector<3x128xf32>
    %cst_36 = arith.constant 0.000000e+00 : f32
    %131 = vector.broadcast %cst_36 : f32 to vector<5x128xf32>
    %132 = tpu.concatenate %130, %131 in 0 : vector<3x128xf32>, vector<5x128xf32> -> vector<8x128xf32>
    %133 = vector.extract_strided_slice %11 {offsets = [6, 0], sizes = [4, 128], strides = [1, 1]} : vector<36x128xf32> to vector<4x128xf32>
    %cst_37 = arith.constant 0.000000e+00 : f32
    %134 = vector.broadcast %cst_37 : f32 to vector<4x128xf32>
    %135 = tpu.concatenate %133, %134 in 0 : vector<4x128xf32>, vector<4x128xf32> -> vector<8x128xf32>
    %136 = vector.extract_strided_slice %11 {offsets = [10, 0], sizes = [5, 128], strides = [1, 1]} : vector<36x128xf32> to vector<5x128xf32>
    %cst_38 = arith.constant 0.000000e+00 : f32
    %137 = vector.broadcast %cst_38 : f32 to vector<3x128xf32>
    %138 = tpu.concatenate %136, %137 in 0 : vector<5x128xf32>, vector<3x128xf32> -> vector<8x128xf32>
    %139 = vector.extract_strided_slice %11 {offsets = [15, 0], sizes = [6, 128], strides = [1, 1]} : vector<36x128xf32> to vector<6x128xf32>
    %cst_39 = arith.constant 0.000000e+00 : f32
    %140 = vector.broadcast %cst_39 : f32 to vector<2x128xf32>
    %141 = tpu.concatenate %139, %140 in 0 : vector<6x128xf32>, vector<2x128xf32> -> vector<8x128xf32>
    %142 = vector.extract_strided_slice %11 {offsets = [21, 0], sizes = [7, 128], strides = [1, 1]} : vector<36x128xf32> to vector<7x128xf32>
    %cst_40 = arith.constant 0.000000e+00 : f32
    %143 = vector.broadcast %cst_40 : f32 to vector<1x128xf32>
    %144 = tpu.concatenate %142, %143 in 0 : vector<7x128xf32>, vector<1x128xf32> -> vector<8x128xf32>
    %145 = vector.extract_strided_slice %11 {offsets = [28, 0], sizes = [8, 128], strides = [1, 1]} : vector<36x128xf32> to vector<8x128xf32>
    %146 = vector.shape_cast %126 : vector<8x128xf32> to vector<1x8x128xf32>
    %147 = vector.shape_cast %129 : vector<8x128xf32> to vector<1x8x128xf32>
    %148 = vector.shape_cast %132 : vector<8x128xf32> to vector<1x8x128xf32>
    %149 = vector.shape_cast %135 : vector<8x128xf32> to vector<1x8x128xf32>
    %150 = vector.shape_cast %138 : vector<8x128xf32> to vector<1x8x128xf32>
    %151 = vector.shape_cast %141 : vector<8x128xf32> to vector<1x8x128xf32>
    %152 = vector.shape_cast %144 : vector<8x128xf32> to vector<1x8x128xf32>
    %153 = vector.shape_cast %145 : vector<8x128xf32> to vector<1x8x128xf32>
    %154 = tpu.concatenate %146, %147, %148, %149, %150, %151, %152, %153 in 0 : vector<1x8x128xf32>, vector<1x8x128xf32>, vector<1x8x128xf32>, vector<1x8x128xf32>, vector<1x8x128xf32>, vector<1x8x128xf32>, vector<1x8x128xf32>, vector<1x8x128xf32> -> vector<8x8x128xf32>
    %155 = vector.extract_strided_slice %7 {offsets = [0, 0, 0], sizes = [1, 8, 128], strides = [1, 1, 1]} : vector<8x8x128xf32> to vector<1x8x128xf32>
    %156 = vector.broadcast %155 : vector<1x8x128xf32> to vector<8x8x128xf32>
    %157 = arith.mulf %123, %156 : vector<8x8x128xf32>
    %cst_41 = arith.constant dense<0.000000e+00> : vector<8x128xf32>
    %158 = vector.multi_reduction <add>, %157, %cst_41 [1] : vector<8x8x128xf32> to vector<8x128xf32>
    %159 = vector.shape_cast %158 : vector<8x128xf32> to vector<8x1x128xf32>
    %160 = vector.extract_strided_slice %7 {offsets = [1, 0, 0], sizes = [1, 8, 128], strides = [1, 1, 1]} : vector<8x8x128xf32> to vector<1x8x128xf32>
    %161 = vector.broadcast %160 : vector<1x8x128xf32> to vector<8x8x128xf32>
    %162 = arith.mulf %123, %161 : vector<8x8x128xf32>
    %cst_42 = arith.constant dense<0.000000e+00> : vector<8x128xf32>
    %163 = vector.multi_reduction <add>, %162, %cst_42 [1] : vector<8x8x128xf32> to vector<8x128xf32>
    %164 = vector.shape_cast %163 : vector<8x128xf32> to vector<8x1x128xf32>
    %165 = vector.extract_strided_slice %7 {offsets = [2, 0, 0], sizes = [1, 8, 128], strides = [1, 1, 1]} : vector<8x8x128xf32> to vector<1x8x128xf32>
    %166 = vector.broadcast %165 : vector<1x8x128xf32> to vector<8x8x128xf32>
    %167 = arith.mulf %123, %166 : vector<8x8x128xf32>
    %cst_43 = arith.constant dense<0.000000e+00> : vector<8x128xf32>
    %168 = vector.multi_reduction <add>, %167, %cst_43 [1] : vector<8x8x128xf32> to vector<8x128xf32>
    %169 = vector.shape_cast %168 : vector<8x128xf32> to vector<8x1x128xf32>
    %170 = vector.extract_strided_slice %7 {offsets = [3, 0, 0], sizes = [1, 8, 128], strides = [1, 1, 1]} : vector<8x8x128xf32> to vector<1x8x128xf32>
    %171 = vector.broadcast %170 : vector<1x8x128xf32> to vector<8x8x128xf32>
    %172 = arith.mulf %123, %171 : vector<8x8x128xf32>
    %cst_44 = arith.constant dense<0.000000e+00> : vector<8x128xf32>
    %173 = vector.multi_reduction <add>, %172, %cst_44 [1] : vector<8x8x128xf32> to vector<8x128xf32>
    %174 = vector.shape_cast %173 : vector<8x128xf32> to vector<8x1x128xf32>
    %175 = vector.extract_strided_slice %7 {offsets = [4, 0, 0], sizes = [1, 8, 128], strides = [1, 1, 1]} : vector<8x8x128xf32> to vector<1x8x128xf32>
    %176 = vector.broadcast %175 : vector<1x8x128xf32> to vector<8x8x128xf32>
    %177 = arith.mulf %123, %176 : vector<8x8x128xf32>
    %cst_45 = arith.constant dense<0.000000e+00> : vector<8x128xf32>
    %178 = vector.multi_reduction <add>, %177, %cst_45 [1] : vector<8x8x128xf32> to vector<8x128xf32>
    %179 = vector.shape_cast %178 : vector<8x128xf32> to vector<8x1x128xf32>
    %180 = vector.extract_strided_slice %7 {offsets = [5, 0, 0], sizes = [1, 8, 128], strides = [1, 1, 1]} : vector<8x8x128xf32> to vector<1x8x128xf32>
    %181 = vector.broadcast %180 : vector<1x8x128xf32> to vector<8x8x128xf32>
    %182 = arith.mulf %123, %181 : vector<8x8x128xf32>
    %cst_46 = arith.constant dense<0.000000e+00> : vector<8x128xf32>
    %183 = vector.multi_reduction <add>, %182, %cst_46 [1] : vector<8x8x128xf32> to vector<8x128xf32>
    %184 = vector.shape_cast %183 : vector<8x128xf32> to vector<8x1x128xf32>
    %185 = vector.extract_strided_slice %7 {offsets = [6, 0, 0], sizes = [1, 8, 128], strides = [1, 1, 1]} : vector<8x8x128xf32> to vector<1x8x128xf32>
    %186 = vector.broadcast %185 : vector<1x8x128xf32> to vector<8x8x128xf32>
    %187 = arith.mulf %123, %186 : vector<8x8x128xf32>
    %cst_47 = arith.constant dense<0.000000e+00> : vector<8x128xf32>
    %188 = vector.multi_reduction <add>, %187, %cst_47 [1] : vector<8x8x128xf32> to vector<8x128xf32>
    %189 = vector.shape_cast %188 : vector<8x128xf32> to vector<8x1x128xf32>
    %190 = vector.extract_strided_slice %7 {offsets = [7, 0, 0], sizes = [1, 8, 128], strides = [1, 1, 1]} : vector<8x8x128xf32> to vector<1x8x128xf32>
    %191 = vector.broadcast %190 : vector<1x8x128xf32> to vector<8x8x128xf32>
    %192 = arith.mulf %123, %191 : vector<8x8x128xf32>
    %cst_48 = arith.constant dense<0.000000e+00> : vector<8x128xf32>
    %193 = vector.multi_reduction <add>, %192, %cst_48 [1] : vector<8x8x128xf32> to vector<8x128xf32>
    %194 = vector.shape_cast %193 : vector<8x128xf32> to vector<8x1x128xf32>
    %195 = tpu.concatenate %159, %164, %169, %174, %179, %184, %189, %194 in 1 : vector<8x1x128xf32>, vector<8x1x128xf32>, vector<8x1x128xf32>, vector<8x1x128xf32>, vector<8x1x128xf32>, vector<8x1x128xf32>, vector<8x1x128xf32>, vector<8x1x128xf32> -> vector<8x8x128xf32>
    %196 = vector.extract_strided_slice %154 {offsets = [0, 0, 0], sizes = [1, 8, 128], strides = [1, 1, 1]} : vector<8x8x128xf32> to vector<1x8x128xf32>
    %197 = vector.broadcast %196 : vector<1x8x128xf32> to vector<8x8x128xf32>
    %198 = arith.mulf %154, %197 : vector<8x8x128xf32>
    %cst_49 = arith.constant dense<0.000000e+00> : vector<8x128xf32>
    %199 = vector.multi_reduction <add>, %198, %cst_49 [1] : vector<8x8x128xf32> to vector<8x128xf32>
    %200 = vector.shape_cast %199 : vector<8x128xf32> to vector<8x1x128xf32>
    %201 = vector.extract_strided_slice %154 {offsets = [1, 0, 0], sizes = [1, 8, 128], strides = [1, 1, 1]} : vector<8x8x128xf32> to vector<1x8x128xf32>
    %202 = vector.broadcast %201 : vector<1x8x128xf32> to vector<8x8x128xf32>
    %203 = arith.mulf %154, %202 : vector<8x8x128xf32>
    %cst_50 = arith.constant dense<0.000000e+00> : vector<8x128xf32>
    %204 = vector.multi_reduction <add>, %203, %cst_50 [1] : vector<8x8x128xf32> to vector<8x128xf32>
    %205 = vector.shape_cast %204 : vector<8x128xf32> to vector<8x1x128xf32>
    %206 = vector.extract_strided_slice %154 {offsets = [2, 0, 0], sizes = [1, 8, 128], strides = [1, 1, 1]} : vector<8x8x128xf32> to vector<1x8x128xf32>
    %207 = vector.broadcast %206 : vector<1x8x128xf32> to vector<8x8x128xf32>
    %208 = arith.mulf %154, %207 : vector<8x8x128xf32>
    %cst_51 = arith.constant dense<0.000000e+00> : vector<8x128xf32>
    %209 = vector.multi_reduction <add>, %208, %cst_51 [1] : vector<8x8x128xf32> to vector<8x128xf32>
    %210 = vector.shape_cast %209 : vector<8x128xf32> to vector<8x1x128xf32>
    %211 = vector.extract_strided_slice %154 {offsets = [3, 0, 0], sizes = [1, 8, 128], strides = [1, 1, 1]} : vector<8x8x128xf32> to vector<1x8x128xf32>
    %212 = vector.broadcast %211 : vector<1x8x128xf32> to vector<8x8x128xf32>
    %213 = arith.mulf %154, %212 : vector<8x8x128xf32>
    %cst_52 = arith.constant dense<0.000000e+00> : vector<8x128xf32>
    %214 = vector.multi_reduction <add>, %213, %cst_52 [1] : vector<8x8x128xf32> to vector<8x128xf32>
    %215 = vector.shape_cast %214 : vector<8x128xf32> to vector<8x1x128xf32>
    %216 = vector.extract_strided_slice %154 {offsets = [4, 0, 0], sizes = [1, 8, 128], strides = [1, 1, 1]} : vector<8x8x128xf32> to vector<1x8x128xf32>
    %217 = vector.broadcast %216 : vector<1x8x128xf32> to vector<8x8x128xf32>
    %218 = arith.mulf %154, %217 : vector<8x8x128xf32>
    %cst_53 = arith.constant dense<0.000000e+00> : vector<8x128xf32>
    %219 = vector.multi_reduction <add>, %218, %cst_53 [1] : vector<8x8x128xf32> to vector<8x128xf32>
    %220 = vector.shape_cast %219 : vector<8x128xf32> to vector<8x1x128xf32>
    %221 = vector.extract_strided_slice %154 {offsets = [5, 0, 0], sizes = [1, 8, 128], strides = [1, 1, 1]} : vector<8x8x128xf32> to vector<1x8x128xf32>
    %222 = vector.broadcast %221 : vector<1x8x128xf32> to vector<8x8x128xf32>
    %223 = arith.mulf %154, %222 : vector<8x8x128xf32>
    %cst_54 = arith.constant dense<0.000000e+00> : vector<8x128xf32>
    %224 = vector.multi_reduction <add>, %223, %cst_54 [1] : vector<8x8x128xf32> to vector<8x128xf32>
    %225 = vector.shape_cast %224 : vector<8x128xf32> to vector<8x1x128xf32>
    %226 = vector.extract_strided_slice %154 {offsets = [6, 0, 0], sizes = [1, 8, 128], strides = [1, 1, 1]} : vector<8x8x128xf32> to vector<1x8x128xf32>
    %227 = vector.broadcast %226 : vector<1x8x128xf32> to vector<8x8x128xf32>
    %228 = arith.mulf %154, %227 : vector<8x8x128xf32>
    %cst_55 = arith.constant dense<0.000000e+00> : vector<8x128xf32>
    %229 = vector.multi_reduction <add>, %228, %cst_55 [1] : vector<8x8x128xf32> to vector<8x128xf32>
    %230 = vector.shape_cast %229 : vector<8x128xf32> to vector<8x1x128xf32>
    %231 = vector.extract_strided_slice %154 {offsets = [7, 0, 0], sizes = [1, 8, 128], strides = [1, 1, 1]} : vector<8x8x128xf32> to vector<1x8x128xf32>
    %232 = vector.broadcast %231 : vector<1x8x128xf32> to vector<8x8x128xf32>
    %233 = arith.mulf %154, %232 : vector<8x8x128xf32>
    %cst_56 = arith.constant dense<0.000000e+00> : vector<8x128xf32>
    %234 = vector.multi_reduction <add>, %233, %cst_56 [1] : vector<8x8x128xf32> to vector<8x128xf32>
    %235 = vector.shape_cast %234 : vector<8x128xf32> to vector<8x1x128xf32>
    %236 = tpu.concatenate %200, %205, %210, %215, %220, %225, %230, %235 in 1 : vector<8x1x128xf32>, vector<8x1x128xf32>, vector<8x1x128xf32>, vector<8x1x128xf32>, vector<8x1x128xf32>, vector<8x1x128xf32>, vector<8x1x128xf32>, vector<8x1x128xf32> -> vector<8x8x128xf32>
    %237 = arith.addf %195, %236 : vector<8x8x128xf32>
    %238 = vector.extract_strided_slice %9 {offsets = [0, 0, 0], sizes = [4, 1, 128], strides = [1, 1, 1]} : vector<4x8x128xf32> to vector<4x1x128xf32>
    %239 = vector.extract_strided_slice %237 {offsets = [0, 0, 0], sizes = [1, 8, 128], strides = [1, 1, 1]} : vector<8x8x128xf32> to vector<1x8x128xf32>
    %240 = vector.broadcast %238 : vector<4x1x128xf32> to vector<4x8x128xf32>
    %241 = vector.broadcast %239 : vector<1x8x128xf32> to vector<4x8x128xf32>
    %242 = arith.mulf %240, %241 : vector<4x8x128xf32>
    %243 = vector.extract_strided_slice %9 {offsets = [0, 1, 0], sizes = [4, 1, 128], strides = [1, 1, 1]} : vector<4x8x128xf32> to vector<4x1x128xf32>
    %244 = vector.extract_strided_slice %237 {offsets = [1, 0, 0], sizes = [1, 8, 128], strides = [1, 1, 1]} : vector<8x8x128xf32> to vector<1x8x128xf32>
    %245 = vector.broadcast %243 : vector<4x1x128xf32> to vector<4x8x128xf32>
    %246 = vector.broadcast %244 : vector<1x8x128xf32> to vector<4x8x128xf32>
    %247 = arith.mulf %245, %246 : vector<4x8x128xf32>
    %248 = arith.addf %242, %247 : vector<4x8x128xf32>
    %249 = vector.extract_strided_slice %9 {offsets = [0, 2, 0], sizes = [4, 1, 128], strides = [1, 1, 1]} : vector<4x8x128xf32> to vector<4x1x128xf32>
    %250 = vector.extract_strided_slice %237 {offsets = [2, 0, 0], sizes = [1, 8, 128], strides = [1, 1, 1]} : vector<8x8x128xf32> to vector<1x8x128xf32>
    %251 = vector.broadcast %249 : vector<4x1x128xf32> to vector<4x8x128xf32>
    %252 = vector.broadcast %250 : vector<1x8x128xf32> to vector<4x8x128xf32>
    %253 = arith.mulf %251, %252 : vector<4x8x128xf32>
    %254 = arith.addf %248, %253 : vector<4x8x128xf32>
    %255 = vector.extract_strided_slice %9 {offsets = [0, 3, 0], sizes = [4, 1, 128], strides = [1, 1, 1]} : vector<4x8x128xf32> to vector<4x1x128xf32>
    %256 = vector.extract_strided_slice %237 {offsets = [3, 0, 0], sizes = [1, 8, 128], strides = [1, 1, 1]} : vector<8x8x128xf32> to vector<1x8x128xf32>
    %257 = vector.broadcast %255 : vector<4x1x128xf32> to vector<4x8x128xf32>
    %258 = vector.broadcast %256 : vector<1x8x128xf32> to vector<4x8x128xf32>
    %259 = arith.mulf %257, %258 : vector<4x8x128xf32>
    %260 = arith.addf %254, %259 : vector<4x8x128xf32>
    %261 = vector.extract_strided_slice %9 {offsets = [0, 4, 0], sizes = [4, 1, 128], strides = [1, 1, 1]} : vector<4x8x128xf32> to vector<4x1x128xf32>
    %262 = vector.extract_strided_slice %237 {offsets = [4, 0, 0], sizes = [1, 8, 128], strides = [1, 1, 1]} : vector<8x8x128xf32> to vector<1x8x128xf32>
    %263 = vector.broadcast %261 : vector<4x1x128xf32> to vector<4x8x128xf32>
    %264 = vector.broadcast %262 : vector<1x8x128xf32> to vector<4x8x128xf32>
    %265 = arith.mulf %263, %264 : vector<4x8x128xf32>
    %266 = arith.addf %260, %265 : vector<4x8x128xf32>
    %267 = vector.extract_strided_slice %9 {offsets = [0, 5, 0], sizes = [4, 1, 128], strides = [1, 1, 1]} : vector<4x8x128xf32> to vector<4x1x128xf32>
    %268 = vector.extract_strided_slice %237 {offsets = [5, 0, 0], sizes = [1, 8, 128], strides = [1, 1, 1]} : vector<8x8x128xf32> to vector<1x8x128xf32>
    %269 = vector.broadcast %267 : vector<4x1x128xf32> to vector<4x8x128xf32>
    %270 = vector.broadcast %268 : vector<1x8x128xf32> to vector<4x8x128xf32>
    %271 = arith.mulf %269, %270 : vector<4x8x128xf32>
    %272 = arith.addf %266, %271 : vector<4x8x128xf32>
    %273 = vector.extract_strided_slice %9 {offsets = [0, 6, 0], sizes = [4, 1, 128], strides = [1, 1, 1]} : vector<4x8x128xf32> to vector<4x1x128xf32>
    %274 = vector.extract_strided_slice %237 {offsets = [6, 0, 0], sizes = [1, 8, 128], strides = [1, 1, 1]} : vector<8x8x128xf32> to vector<1x8x128xf32>
    %275 = vector.broadcast %273 : vector<4x1x128xf32> to vector<4x8x128xf32>
    %276 = vector.broadcast %274 : vector<1x8x128xf32> to vector<4x8x128xf32>
    %277 = arith.mulf %275, %276 : vector<4x8x128xf32>
    %278 = arith.addf %272, %277 : vector<4x8x128xf32>
    %279 = vector.extract_strided_slice %9 {offsets = [0, 7, 0], sizes = [4, 1, 128], strides = [1, 1, 1]} : vector<4x8x128xf32> to vector<4x1x128xf32>
    %280 = vector.extract_strided_slice %237 {offsets = [7, 0, 0], sizes = [1, 8, 128], strides = [1, 1, 1]} : vector<8x8x128xf32> to vector<1x8x128xf32>
    %281 = vector.broadcast %279 : vector<4x1x128xf32> to vector<4x8x128xf32>
    %282 = vector.broadcast %280 : vector<1x8x128xf32> to vector<4x8x128xf32>
    %283 = arith.mulf %281, %282 : vector<4x8x128xf32>
    %284 = arith.addf %278, %283 : vector<4x8x128xf32>
    %285 = vector.extract_strided_slice %13 {offsets = [0, 0], sizes = [1, 128], strides = [1, 1]} : vector<10x128xf32> to vector<1x128xf32>
    %cst_57 = arith.constant 0.000000e+00 : f32
    %286 = vector.broadcast %cst_57 : f32 to vector<3x128xf32>
    %287 = tpu.concatenate %285, %286 in 0 : vector<1x128xf32>, vector<3x128xf32> -> vector<4x128xf32>
    %288 = vector.extract_strided_slice %13 {offsets = [1, 0], sizes = [2, 128], strides = [1, 1]} : vector<10x128xf32> to vector<2x128xf32>
    %cst_58 = arith.constant 0.000000e+00 : f32
    %289 = vector.broadcast %cst_58 : f32 to vector<2x128xf32>
    %290 = tpu.concatenate %288, %289 in 0 : vector<2x128xf32>, vector<2x128xf32> -> vector<4x128xf32>
    %291 = vector.extract_strided_slice %13 {offsets = [3, 0], sizes = [3, 128], strides = [1, 1]} : vector<10x128xf32> to vector<3x128xf32>
    %cst_59 = arith.constant 0.000000e+00 : f32
    %292 = vector.broadcast %cst_59 : f32 to vector<1x128xf32>
    %293 = tpu.concatenate %291, %292 in 0 : vector<3x128xf32>, vector<1x128xf32> -> vector<4x128xf32>
    %294 = vector.extract_strided_slice %13 {offsets = [6, 0], sizes = [4, 128], strides = [1, 1]} : vector<10x128xf32> to vector<4x128xf32>
    %295 = vector.shape_cast %287 : vector<4x128xf32> to vector<1x4x128xf32>
    %296 = vector.shape_cast %290 : vector<4x128xf32> to vector<1x4x128xf32>
    %297 = vector.shape_cast %293 : vector<4x128xf32> to vector<1x4x128xf32>
    %298 = vector.shape_cast %294 : vector<4x128xf32> to vector<1x4x128xf32>
    %299 = tpu.concatenate %295, %296, %297, %298 in 0 : vector<1x4x128xf32>, vector<1x4x128xf32>, vector<1x4x128xf32>, vector<1x4x128xf32> -> vector<4x4x128xf32>
    %300 = vector.extract_strided_slice %9 {offsets = [0, 0, 0], sizes = [1, 8, 128], strides = [1, 1, 1]} : vector<4x8x128xf32> to vector<1x8x128xf32>
    %301 = vector.broadcast %300 : vector<1x8x128xf32> to vector<4x8x128xf32>
    %302 = arith.mulf %284, %301 : vector<4x8x128xf32>
    %cst_60 = arith.constant dense<0.000000e+00> : vector<4x128xf32>
    %303 = vector.multi_reduction <add>, %302, %cst_60 [1] : vector<4x8x128xf32> to vector<4x128xf32>
    %304 = vector.shape_cast %303 : vector<4x128xf32> to vector<4x1x128xf32>
    %305 = vector.extract_strided_slice %9 {offsets = [1, 0, 0], sizes = [1, 8, 128], strides = [1, 1, 1]} : vector<4x8x128xf32> to vector<1x8x128xf32>
    %306 = vector.broadcast %305 : vector<1x8x128xf32> to vector<4x8x128xf32>
    %307 = arith.mulf %284, %306 : vector<4x8x128xf32>
    %cst_61 = arith.constant dense<0.000000e+00> : vector<4x128xf32>
    %308 = vector.multi_reduction <add>, %307, %cst_61 [1] : vector<4x8x128xf32> to vector<4x128xf32>
    %309 = vector.shape_cast %308 : vector<4x128xf32> to vector<4x1x128xf32>
    %310 = vector.extract_strided_slice %9 {offsets = [2, 0, 0], sizes = [1, 8, 128], strides = [1, 1, 1]} : vector<4x8x128xf32> to vector<1x8x128xf32>
    %311 = vector.broadcast %310 : vector<1x8x128xf32> to vector<4x8x128xf32>
    %312 = arith.mulf %284, %311 : vector<4x8x128xf32>
    %cst_62 = arith.constant dense<0.000000e+00> : vector<4x128xf32>
    %313 = vector.multi_reduction <add>, %312, %cst_62 [1] : vector<4x8x128xf32> to vector<4x128xf32>
    %314 = vector.shape_cast %313 : vector<4x128xf32> to vector<4x1x128xf32>
    %315 = vector.extract_strided_slice %9 {offsets = [3, 0, 0], sizes = [1, 8, 128], strides = [1, 1, 1]} : vector<4x8x128xf32> to vector<1x8x128xf32>
    %316 = vector.broadcast %315 : vector<1x8x128xf32> to vector<4x8x128xf32>
    %317 = arith.mulf %284, %316 : vector<4x8x128xf32>
    %cst_63 = arith.constant dense<0.000000e+00> : vector<4x128xf32>
    %318 = vector.multi_reduction <add>, %317, %cst_63 [1] : vector<4x8x128xf32> to vector<4x128xf32>
    %319 = vector.shape_cast %318 : vector<4x128xf32> to vector<4x1x128xf32>
    %320 = tpu.concatenate %304, %309, %314, %319 in 1 : vector<4x1x128xf32>, vector<4x1x128xf32>, vector<4x1x128xf32>, vector<4x1x128xf32> -> vector<4x4x128xf32>
    %321 = vector.extract_strided_slice %299 {offsets = [0, 0, 0], sizes = [1, 4, 128], strides = [1, 1, 1]} : vector<4x4x128xf32> to vector<1x4x128xf32>
    %322 = vector.broadcast %321 : vector<1x4x128xf32> to vector<4x4x128xf32>
    %323 = arith.mulf %299, %322 : vector<4x4x128xf32>
    %cst_64 = arith.constant dense<0.000000e+00> : vector<4x128xf32>
    %324 = vector.multi_reduction <add>, %323, %cst_64 [1] : vector<4x4x128xf32> to vector<4x128xf32>
    %325 = vector.shape_cast %324 : vector<4x128xf32> to vector<4x1x128xf32>
    %326 = vector.extract_strided_slice %299 {offsets = [1, 0, 0], sizes = [1, 4, 128], strides = [1, 1, 1]} : vector<4x4x128xf32> to vector<1x4x128xf32>
    %327 = vector.broadcast %326 : vector<1x4x128xf32> to vector<4x4x128xf32>
    %328 = arith.mulf %299, %327 : vector<4x4x128xf32>
    %cst_65 = arith.constant dense<0.000000e+00> : vector<4x128xf32>
    %329 = vector.multi_reduction <add>, %328, %cst_65 [1] : vector<4x4x128xf32> to vector<4x128xf32>
    %330 = vector.shape_cast %329 : vector<4x128xf32> to vector<4x1x128xf32>
    %331 = vector.extract_strided_slice %299 {offsets = [2, 0, 0], sizes = [1, 4, 128], strides = [1, 1, 1]} : vector<4x4x128xf32> to vector<1x4x128xf32>
    %332 = vector.broadcast %331 : vector<1x4x128xf32> to vector<4x4x128xf32>
    %333 = arith.mulf %299, %332 : vector<4x4x128xf32>
    %cst_66 = arith.constant dense<0.000000e+00> : vector<4x128xf32>
    %334 = vector.multi_reduction <add>, %333, %cst_66 [1] : vector<4x4x128xf32> to vector<4x128xf32>
    %335 = vector.shape_cast %334 : vector<4x128xf32> to vector<4x1x128xf32>
    %336 = vector.extract_strided_slice %299 {offsets = [3, 0, 0], sizes = [1, 4, 128], strides = [1, 1, 1]} : vector<4x4x128xf32> to vector<1x4x128xf32>
    %337 = vector.broadcast %336 : vector<1x4x128xf32> to vector<4x4x128xf32>
    %338 = arith.mulf %299, %337 : vector<4x4x128xf32>
    %cst_67 = arith.constant dense<0.000000e+00> : vector<4x128xf32>
    %339 = vector.multi_reduction <add>, %338, %cst_67 [1] : vector<4x4x128xf32> to vector<4x128xf32>
    %340 = vector.shape_cast %339 : vector<4x128xf32> to vector<4x1x128xf32>
    %341 = tpu.concatenate %325, %330, %335, %340 in 1 : vector<4x1x128xf32>, vector<4x1x128xf32>, vector<4x1x128xf32>, vector<4x1x128xf32> -> vector<4x4x128xf32>
    %342 = arith.addf %320, %341 : vector<4x4x128xf32>
    %343 = vector.extract_strided_slice %342 {offsets = [0, 0, 0], sizes = [1, 1, 128], strides = [1, 1, 1]} : vector<4x4x128xf32> to vector<1x1x128xf32>
    %344 = vector.shape_cast %343 : vector<1x1x128xf32> to vector<1x128xf32>
    %345 = math.rsqrt %344 : vector<1x128xf32>
    %346 = vector.extract_strided_slice %342 {offsets = [1, 0, 0], sizes = [1, 1, 128], strides = [1, 1, 1]} : vector<4x4x128xf32> to vector<1x1x128xf32>
    %347 = vector.shape_cast %346 : vector<1x1x128xf32> to vector<1x128xf32>
    %348 = arith.mulf %347, %345 : vector<1x128xf32>
    %349 = vector.extract_strided_slice %342 {offsets = [2, 0, 0], sizes = [1, 1, 128], strides = [1, 1, 1]} : vector<4x4x128xf32> to vector<1x1x128xf32>
    %350 = vector.shape_cast %349 : vector<1x1x128xf32> to vector<1x128xf32>
    %351 = arith.mulf %350, %345 : vector<1x128xf32>
    %352 = vector.extract_strided_slice %342 {offsets = [3, 0, 0], sizes = [1, 1, 128], strides = [1, 1, 1]} : vector<4x4x128xf32> to vector<1x1x128xf32>
    %353 = vector.shape_cast %352 : vector<1x1x128xf32> to vector<1x128xf32>
    %354 = arith.mulf %353, %345 : vector<1x128xf32>
    %355 = vector.extract_strided_slice %342 {offsets = [1, 1, 0], sizes = [1, 1, 128], strides = [1, 1, 1]} : vector<4x4x128xf32> to vector<1x1x128xf32>
    %356 = vector.shape_cast %355 : vector<1x1x128xf32> to vector<1x128xf32>
    %357 = arith.mulf %348, %348 : vector<1x128xf32>
    %358 = arith.subf %356, %357 : vector<1x128xf32>
    %359 = math.rsqrt %358 : vector<1x128xf32>
    %360 = vector.extract_strided_slice %342 {offsets = [2, 1, 0], sizes = [1, 1, 128], strides = [1, 1, 1]} : vector<4x4x128xf32> to vector<1x1x128xf32>
    %361 = vector.shape_cast %360 : vector<1x1x128xf32> to vector<1x128xf32>
    %362 = arith.mulf %351, %348 : vector<1x128xf32>
    %363 = arith.subf %361, %362 : vector<1x128xf32>
    %364 = arith.mulf %363, %359 : vector<1x128xf32>
    %365 = vector.extract_strided_slice %342 {offsets = [3, 1, 0], sizes = [1, 1, 128], strides = [1, 1, 1]} : vector<4x4x128xf32> to vector<1x1x128xf32>
    %366 = vector.shape_cast %365 : vector<1x1x128xf32> to vector<1x128xf32>
    %367 = arith.mulf %354, %348 : vector<1x128xf32>
    %368 = arith.subf %366, %367 : vector<1x128xf32>
    %369 = arith.mulf %368, %359 : vector<1x128xf32>
    %370 = vector.extract_strided_slice %342 {offsets = [2, 2, 0], sizes = [1, 1, 128], strides = [1, 1, 1]} : vector<4x4x128xf32> to vector<1x1x128xf32>
    %371 = vector.shape_cast %370 : vector<1x1x128xf32> to vector<1x128xf32>
    %372 = arith.mulf %351, %351 : vector<1x128xf32>
    %373 = arith.subf %371, %372 : vector<1x128xf32>
    %374 = arith.mulf %364, %364 : vector<1x128xf32>
    %375 = arith.subf %373, %374 : vector<1x128xf32>
    %376 = math.rsqrt %375 : vector<1x128xf32>
    %377 = vector.extract_strided_slice %342 {offsets = [3, 2, 0], sizes = [1, 1, 128], strides = [1, 1, 1]} : vector<4x4x128xf32> to vector<1x1x128xf32>
    %378 = vector.shape_cast %377 : vector<1x1x128xf32> to vector<1x128xf32>
    %379 = arith.mulf %354, %351 : vector<1x128xf32>
    %380 = arith.subf %378, %379 : vector<1x128xf32>
    %381 = arith.mulf %369, %364 : vector<1x128xf32>
    %382 = arith.subf %380, %381 : vector<1x128xf32>
    %383 = arith.mulf %382, %376 : vector<1x128xf32>
    %384 = vector.extract_strided_slice %342 {offsets = [3, 3, 0], sizes = [1, 1, 128], strides = [1, 1, 1]} : vector<4x4x128xf32> to vector<1x1x128xf32>
    %385 = vector.shape_cast %384 : vector<1x1x128xf32> to vector<1x128xf32>
    %386 = arith.mulf %354, %354 : vector<1x128xf32>
    %387 = arith.subf %385, %386 : vector<1x128xf32>
    %388 = arith.mulf %369, %369 : vector<1x128xf32>
    %389 = arith.subf %387, %388 : vector<1x128xf32>
    %390 = arith.mulf %383, %383 : vector<1x128xf32>
    %391 = arith.subf %389, %390 : vector<1x128xf32>
    %392 = math.rsqrt %391 : vector<1x128xf32>
    %393 = vector.extract_strided_slice %284 {offsets = [0, 0, 0], sizes = [1, 8, 128], strides = [1, 1, 1]} : vector<4x8x128xf32> to vector<1x8x128xf32>
    %394 = vector.shape_cast %393 : vector<1x8x128xf32> to vector<8x128xf32>
    %395 = vector.broadcast %345 : vector<1x128xf32> to vector<8x128xf32>
    %396 = arith.mulf %394, %395 : vector<8x128xf32>
    %397 = vector.extract_strided_slice %284 {offsets = [1, 0, 0], sizes = [1, 8, 128], strides = [1, 1, 1]} : vector<4x8x128xf32> to vector<1x8x128xf32>
    %398 = vector.shape_cast %397 : vector<1x8x128xf32> to vector<8x128xf32>
    %399 = vector.broadcast %348 : vector<1x128xf32> to vector<8x128xf32>
    %400 = arith.mulf %399, %396 : vector<8x128xf32>
    %401 = arith.subf %398, %400 : vector<8x128xf32>
    %402 = vector.broadcast %359 : vector<1x128xf32> to vector<8x128xf32>
    %403 = arith.mulf %401, %402 : vector<8x128xf32>
    %404 = vector.extract_strided_slice %284 {offsets = [2, 0, 0], sizes = [1, 8, 128], strides = [1, 1, 1]} : vector<4x8x128xf32> to vector<1x8x128xf32>
    %405 = vector.shape_cast %404 : vector<1x8x128xf32> to vector<8x128xf32>
    %406 = vector.broadcast %351 : vector<1x128xf32> to vector<8x128xf32>
    %407 = arith.mulf %406, %396 : vector<8x128xf32>
    %408 = arith.subf %405, %407 : vector<8x128xf32>
    %409 = vector.broadcast %364 : vector<1x128xf32> to vector<8x128xf32>
    %410 = arith.mulf %409, %403 : vector<8x128xf32>
    %411 = arith.subf %408, %410 : vector<8x128xf32>
    %412 = vector.broadcast %376 : vector<1x128xf32> to vector<8x128xf32>
    %413 = arith.mulf %411, %412 : vector<8x128xf32>
    %414 = vector.extract_strided_slice %284 {offsets = [3, 0, 0], sizes = [1, 8, 128], strides = [1, 1, 1]} : vector<4x8x128xf32> to vector<1x8x128xf32>
    %415 = vector.shape_cast %414 : vector<1x8x128xf32> to vector<8x128xf32>
    %416 = vector.broadcast %354 : vector<1x128xf32> to vector<8x128xf32>
    %417 = arith.mulf %416, %396 : vector<8x128xf32>
    %418 = arith.subf %415, %417 : vector<8x128xf32>
    %419 = vector.broadcast %369 : vector<1x128xf32> to vector<8x128xf32>
    %420 = arith.mulf %419, %403 : vector<8x128xf32>
    %421 = arith.subf %418, %420 : vector<8x128xf32>
    %422 = vector.broadcast %383 : vector<1x128xf32> to vector<8x128xf32>
    %423 = arith.mulf %422, %413 : vector<8x128xf32>
    %424 = arith.subf %421, %423 : vector<8x128xf32>
    %425 = vector.broadcast %392 : vector<1x128xf32> to vector<8x128xf32>
    %426 = arith.mulf %424, %425 : vector<8x128xf32>
    %427 = vector.broadcast %392 : vector<1x128xf32> to vector<8x128xf32>
    %428 = arith.mulf %426, %427 : vector<8x128xf32>
    %429 = vector.broadcast %383 : vector<1x128xf32> to vector<8x128xf32>
    %430 = arith.mulf %429, %428 : vector<8x128xf32>
    %431 = arith.subf %413, %430 : vector<8x128xf32>
    %432 = vector.broadcast %376 : vector<1x128xf32> to vector<8x128xf32>
    %433 = arith.mulf %431, %432 : vector<8x128xf32>
    %434 = vector.broadcast %364 : vector<1x128xf32> to vector<8x128xf32>
    %435 = arith.mulf %434, %433 : vector<8x128xf32>
    %436 = arith.subf %403, %435 : vector<8x128xf32>
    %437 = vector.broadcast %369 : vector<1x128xf32> to vector<8x128xf32>
    %438 = arith.mulf %437, %428 : vector<8x128xf32>
    %439 = arith.subf %436, %438 : vector<8x128xf32>
    %440 = vector.broadcast %359 : vector<1x128xf32> to vector<8x128xf32>
    %441 = arith.mulf %439, %440 : vector<8x128xf32>
    %442 = vector.broadcast %348 : vector<1x128xf32> to vector<8x128xf32>
    %443 = arith.mulf %442, %441 : vector<8x128xf32>
    %444 = arith.subf %396, %443 : vector<8x128xf32>
    %445 = vector.broadcast %351 : vector<1x128xf32> to vector<8x128xf32>
    %446 = arith.mulf %445, %433 : vector<8x128xf32>
    %447 = arith.subf %444, %446 : vector<8x128xf32>
    %448 = vector.broadcast %354 : vector<1x128xf32> to vector<8x128xf32>
    %449 = arith.mulf %448, %428 : vector<8x128xf32>
    %450 = arith.subf %447, %449 : vector<8x128xf32>
    %451 = vector.broadcast %345 : vector<1x128xf32> to vector<8x128xf32>
    %452 = arith.mulf %450, %451 : vector<8x128xf32>
    %453 = vector.shape_cast %452 : vector<8x128xf32> to vector<1x8x128xf32>
    %454 = vector.shape_cast %441 : vector<8x128xf32> to vector<1x8x128xf32>
    %455 = vector.shape_cast %433 : vector<8x128xf32> to vector<1x8x128xf32>
    %456 = vector.shape_cast %428 : vector<8x128xf32> to vector<1x8x128xf32>
    %457 = tpu.concatenate %453, %454, %455, %456 in 0 : vector<1x8x128xf32>, vector<1x8x128xf32>, vector<1x8x128xf32>, vector<1x8x128xf32> -> vector<4x8x128xf32>
    %458 = vector.extract_strided_slice %457 {offsets = [0, 0, 0], sizes = [1, 8, 128], strides = [1, 1, 1]} : vector<4x8x128xf32> to vector<1x8x128xf32>
    %459 = vector.shape_cast %458 : vector<1x8x128xf32> to vector<8x128xf32>
    %460 = vector.extract_strided_slice %76 {offsets = [0, 0], sizes = [1, 128], strides = [1, 1]} : vector<4x128xf32> to vector<1x128xf32>
    %461 = vector.broadcast %460 : vector<1x128xf32> to vector<8x128xf32>
    %462 = arith.mulf %459, %461 : vector<8x128xf32>
    %463 = vector.extract_strided_slice %457 {offsets = [1, 0, 0], sizes = [1, 8, 128], strides = [1, 1, 1]} : vector<4x8x128xf32> to vector<1x8x128xf32>
    %464 = vector.shape_cast %463 : vector<1x8x128xf32> to vector<8x128xf32>
    %465 = vector.extract_strided_slice %76 {offsets = [1, 0], sizes = [1, 128], strides = [1, 1]} : vector<4x128xf32> to vector<1x128xf32>
    %466 = vector.broadcast %465 : vector<1x128xf32> to vector<8x128xf32>
    %467 = arith.mulf %464, %466 : vector<8x128xf32>
    %468 = arith.addf %462, %467 : vector<8x128xf32>
    %469 = vector.extract_strided_slice %457 {offsets = [2, 0, 0], sizes = [1, 8, 128], strides = [1, 1, 1]} : vector<4x8x128xf32> to vector<1x8x128xf32>
    %470 = vector.shape_cast %469 : vector<1x8x128xf32> to vector<8x128xf32>
    %471 = vector.extract_strided_slice %76 {offsets = [2, 0], sizes = [1, 128], strides = [1, 1]} : vector<4x128xf32> to vector<1x128xf32>
    %472 = vector.broadcast %471 : vector<1x128xf32> to vector<8x128xf32>
    %473 = arith.mulf %470, %472 : vector<8x128xf32>
    %474 = arith.addf %468, %473 : vector<8x128xf32>
    %475 = vector.extract_strided_slice %457 {offsets = [3, 0, 0], sizes = [1, 8, 128], strides = [1, 1, 1]} : vector<4x8x128xf32> to vector<1x8x128xf32>
    %476 = vector.shape_cast %475 : vector<1x8x128xf32> to vector<8x128xf32>
    %477 = vector.extract_strided_slice %76 {offsets = [3, 0], sizes = [1, 128], strides = [1, 1]} : vector<4x128xf32> to vector<1x128xf32>
    %478 = vector.broadcast %477 : vector<1x128xf32> to vector<8x128xf32>
    %479 = arith.mulf %476, %478 : vector<8x128xf32>
    %480 = arith.addf %474, %479 : vector<8x128xf32>
    %481 = arith.addf %54, %480 : vector<8x128xf32>
    %482 = vector.extract_strided_slice %457 {offsets = [0, 0, 0], sizes = [1, 1, 128], strides = [1, 1, 1]} : vector<4x8x128xf32> to vector<1x1x128xf32>
    %483 = vector.extract_strided_slice %284 {offsets = [0, 0, 0], sizes = [1, 8, 128], strides = [1, 1, 1]} : vector<4x8x128xf32> to vector<1x8x128xf32>
    %484 = vector.broadcast %482 : vector<1x1x128xf32> to vector<1x8x128xf32>
    %485 = arith.mulf %484, %483 : vector<1x8x128xf32>
    %486 = vector.extract_strided_slice %457 {offsets = [1, 0, 0], sizes = [1, 1, 128], strides = [1, 1, 1]} : vector<4x8x128xf32> to vector<1x1x128xf32>
    %487 = vector.extract_strided_slice %284 {offsets = [1, 0, 0], sizes = [1, 8, 128], strides = [1, 1, 1]} : vector<4x8x128xf32> to vector<1x8x128xf32>
    %488 = vector.broadcast %486 : vector<1x1x128xf32> to vector<1x8x128xf32>
    %489 = arith.mulf %488, %487 : vector<1x8x128xf32>
    %490 = arith.addf %485, %489 : vector<1x8x128xf32>
    %491 = vector.extract_strided_slice %457 {offsets = [2, 0, 0], sizes = [1, 1, 128], strides = [1, 1, 1]} : vector<4x8x128xf32> to vector<1x1x128xf32>
    %492 = vector.extract_strided_slice %284 {offsets = [2, 0, 0], sizes = [1, 8, 128], strides = [1, 1, 1]} : vector<4x8x128xf32> to vector<1x8x128xf32>
    %493 = vector.broadcast %491 : vector<1x1x128xf32> to vector<1x8x128xf32>
    %494 = arith.mulf %493, %492 : vector<1x8x128xf32>
    %495 = arith.addf %490, %494 : vector<1x8x128xf32>
    %496 = vector.extract_strided_slice %457 {offsets = [3, 0, 0], sizes = [1, 1, 128], strides = [1, 1, 1]} : vector<4x8x128xf32> to vector<1x1x128xf32>
    %497 = vector.extract_strided_slice %284 {offsets = [3, 0, 0], sizes = [1, 8, 128], strides = [1, 1, 1]} : vector<4x8x128xf32> to vector<1x8x128xf32>
    %498 = vector.broadcast %496 : vector<1x1x128xf32> to vector<1x8x128xf32>
    %499 = arith.mulf %498, %497 : vector<1x8x128xf32>
    %500 = arith.addf %495, %499 : vector<1x8x128xf32>
    %501 = vector.extract_strided_slice %457 {offsets = [0, 1, 0], sizes = [1, 1, 128], strides = [1, 1, 1]} : vector<4x8x128xf32> to vector<1x1x128xf32>
    %502 = vector.extract_strided_slice %284 {offsets = [0, 0, 0], sizes = [1, 8, 128], strides = [1, 1, 1]} : vector<4x8x128xf32> to vector<1x8x128xf32>
    %503 = vector.broadcast %501 : vector<1x1x128xf32> to vector<1x8x128xf32>
    %504 = arith.mulf %503, %502 : vector<1x8x128xf32>
    %505 = vector.extract_strided_slice %457 {offsets = [1, 1, 0], sizes = [1, 1, 128], strides = [1, 1, 1]} : vector<4x8x128xf32> to vector<1x1x128xf32>
    %506 = vector.extract_strided_slice %284 {offsets = [1, 0, 0], sizes = [1, 8, 128], strides = [1, 1, 1]} : vector<4x8x128xf32> to vector<1x8x128xf32>
    %507 = vector.broadcast %505 : vector<1x1x128xf32> to vector<1x8x128xf32>
    %508 = arith.mulf %507, %506 : vector<1x8x128xf32>
    %509 = arith.addf %504, %508 : vector<1x8x128xf32>
    %510 = vector.extract_strided_slice %457 {offsets = [2, 1, 0], sizes = [1, 1, 128], strides = [1, 1, 1]} : vector<4x8x128xf32> to vector<1x1x128xf32>
    %511 = vector.extract_strided_slice %284 {offsets = [2, 0, 0], sizes = [1, 8, 128], strides = [1, 1, 1]} : vector<4x8x128xf32> to vector<1x8x128xf32>
    %512 = vector.broadcast %510 : vector<1x1x128xf32> to vector<1x8x128xf32>
    %513 = arith.mulf %512, %511 : vector<1x8x128xf32>
    %514 = arith.addf %509, %513 : vector<1x8x128xf32>
    %515 = vector.extract_strided_slice %457 {offsets = [3, 1, 0], sizes = [1, 1, 128], strides = [1, 1, 1]} : vector<4x8x128xf32> to vector<1x1x128xf32>
    %516 = vector.extract_strided_slice %284 {offsets = [3, 0, 0], sizes = [1, 8, 128], strides = [1, 1, 1]} : vector<4x8x128xf32> to vector<1x8x128xf32>
    %517 = vector.broadcast %515 : vector<1x1x128xf32> to vector<1x8x128xf32>
    %518 = arith.mulf %517, %516 : vector<1x8x128xf32>
    %519 = arith.addf %514, %518 : vector<1x8x128xf32>
    %520 = vector.extract_strided_slice %457 {offsets = [0, 2, 0], sizes = [1, 1, 128], strides = [1, 1, 1]} : vector<4x8x128xf32> to vector<1x1x128xf32>
    %521 = vector.extract_strided_slice %284 {offsets = [0, 0, 0], sizes = [1, 8, 128], strides = [1, 1, 1]} : vector<4x8x128xf32> to vector<1x8x128xf32>
    %522 = vector.broadcast %520 : vector<1x1x128xf32> to vector<1x8x128xf32>
    %523 = arith.mulf %522, %521 : vector<1x8x128xf32>
    %524 = vector.extract_strided_slice %457 {offsets = [1, 2, 0], sizes = [1, 1, 128], strides = [1, 1, 1]} : vector<4x8x128xf32> to vector<1x1x128xf32>
    %525 = vector.extract_strided_slice %284 {offsets = [1, 0, 0], sizes = [1, 8, 128], strides = [1, 1, 1]} : vector<4x8x128xf32> to vector<1x8x128xf32>
    %526 = vector.broadcast %524 : vector<1x1x128xf32> to vector<1x8x128xf32>
    %527 = arith.mulf %526, %525 : vector<1x8x128xf32>
    %528 = arith.addf %523, %527 : vector<1x8x128xf32>
    %529 = vector.extract_strided_slice %457 {offsets = [2, 2, 0], sizes = [1, 1, 128], strides = [1, 1, 1]} : vector<4x8x128xf32> to vector<1x1x128xf32>
    %530 = vector.extract_strided_slice %284 {offsets = [2, 0, 0], sizes = [1, 8, 128], strides = [1, 1, 1]} : vector<4x8x128xf32> to vector<1x8x128xf32>
    %531 = vector.broadcast %529 : vector<1x1x128xf32> to vector<1x8x128xf32>
    %532 = arith.mulf %531, %530 : vector<1x8x128xf32>
    %533 = arith.addf %528, %532 : vector<1x8x128xf32>
    %534 = vector.extract_strided_slice %457 {offsets = [3, 2, 0], sizes = [1, 1, 128], strides = [1, 1, 1]} : vector<4x8x128xf32> to vector<1x1x128xf32>
    %535 = vector.extract_strided_slice %284 {offsets = [3, 0, 0], sizes = [1, 8, 128], strides = [1, 1, 1]} : vector<4x8x128xf32> to vector<1x8x128xf32>
    %536 = vector.broadcast %534 : vector<1x1x128xf32> to vector<1x8x128xf32>
    %537 = arith.mulf %536, %535 : vector<1x8x128xf32>
    %538 = arith.addf %533, %537 : vector<1x8x128xf32>
    %539 = vector.extract_strided_slice %457 {offsets = [0, 3, 0], sizes = [1, 1, 128], strides = [1, 1, 1]} : vector<4x8x128xf32> to vector<1x1x128xf32>
    %540 = vector.extract_strided_slice %284 {offsets = [0, 0, 0], sizes = [1, 8, 128], strides = [1, 1, 1]} : vector<4x8x128xf32> to vector<1x8x128xf32>
    %541 = vector.broadcast %539 : vector<1x1x128xf32> to vector<1x8x128xf32>
    %542 = arith.mulf %541, %540 : vector<1x8x128xf32>
    %543 = vector.extract_strided_slice %457 {offsets = [1, 3, 0], sizes = [1, 1, 128], strides = [1, 1, 1]} : vector<4x8x128xf32> to vector<1x1x128xf32>
    %544 = vector.extract_strided_slice %284 {offsets = [1, 0, 0], sizes = [1, 8, 128], strides = [1, 1, 1]} : vector<4x8x128xf32> to vector<1x8x128xf32>
    %545 = vector.broadcast %543 : vector<1x1x128xf32> to vector<1x8x128xf32>
    %546 = arith.mulf %545, %544 : vector<1x8x128xf32>
    %547 = arith.addf %542, %546 : vector<1x8x128xf32>
    %548 = vector.extract_strided_slice %457 {offsets = [2, 3, 0], sizes = [1, 1, 128], strides = [1, 1, 1]} : vector<4x8x128xf32> to vector<1x1x128xf32>
    %549 = vector.extract_strided_slice %284 {offsets = [2, 0, 0], sizes = [1, 8, 128], strides = [1, 1, 1]} : vector<4x8x128xf32> to vector<1x8x128xf32>
    %550 = vector.broadcast %548 : vector<1x1x128xf32> to vector<1x8x128xf32>
    %551 = arith.mulf %550, %549 : vector<1x8x128xf32>
    %552 = arith.addf %547, %551 : vector<1x8x128xf32>
    %553 = vector.extract_strided_slice %457 {offsets = [3, 3, 0], sizes = [1, 1, 128], strides = [1, 1, 1]} : vector<4x8x128xf32> to vector<1x1x128xf32>
    %554 = vector.extract_strided_slice %284 {offsets = [3, 0, 0], sizes = [1, 8, 128], strides = [1, 1, 1]} : vector<4x8x128xf32> to vector<1x8x128xf32>
    %555 = vector.broadcast %553 : vector<1x1x128xf32> to vector<1x8x128xf32>
    %556 = arith.mulf %555, %554 : vector<1x8x128xf32>
    %557 = arith.addf %552, %556 : vector<1x8x128xf32>
    %558 = vector.extract_strided_slice %457 {offsets = [0, 4, 0], sizes = [1, 1, 128], strides = [1, 1, 1]} : vector<4x8x128xf32> to vector<1x1x128xf32>
    %559 = vector.extract_strided_slice %284 {offsets = [0, 0, 0], sizes = [1, 8, 128], strides = [1, 1, 1]} : vector<4x8x128xf32> to vector<1x8x128xf32>
    %560 = vector.broadcast %558 : vector<1x1x128xf32> to vector<1x8x128xf32>
    %561 = arith.mulf %560, %559 : vector<1x8x128xf32>
    %562 = vector.extract_strided_slice %457 {offsets = [1, 4, 0], sizes = [1, 1, 128], strides = [1, 1, 1]} : vector<4x8x128xf32> to vector<1x1x128xf32>
    %563 = vector.extract_strided_slice %284 {offsets = [1, 0, 0], sizes = [1, 8, 128], strides = [1, 1, 1]} : vector<4x8x128xf32> to vector<1x8x128xf32>
    %564 = vector.broadcast %562 : vector<1x1x128xf32> to vector<1x8x128xf32>
    %565 = arith.mulf %564, %563 : vector<1x8x128xf32>
    %566 = arith.addf %561, %565 : vector<1x8x128xf32>
    %567 = vector.extract_strided_slice %457 {offsets = [2, 4, 0], sizes = [1, 1, 128], strides = [1, 1, 1]} : vector<4x8x128xf32> to vector<1x1x128xf32>
    %568 = vector.extract_strided_slice %284 {offsets = [2, 0, 0], sizes = [1, 8, 128], strides = [1, 1, 1]} : vector<4x8x128xf32> to vector<1x8x128xf32>
    %569 = vector.broadcast %567 : vector<1x1x128xf32> to vector<1x8x128xf32>
    %570 = arith.mulf %569, %568 : vector<1x8x128xf32>
    %571 = arith.addf %566, %570 : vector<1x8x128xf32>
    %572 = vector.extract_strided_slice %457 {offsets = [3, 4, 0], sizes = [1, 1, 128], strides = [1, 1, 1]} : vector<4x8x128xf32> to vector<1x1x128xf32>
    %573 = vector.extract_strided_slice %284 {offsets = [3, 0, 0], sizes = [1, 8, 128], strides = [1, 1, 1]} : vector<4x8x128xf32> to vector<1x8x128xf32>
    %574 = vector.broadcast %572 : vector<1x1x128xf32> to vector<1x8x128xf32>
    %575 = arith.mulf %574, %573 : vector<1x8x128xf32>
    %576 = arith.addf %571, %575 : vector<1x8x128xf32>
    %577 = vector.extract_strided_slice %457 {offsets = [0, 5, 0], sizes = [1, 1, 128], strides = [1, 1, 1]} : vector<4x8x128xf32> to vector<1x1x128xf32>
    %578 = vector.extract_strided_slice %284 {offsets = [0, 0, 0], sizes = [1, 8, 128], strides = [1, 1, 1]} : vector<4x8x128xf32> to vector<1x8x128xf32>
    %579 = vector.broadcast %577 : vector<1x1x128xf32> to vector<1x8x128xf32>
    %580 = arith.mulf %579, %578 : vector<1x8x128xf32>
    %581 = vector.extract_strided_slice %457 {offsets = [1, 5, 0], sizes = [1, 1, 128], strides = [1, 1, 1]} : vector<4x8x128xf32> to vector<1x1x128xf32>
    %582 = vector.extract_strided_slice %284 {offsets = [1, 0, 0], sizes = [1, 8, 128], strides = [1, 1, 1]} : vector<4x8x128xf32> to vector<1x8x128xf32>
    %583 = vector.broadcast %581 : vector<1x1x128xf32> to vector<1x8x128xf32>
    %584 = arith.mulf %583, %582 : vector<1x8x128xf32>
    %585 = arith.addf %580, %584 : vector<1x8x128xf32>
    %586 = vector.extract_strided_slice %457 {offsets = [2, 5, 0], sizes = [1, 1, 128], strides = [1, 1, 1]} : vector<4x8x128xf32> to vector<1x1x128xf32>
    %587 = vector.extract_strided_slice %284 {offsets = [2, 0, 0], sizes = [1, 8, 128], strides = [1, 1, 1]} : vector<4x8x128xf32> to vector<1x8x128xf32>
    %588 = vector.broadcast %586 : vector<1x1x128xf32> to vector<1x8x128xf32>
    %589 = arith.mulf %588, %587 : vector<1x8x128xf32>
    %590 = arith.addf %585, %589 : vector<1x8x128xf32>
    %591 = vector.extract_strided_slice %457 {offsets = [3, 5, 0], sizes = [1, 1, 128], strides = [1, 1, 1]} : vector<4x8x128xf32> to vector<1x1x128xf32>
    %592 = vector.extract_strided_slice %284 {offsets = [3, 0, 0], sizes = [1, 8, 128], strides = [1, 1, 1]} : vector<4x8x128xf32> to vector<1x8x128xf32>
    %593 = vector.broadcast %591 : vector<1x1x128xf32> to vector<1x8x128xf32>
    %594 = arith.mulf %593, %592 : vector<1x8x128xf32>
    %595 = arith.addf %590, %594 : vector<1x8x128xf32>
    %596 = vector.extract_strided_slice %457 {offsets = [0, 6, 0], sizes = [1, 1, 128], strides = [1, 1, 1]} : vector<4x8x128xf32> to vector<1x1x128xf32>
    %597 = vector.extract_strided_slice %284 {offsets = [0, 0, 0], sizes = [1, 8, 128], strides = [1, 1, 1]} : vector<4x8x128xf32> to vector<1x8x128xf32>
    %598 = vector.broadcast %596 : vector<1x1x128xf32> to vector<1x8x128xf32>
    %599 = arith.mulf %598, %597 : vector<1x8x128xf32>
    %600 = vector.extract_strided_slice %457 {offsets = [1, 6, 0], sizes = [1, 1, 128], strides = [1, 1, 1]} : vector<4x8x128xf32> to vector<1x1x128xf32>
    %601 = vector.extract_strided_slice %284 {offsets = [1, 0, 0], sizes = [1, 8, 128], strides = [1, 1, 1]} : vector<4x8x128xf32> to vector<1x8x128xf32>
    %602 = vector.broadcast %600 : vector<1x1x128xf32> to vector<1x8x128xf32>
    %603 = arith.mulf %602, %601 : vector<1x8x128xf32>
    %604 = arith.addf %599, %603 : vector<1x8x128xf32>
    %605 = vector.extract_strided_slice %457 {offsets = [2, 6, 0], sizes = [1, 1, 128], strides = [1, 1, 1]} : vector<4x8x128xf32> to vector<1x1x128xf32>
    %606 = vector.extract_strided_slice %284 {offsets = [2, 0, 0], sizes = [1, 8, 128], strides = [1, 1, 1]} : vector<4x8x128xf32> to vector<1x8x128xf32>
    %607 = vector.broadcast %605 : vector<1x1x128xf32> to vector<1x8x128xf32>
    %608 = arith.mulf %607, %606 : vector<1x8x128xf32>
    %609 = arith.addf %604, %608 : vector<1x8x128xf32>
    %610 = vector.extract_strided_slice %457 {offsets = [3, 6, 0], sizes = [1, 1, 128], strides = [1, 1, 1]} : vector<4x8x128xf32> to vector<1x1x128xf32>
    %611 = vector.extract_strided_slice %284 {offsets = [3, 0, 0], sizes = [1, 8, 128], strides = [1, 1, 1]} : vector<4x8x128xf32> to vector<1x8x128xf32>
    %612 = vector.broadcast %610 : vector<1x1x128xf32> to vector<1x8x128xf32>
    %613 = arith.mulf %612, %611 : vector<1x8x128xf32>
    %614 = arith.addf %609, %613 : vector<1x8x128xf32>
    %615 = vector.extract_strided_slice %457 {offsets = [0, 7, 0], sizes = [1, 1, 128], strides = [1, 1, 1]} : vector<4x8x128xf32> to vector<1x1x128xf32>
    %616 = vector.extract_strided_slice %284 {offsets = [0, 0, 0], sizes = [1, 8, 128], strides = [1, 1, 1]} : vector<4x8x128xf32> to vector<1x8x128xf32>
    %617 = vector.broadcast %615 : vector<1x1x128xf32> to vector<1x8x128xf32>
    %618 = arith.mulf %617, %616 : vector<1x8x128xf32>
    %619 = vector.extract_strided_slice %457 {offsets = [1, 7, 0], sizes = [1, 1, 128], strides = [1, 1, 1]} : vector<4x8x128xf32> to vector<1x1x128xf32>
    %620 = vector.extract_strided_slice %284 {offsets = [1, 0, 0], sizes = [1, 8, 128], strides = [1, 1, 1]} : vector<4x8x128xf32> to vector<1x8x128xf32>
    %621 = vector.broadcast %619 : vector<1x1x128xf32> to vector<1x8x128xf32>
    %622 = arith.mulf %621, %620 : vector<1x8x128xf32>
    %623 = arith.addf %618, %622 : vector<1x8x128xf32>
    %624 = vector.extract_strided_slice %457 {offsets = [2, 7, 0], sizes = [1, 1, 128], strides = [1, 1, 1]} : vector<4x8x128xf32> to vector<1x1x128xf32>
    %625 = vector.extract_strided_slice %284 {offsets = [2, 0, 0], sizes = [1, 8, 128], strides = [1, 1, 1]} : vector<4x8x128xf32> to vector<1x8x128xf32>
    %626 = vector.broadcast %624 : vector<1x1x128xf32> to vector<1x8x128xf32>
    %627 = arith.mulf %626, %625 : vector<1x8x128xf32>
    %628 = arith.addf %623, %627 : vector<1x8x128xf32>
    %629 = vector.extract_strided_slice %457 {offsets = [3, 7, 0], sizes = [1, 1, 128], strides = [1, 1, 1]} : vector<4x8x128xf32> to vector<1x1x128xf32>
    %630 = vector.extract_strided_slice %284 {offsets = [3, 0, 0], sizes = [1, 8, 128], strides = [1, 1, 1]} : vector<4x8x128xf32> to vector<1x8x128xf32>
    %631 = vector.broadcast %629 : vector<1x1x128xf32> to vector<1x8x128xf32>
    %632 = arith.mulf %631, %630 : vector<1x8x128xf32>
    %633 = arith.addf %628, %632 : vector<1x8x128xf32>
    %634 = tpu.concatenate %500, %519, %538, %557, %576, %595, %614, %633 in 0 : vector<1x8x128xf32>, vector<1x8x128xf32>, vector<1x8x128xf32>, vector<1x8x128xf32>, vector<1x8x128xf32>, vector<1x8x128xf32>, vector<1x8x128xf32>, vector<1x8x128xf32> -> vector<8x8x128xf32>
    %635 = arith.subf %237, %634 : vector<8x8x128xf32>
    %c0_68 = arith.constant 0 : index
    %c0_69 = arith.constant 0 : index
    %c0_70 = arith.constant 0 : index
    %636 = vector.load %arg8[%c0_68, %c0_69, %c0_70] : memref<1x4x128xf32, #tpu.memory_space<vmem>>, vector<1x4x128xf32>
    %637 = vector.shape_cast %636 : vector<1x4x128xf32> to vector<4x128xf32>
    %638 = vector.shape_cast %75 : vector<4x128xf32> to vector<1x4x128xf32>
    tpu.vector_store %arg8[%c0_68, %c0_69, %c0_70], %638 {strides = array<i32>} : memref<1x4x128xf32, #tpu.memory_space<vmem>>, vector<1x4x128xf32>,
    %c0_71 = arith.constant 0 : index
    %c0_72 = arith.constant 0 : index
    %c0_73 = arith.constant 0 : index
    %639 = vector.load %arg9[%c0_71, %c0_72, %c0_73] : memref<1x8x128xf32, #tpu.memory_space<vmem>>, vector<1x8x128xf32>
    %640 = vector.shape_cast %639 : vector<1x8x128xf32> to vector<8x128xf32>
    %641 = vector.shape_cast %481 : vector<8x128xf32> to vector<1x8x128xf32>
    tpu.vector_store %arg9[%c0_71, %c0_72, %c0_73], %641 {strides = array<i32>} : memref<1x8x128xf32, #tpu.memory_space<vmem>>, vector<1x8x128xf32>,
    %c0_74 = arith.constant 0 : index
    %c0_75 = arith.constant 0 : index
    %c0_76 = arith.constant 0 : index
    %c0_77 = arith.constant 0 : index
    %642 = vector.load %arg10[%c0_74, %c0_75, %c0_76, %c0_77] : memref<1x8x8x128xf32, #tpu.memory_space<vmem>>, vector<1x8x8x128xf32>
    %643 = vector.shape_cast %642 : vector<1x8x8x128xf32> to vector<8x8x128xf32>
    %644 = vector.shape_cast %635 : vector<8x8x128xf32> to vector<1x8x8x128xf32>
    tpu.vector_store %arg10[%c0_74, %c0_75, %c0_76, %c0_77], %644 {strides = array<i32>} : memref<1x8x8x128xf32, #tpu.memory_space<vmem>>, vector<1x8x8x128xf32>,
    return
  }
  func.func @transform_0(%arg0: i32) -> (i32, i32, i32) {
    %c0_i32 = arith.constant 0 : i32
    %c0_i32_0 = arith.constant 0 : i32
    %c0_i32_1 = arith.constant 0 : i32
    return %arg0, %c0_i32, %c0_i32_0 : i32, i32, i32
  }
  func.func @transform_1(%arg0: i32) -> (i32, i32, i32) {
    %c0_i32 = arith.constant 0 : i32
    %c0_i32_0 = arith.constant 0 : i32
    %c0_i32_1 = arith.constant 0 : i32
    return %arg0, %c0_i32, %c0_i32_0 : i32, i32, i32
  }
  func.func @transform_2(%arg0: i32) -> (i32, i32, i32, i32) {
    %c0_i32 = arith.constant 0 : i32
    %c0_i32_0 = arith.constant 0 : i32
    %c0_i32_1 = arith.constant 0 : i32
    %c0_i32_2 = arith.constant 0 : i32
    return %arg0, %c0_i32, %c0_i32_0, %c0_i32_1 : i32, i32, i32, i32
  }
  func.func @transform_3(%arg0: i32) -> (i32, i32, i32, i32) {
    %c0_i32 = arith.constant 0 : i32
    %c0_i32_0 = arith.constant 0 : i32
    %c0_i32_1 = arith.constant 0 : i32
    %c0_i32_2 = arith.constant 0 : i32
    return %arg0, %c0_i32, %c0_i32_0, %c0_i32_1 : i32, i32, i32, i32
  }
  func.func @transform_4(%arg0: i32) -> (i32, i32, i32, i32) {
    %c0_i32 = arith.constant 0 : i32
    %c0_i32_0 = arith.constant 0 : i32
    %c0_i32_1 = arith.constant 0 : i32
    %c0_i32_2 = arith.constant 0 : i32
    return %arg0, %c0_i32, %c0_i32_0, %c0_i32_1 : i32, i32, i32, i32
  }
  func.func @transform_5(%arg0: i32) -> (i32, i32, i32) {
    %c0_i32 = arith.constant 0 : i32
    %c0_i32_0 = arith.constant 0 : i32
    %c0_i32_1 = arith.constant 0 : i32
    return %arg0, %c0_i32, %c0_i32_0 : i32, i32, i32
  }
  func.func @transform_6(%arg0: i32) -> (i32, i32, i32) {
    %c0_i32 = arith.constant 0 : i32
    %c0_i32_0 = arith.constant 0 : i32
    %c0_i32_1 = arith.constant 0 : i32
    return %arg0, %c0_i32, %c0_i32_0 : i32, i32, i32
  }
  func.func @transform_7(%arg0: i32) -> (i32, i32, i32) {
    %c0_i32 = arith.constant 0 : i32
    %c0_i32_0 = arith.constant 0 : i32
    %c0_i32_1 = arith.constant 0 : i32
    return %arg0, %c0_i32, %c0_i32_0 : i32, i32, i32
  }
  func.func @transform_8(%arg0: i32) -> (i32, i32, i32) {
    %c0_i32 = arith.constant 0 : i32
    %c0_i32_0 = arith.constant 0 : i32
    %c0_i32_1 = arith.constant 0 : i32
    return %arg0, %c0_i32, %c0_i32_0 : i32, i32, i32
  }
  func.func @transform_9(%arg0: i32) -> (i32, i32, i32, i32) {
    %c0_i32 = arith.constant 0 : i32
    %c0_i32_0 = arith.constant 0 : i32
    %c0_i32_1 = arith.constant 0 : i32
    %c0_i32_2 = arith.constant 0 : i32
    return %arg0, %c0_i32, %c0_i32_0, %c0_i32_1 : i32, i32, i32, i32
  }
}

</mosaic_0001>

<bundles_post_ra>
// kernel: tpu_custom_call.1
= control target key start
LH: loop header
LB: loop body
LE: loop exit
PB: predicated region body
PF: predicated region fallthrough
CT: control target
= control target key end

     0   :  { %15 = vsyncpa [#allocation3], 0  ;;  %s3306_s0 = inlined_call_operand.vmem [shape: f32[1,4,128], index: 0, kind: input, shape index: {}]   ;;  %s3307_s1 = inlined_call_operand.hbm [shape: f32[1,8,128], index: 1, kind: input, shape index: {}]   ;;  %s3308_s2 = inlined_call_operand.vmem [shape: f32[1,8,8,128], index: 2, kind: input, shape index: {}]   ;;  %s3309_s3 = inlined_call_operand.hbm [shape: f32[1,8,8,128], index: 3, kind: input, shape index: {}]   ;;  %s3310_s4 = inlined_call_operand.vmem [shape: f32[1,4,8,128], index: 4, kind: input, shape index: {}]   ;;  %s3311_s5 = inlined_call_operand.vmem [shape: f32[1,36,128], index: 5, kind: input, shape index: {}]   ;;  %s3312_s6 = inlined_call_operand.vmem [shape: f32[1,10,128], index: 6, kind: input, shape index: {}]   ;;  %s3313_s7 = inlined_call_operand.hbm [shape: f32[1,4,128], index: 7, kind: output, shape index: {0}]   ;;  %s3314_s8 = inlined_call_operand.hbm [shape: f32[1,8,128], index: 8, kind: output, shape index: {1}]   ;;  %s3315_s9 = inlined_call_operand.hbm [shape: f32[1,8,8,128], index: 9, kind: output, shape index: {2}]  }
   0x1   :  { %16 = vsyncpa [#allocation6], 0 }
   0x2   :  { %17 = vsyncpa [#allocation4], 0 }
   0x3   :  { %18 = vsyncpa [#allocation9], 0  ;;  %s26_s11 = sshll.u32 %s3307_s1, 4  ;;  %s2013_s12 = smov [#allocation2]   ;;  %s27_s11 = int_to_ptr.hbm [resolvable:$true] %s26_s11 }
   0x4   :  { %s28_s13 = sshll.u32 %s2013_s12, 4  ;;  %s38_s16 = sshll.u32 %s3309_s3, 4  ;;  %s29_s13 = int_to_ptr.vmem [resolvable:$true] %s28_s13  ;;  %s39_s16 = int_to_ptr.hbm [resolvable:$true] %s38_s16 }
   0x5   :  { %31 = dma.hbm_to_vmem [thread:$0]  %s27_s11, 128, %s29_s13, [#allocation3]  }
   0x6   :  { %s2014_s17 = smov [#allocation5]   ;;  %s2015_s19 = smov 128  }
   0x7   :  { %s40_s18 = sshll.u32 %s2014_s17, 4  ;;  %s2016_s20 = smov 8   ;;  %s41_s18 = int_to_ptr.vmem [resolvable:$true] %s40_s18 }
   0x8   :  { %46 = dma.hbm_to_vmem [thread:$0]  %s39_s16, 1024, %s41_s18, [#allocation6], %s2015_s19, %s2015_s19, %s2016_s20  }
   0x9   :  { %2005 = dma.done.wait [#allocation3], 128  }
   0xa   :  { %2006 = vsyncadd [#allocation3], 4294967168 }
   0xb   :  { %2007 = dma.done.wait [#allocation6], 1024  }
   0xc   :  { %2008 = vsyncadd [#allocation6], 4294966272  ;;  %v62_v0 = vld [vmem:[#allocation2] sm:$0xff]  ;;  %v2079_v1 = vld [vmem:[#allocation5] sm:$0xff]  ;;  %vm146_vm0 = vcmask 1040384   ;;  %vm148_vm1 = vcmask 1041408  }
   0xd   :  { %v2081_v2 = vld [vmem:[#allocation5 + $0x8] sm:$0xff]  ;;  %v2083_v3 = vld [vmem:[#allocation5 + $0x10] sm:$0xff]  ;;  %v2085_v4 = vld [vmem:[#allocation5 + $0x18] sm:$0xff]  ;;  %v90_v6 = vmul.f32 %v2079_v1, %v62_v0  ;;  %vm150_vm2 = vcmask 1042432   ;;  %vm152_vm3 = vcmask 1043456   ;;  %vm154_vm4 = vcmask 1044480  }
   0xe   :  { %v2087_v5 = vld [vmem:[#allocation5 + $0x20] sm:$0xff]  ;;  %v97_v7 = vmul.f32 %v2081_v2, %v62_v0  ;;  %v2091_v8 = vld [vmem:[#allocation5 + $0x28] sm:$0xff]  ;;  %v2093_v9 = vld [vmem:[#allocation5 + $0x30] sm:$0xff]  ;;  %v104_v10 = vmul.f32 %v2083_v3, %v62_v0  ;;  %v111_v11 = vmul.f32 %v2085_v4, %v62_v0  ;;  %vm156_vm5 = vcmask 1045504   ;;  %s1818_s22 = sshll.u32 %s3313_s7, 4  ;;  %s1829_s27 = sshll.u32 %s3314_s8, 4  ;;  %s1819_s22 = int_to_ptr.hbm [resolvable:$true] %s1818_s22  ;;  %s1830_s27 = int_to_ptr.hbm [resolvable:$true] %s1829_s27 }
   0xf   :  { %v118_v12 = vmul.f32 %v2087_v5, %v62_v0  ;;  %v2098_v13 = vld [vmem:[#allocation5 + $0x38] sm:$0xff]  ;;  %v91_v14 = vrot.slane %v90_v6, 4  ;;  %v125_v16 = vmul.f32 %v2091_v8, %v62_v0  ;;  %v132_v17 = vmul.f32 %v2093_v9, %v62_v0  ;;  %s2019_s8 = smov [#allocation10]  }
  0x10   :  { %v98_v15 = vrot.slane %v97_v7, 4  ;;  %v105_v18 = vrot.slane %v104_v10, 4  ;;  %v112_v19 = vrot.slane %v111_v11, 4  ;;  %v139_v21 = vmul.f32 %v2098_v13, %v62_v0  ;;  %s1837_s28 = sshll.u32 %s2019_s8, 4  ;;  %s1838_s28 = int_to_ptr.vmem [resolvable:$true] %s1837_s28 }
  0x11   :  { %v119_v20 = vrot.slane %v118_v12, 4  ;;  %v92_v22 = vadd.f32 %v91_v14, %v90_v6  ;;  %v126_v24 = vrot.slane %v125_v16, 4  ;;  %v133_v25 = vrot.slane %v132_v17, 4 }
  0x12   :  { %v99_v23 = vadd.f32 %v98_v15, %v97_v7  ;;  %v106_v26 = vadd.f32 %v105_v18, %v104_v10  ;;  %v113_v27 = vadd.f32 %v112_v19, %v111_v11  ;;  %v140_v29 = vrot.slane %v139_v21, 4 }
  0x13   :  { %v120_v28 = vadd.f32 %v119_v20, %v118_v12  ;;  %v93_v30 = vrot.slane %v92_v22, 2  ;;  %v127_v32 = vadd.f32 %v126_v24, %v125_v16  ;;  %v134_v33 = vadd.f32 %v133_v25, %v132_v17  ;;  %v63_v12 = vld [vmem:[%s3308_s2] sm:$0xff] }
  0x14   :  { %v100_v31 = vrot.slane %v99_v23, 2  ;;  %v107_v34 = vrot.slane %v106_v26, 2  ;;  %v114_v35 = vrot.slane %v113_v27, 2  ;;  %v141_v37 = vadd.f32 %v140_v29, %v139_v21  ;;  %v82_v29 = vld [vmem:[%s3310_s4 + $0x18] sm:$0xff] }
  0x15   :  { %v121_v36 = vrot.slane %v120_v28, 2  ;;  %v94_v38 = vadd.f32 %v93_v30, %v92_v22  ;;  %v128_v40 = vrot.slane %v127_v32, 2  ;;  %v135_v41 = vrot.slane %v134_v33, 2 }
  0x16   :  { %v101_v39 = vadd.f32 %v100_v31, %v99_v23  ;;  %v108_v42 = vadd.f32 %v107_v34, %v106_v26  ;;  %v115_v43 = vadd.f32 %v114_v35, %v113_v27  ;;  %v142_v45 = vrot.slane %v141_v37, 2  ;;  %v79_v23 = vld [vmem:[%s3310_s4] sm:$0xff]  ;;  %v80_v27 = vld [vmem:[%s3310_s4 + $0x8] sm:$0xff] }
  0x17   :  { %v122_v44 = vadd.f32 %v121_v36, %v120_v28  ;;  %v95_v46 = vrot.slane %v94_v38, 1  ;;  %v129_v48 = vadd.f32 %v128_v40, %v127_v32  ;;  %v136_v49 = vadd.f32 %v135_v41, %v134_v33  ;;  %v81_v28 = vld [vmem:[%s3310_s4 + $0x10] sm:$0xff] }
  0x18   :  { %v102_v47 = vrot.slane %v101_v39, 1  ;;  %v109_v50 = vrot.slane %v108_v42, 1  ;;  %v116_v51 = vrot.slane %v115_v43, 1  ;;  %v143_v53 = vadd.f32 %v142_v45, %v141_v37 }
  0x19   :  { %v123_v52 = vrot.slane %v122_v44, 1  ;;  %v96_v54 = vadd.f32 %v95_v46, %v94_v38  ;;  %v130_v56 = vrot.slane %v129_v48, 1  ;;  %v137_v57 = vrot.slane %v136_v49, 1 }
  0x1a   :  { %v103_v55 = vadd.f32 %v102_v47, %v101_v39  ;;  %v110_v58 = vadd.f32 %v109_v50, %v108_v42  ;;  %v117_v59 = vadd.f32 %v116_v51, %v115_v43  ;;  %v144_v61 = vrot.slane %v143_v53, 1  ;;  %v64_v42 = vld [vmem:[%s3308_s2 + $0x8] sm:$0xff] }
  0x1b   :  { %v124_v60 = vadd.f32 %v123_v52, %v122_v44  ;;  %v131_v62 = vadd.f32 %v130_v56, %v129_v48  ;;  %v192_v0 = vperm.slane %v2079_v1, 0  ;;  %v138_v6 = vadd.f32 %v137_v57, %v136_v49 }
  0x1c   :  { %v147_v63 = vsel %vm146_vm0, %v96_v54, %v103_v55  ;;  %v193_v10 = vperm.slane %v2081_v2, 0  ;;  %v194_v11 = vperm.slane %v2083_v3, 0  ;;  %v145_v14 = vadd.f32 %v144_v61, %v143_v53 }
  0x1d   :  { %v149_v7 = vsel %vm148_vm1, %v147_v63, %v110_v58  ;;  %v195_v16 = vperm.slane %v2085_v4, 0  ;;  %v196_v17 = vperm.slane %v2087_v5, 0  ;;  %v197_v20 = vperm.slane %v2091_v8, 0 }
  0x1e   :  { %v151_v15 = vsel %vm150_vm2, %v149_v7, %v117_v59  ;;  %v198_v21 = vperm.slane %v2093_v9, 0  ;;  %v199_v22 = vperm.slane %v2098_v13, 0  ;;  %vm158_vm6 = vcmask 1046528  }
  0x1f   :  { %v153_v18 = vsel %vm152_vm3, %v151_v15, %v124_v60  ;;  %v200_v25 = vmul.f32 %v192_v0, %v63_v12  ;;  %v201_v26 = vmul.f32 %v193_v10, %v63_v12  ;;  %v202_v31 = vmul.f32 %v194_v11, %v63_v12 }
  0x20   :  { %v155_v19 = vsel %vm154_vm4, %v153_v18, %v131_v62  ;;  %v2135_v32 = vmul.f32 %v195_v16, %v63_v12  ;;  %v2137_v33 = vmul.f32 %v196_v17, %v63_v12  ;;  %v205_v38 = vmul.f32 %v197_v20, %v63_v12 }
  0x21   :  { %v157_v24 = vsel %vm156_vm5, %v155_v19, %v138_v6  ;;  %v2143_v39 = vmul.f32 %v198_v21, %v63_v12  ;;  %v207_v40 = vmul.f32 %v199_v22, %v63_v12  ;;  %v208_v41 = vperm.slane %v2079_v1, 1 }
  0x22   :  { %v2133_v30 = vsel %vm158_vm6, %v157_v24, %v145_v14  ;;  %v209_v47 = vperm.slane %v2081_v2, 1  ;;  %v210_v48 = vperm.slane %v2083_v3, 1  ;;  %v211_v49 = vperm.slane %v2085_v4, 1 }
  0x23   :  { %3326 = vst [vmem:[#allocation15_spill] sm:$0xff] %v2133_v30  ;;  %v160_v34 = vmul.f32 %v2133_v30, %v79_v23  ;;  %v167_v35 = vmul.f32 %v2133_v30, %v80_v27  ;;  %v174_v36 = vmul.f32 %v2133_v30, %v81_v28  ;;  %v181_v37 = vmul.f32 %v2133_v30, %v82_v29  ;;  %v65_v23 = vld [vmem:[%s3308_s2 + $0x10] sm:$0xff] }
  0x24   :  { %v212_v50 = vperm.slane %v2087_v5, 1  ;;  %v213_v55 = vperm.slane %v2091_v8, 1  ;;  %v214_v56 = vperm.slane %v2093_v9, 1  ;;  %v215_v57 = vperm.slane %v2098_v13, 1 }
  0x25   :  { %v161_v43 = vrot.slane %v160_v34, 4  ;;  %v168_v44 = vrot.slane %v167_v35, 4  ;;  %v175_v45 = vrot.slane %v174_v36, 4  ;;  %v182_v46 = vrot.slane %v181_v37, 4 }
  0x26   :  { %v216_v58 = vmul.f32 %v208_v41, %v64_v42  ;;  %v217_v63 = vmul.f32 %v209_v47, %v64_v42  ;;  %v218_v0 = vmul.f32 %v210_v48, %v64_v42  ;;  %v219_v6 = vmul.f32 %v211_v49, %v64_v42 }
  0x27   :  { %v162_v51 = vadd.f32 %v161_v43, %v160_v34  ;;  %v169_v52 = vadd.f32 %v168_v44, %v167_v35  ;;  %v176_v53 = vadd.f32 %v175_v45, %v174_v36  ;;  %v183_v54 = vadd.f32 %v182_v46, %v181_v37 }
  0x28   :  { %v220_v7 = vmul.f32 %v212_v50, %v64_v42  ;;  %v221_v15 = vmul.f32 %v213_v55, %v64_v42  ;;  %v222_v16 = vmul.f32 %v214_v56, %v64_v42  ;;  %v223_v17 = vmul.f32 %v215_v57, %v64_v42 }
  0x29   :  { %v163_v59 = vrot.slane %v162_v51, 2  ;;  %v170_v60 = vrot.slane %v169_v52, 2  ;;  %v177_v61 = vrot.slane %v176_v53, 2  ;;  %v184_v62 = vrot.slane %v183_v54, 2 }
  0x2a   :  { %v232_v18 = vperm.slane %v2079_v1, 2  ;;  %v224_v24 = vadd.f32 %v216_v58, %v200_v25  ;;  %v225_v27 = vadd.f32 %v217_v63, %v201_v26  ;;  %v226_v28 = vadd.f32 %v218_v0, %v202_v31 }
  0x2b   :  { %v164_v10 = vadd.f32 %v163_v59, %v162_v51  ;;  %v171_v11 = vadd.f32 %v170_v60, %v169_v52  ;;  %v178_v12 = vadd.f32 %v177_v61, %v176_v53  ;;  %v185_v14 = vadd.f32 %v184_v62, %v183_v54  ;;  %v66_v54 = vld [vmem:[%s3308_s2 + $0x18] sm:$0xff] }
  0x2c   :  { %v233_v29 = vperm.slane %v2081_v2, 2  ;;  %v234_v41 = vperm.slane %v2083_v3, 2  ;;  %v235_v42 = vperm.slane %v2085_v4, 2  ;;  %v236_v43 = vperm.slane %v2087_v5, 2 }
  0x2d   :  { %v165_v19 = vrot.slane %v164_v10, 1  ;;  %v172_v20 = vrot.slane %v171_v11, 1  ;;  %v179_v21 = vrot.slane %v178_v12, 1  ;;  %v186_v22 = vrot.slane %v185_v14, 1 }
  0x2e   :  { %v237_v44 = vperm.slane %v2091_v8, 2  ;;  %v238_v25 = vperm.slane %v2093_v9, 2  ;;  %v239_v26 = vperm.slane %v2098_v13, 2  ;;  %v240_v31 = vmul.f32 %v232_v18, %v65_v23  ;;  %v67_v18 = vld [vmem:[%s3308_s2 + $0x20] sm:$0xff] }
  0x2f   :  { %v166_v34 = vadd.f32 %v165_v19, %v164_v10  ;;  %v173_v35 = vadd.f32 %v172_v20, %v171_v11  ;;  %v180_v36 = vadd.f32 %v179_v21, %v178_v12  ;;  %v187_v37 = vadd.f32 %v186_v22, %v185_v14 }
  0x30   :  { %v227_v47 = vadd.f32 %v219_v6, %v2135_v32  ;;  %v228_v48 = vadd.f32 %v220_v7, %v2137_v33  ;;  %v229_v49 = vadd.f32 %v221_v15, %v205_v38  ;;  %v230_v51 = vadd.f32 %v222_v16, %v2143_v39 }
  0x31   :  { %v188_v45 = vsel %vm146_vm0, %v166_v34, %v173_v35  ;;  %v231_v52 = vadd.f32 %v223_v17, %v207_v40  ;;  %v241_v53 = vmul.f32 %v233_v29, %v65_v23  ;;  %v242_v55 = vmul.f32 %v234_v41, %v65_v23 }
  0x32   :  { %v189_v46 = vsel %vm148_vm1, %v188_v45, %v180_v36  ;;  %v243_v56 = vmul.f32 %v235_v42, %v65_v23  ;;  %v244_v57 = vmul.f32 %v236_v43, %v65_v23  ;;  %v245_v58 = vmul.f32 %v237_v44, %v65_v23 }
  0x33   :  { %v2172_v50 = vsel %vm150_vm2, %v189_v46, %v187_v37  ;;  %v246_v32 = vmul.f32 %v238_v25, %v65_v23  ;;  %v247_v33 = vmul.f32 %v239_v26, %v65_v23  ;;  %v248_v38 = vadd.f32 %v240_v31, %v224_v24 }
  0x34   :  { %3327 = vst [vmem:[#allocation16_spill] sm:$0xff] %v2172_v50  ;;  %v256_v59 = vperm.slane %v2079_v1, 3  ;;  %v257_v60 = vperm.slane %v2081_v2, 3  ;;  %v258_v39 = vperm.slane %v2083_v3, 3  ;;  %v259_v40 = vperm.slane %v2085_v4, 3 }
  0x35   :  { %1801 = vst [vmem:[#allocation7] sm:$0xf] %v2172_v50  ;;  %v260_v61 = vperm.slane %v2087_v5, 3  ;;  %v261_v62 = vperm.slane %v2091_v8, 3  ;;  %v262_v63 = vperm.slane %v2093_v9, 3  ;;  %v263_v0 = vperm.slane %v2098_v13, 3 }
  0x36   :  { %v264_v6 = vmul.f32 %v256_v59, %v66_v54  ;;  %v249_v7 = vadd.f32 %v241_v53, %v225_v27  ;;  %v250_v10 = vadd.f32 %v242_v55, %v226_v28  ;;  %v251_v11 = vadd.f32 %v243_v56, %v227_v47 }
  0x37   :  { %v252_v12 = vadd.f32 %v244_v57, %v228_v48  ;;  %v253_v14 = vadd.f32 %v245_v58, %v229_v49  ;;  %v254_v15 = vadd.f32 %v246_v32, %v230_v51  ;;  %v255_v16 = vadd.f32 %v247_v33, %v231_v52  ;;  %v68_v49 = vld [vmem:[%s3308_s2 + $0x28] sm:$0xff] }
  0x38   :  { %v265_v17 = vmul.f32 %v257_v60, %v66_v54  ;;  %v266_v19 = vmul.f32 %v258_v39, %v66_v54  ;;  %v267_v20 = vmul.f32 %v259_v40, %v66_v54  ;;  %v268_v21 = vmul.f32 %v260_v61, %v66_v54 }
  0x39   :  { %v269_v22 = vmul.f32 %v261_v62, %v66_v54  ;;  %v270_v23 = vmul.f32 %v262_v63, %v66_v54  ;;  %v271_v24 = vmul.f32 %v263_v0, %v66_v54  ;;  %v272_v29 = vadd.f32 %v264_v6, %v248_v38 }
  0x3a   :  { %v280_v27 = vperm.slane %v2079_v1, 4  ;;  %v281_v28 = vperm.slane %v2081_v2, 4  ;;  %v282_v34 = vperm.slane %v2083_v3, 4  ;;  %v283_v35 = vperm.slane %v2085_v4, 4 }
  0x3b   :  { %v284_v36 = vperm.slane %v2087_v5, 4  ;;  %v285_v37 = vperm.slane %v2091_v8, 4  ;;  %v286_v41 = vperm.slane %v2093_v9, 4  ;;  %v287_v42 = vperm.slane %v2098_v13, 4 }
  0x3c   :  { %v288_v43 = vmul.f32 %v280_v27, %v67_v18  ;;  %v273_v44 = vadd.f32 %v265_v17, %v249_v7  ;;  %v274_v45 = vadd.f32 %v266_v19, %v250_v10  ;;  %v275_v25 = vadd.f32 %v267_v20, %v251_v11 }
  0x3d   :  { %v276_v26 = vadd.f32 %v268_v21, %v252_v12  ;;  %v277_v31 = vadd.f32 %v269_v22, %v253_v14  ;;  %v278_v46 = vadd.f32 %v270_v23, %v254_v15  ;;  %v279_v47 = vadd.f32 %v271_v24, %v255_v16  ;;  %v69_v14 = vld [vmem:[%s3308_s2 + $0x30] sm:$0xff] }
  0x3e   :  { %v289_v48 = vmul.f32 %v281_v28, %v67_v18  ;;  %v290_v51 = vmul.f32 %v282_v34, %v67_v18  ;;  %v291_v52 = vmul.f32 %v283_v35, %v67_v18  ;;  %v292_v53 = vmul.f32 %v284_v36, %v67_v18 }
  0x3f   :  { %v293_v54 = vmul.f32 %v285_v37, %v67_v18  ;;  %v294_v55 = vmul.f32 %v286_v41, %v67_v18  ;;  %v295_v56 = vmul.f32 %v287_v42, %v67_v18  ;;  %v296_v57 = vadd.f32 %v288_v43, %v272_v29 }
  0x40   :  { %v304_v58 = vperm.slane %v2079_v1, 5  ;;  %v305_v32 = vperm.slane %v2081_v2, 5  ;;  %v306_v33 = vperm.slane %v2083_v3, 5  ;;  %v307_v38 = vperm.slane %v2085_v4, 5 }
  0x41   :  { %v308_v59 = vperm.slane %v2087_v5, 5  ;;  %v309_v60 = vperm.slane %v2091_v8, 5  ;;  %v310_v39 = vperm.slane %v2093_v9, 5  ;;  %v311_v40 = vperm.slane %v2098_v13, 5 }
  0x42   :  { %v312_v61 = vmul.f32 %v304_v58, %v68_v49  ;;  %v297_v62 = vadd.f32 %v289_v48, %v273_v44  ;;  %v298_v63 = vadd.f32 %v290_v51, %v274_v45  ;;  %v299_v0 = vadd.f32 %v291_v52, %v275_v25 }
  0x43   :  { %v300_v6 = vadd.f32 %v292_v53, %v276_v26  ;;  %v301_v7 = vadd.f32 %v293_v54, %v277_v31  ;;  %v302_v10 = vadd.f32 %v294_v55, %v278_v46  ;;  %v303_v11 = vadd.f32 %v295_v56, %v279_v47  ;;  %v70_v54 = vld [vmem:[%s3308_s2 + $0x38] sm:$0xff] }
  0x44   :  { %v313_v12 = vmul.f32 %v305_v32, %v68_v49  ;;  %v314_v15 = vmul.f32 %v306_v33, %v68_v49  ;;  %v315_v16 = vmul.f32 %v307_v38, %v68_v49  ;;  %v316_v17 = vmul.f32 %v308_v59, %v68_v49 }
  0x45   :  { %v317_v18 = vmul.f32 %v309_v60, %v68_v49  ;;  %v318_v19 = vmul.f32 %v310_v39, %v68_v49  ;;  %v319_v20 = vmul.f32 %v311_v40, %v68_v49  ;;  %v320_v21 = vadd.f32 %v312_v61, %v296_v57 }
  0x46   :  { %v328_v22 = vperm.slane %v2079_v1, 6  ;;  %v329_v23 = vperm.slane %v2081_v2, 6  ;;  %v330_v24 = vperm.slane %v2083_v3, 6  ;;  %v331_v29 = vperm.slane %v2085_v4, 6 }
  0x47   :  { %v332_v27 = vperm.slane %v2087_v5, 6  ;;  %v333_v28 = vperm.slane %v2091_v8, 6  ;;  %v334_v34 = vperm.slane %v2093_v9, 6  ;;  %v335_v35 = vperm.slane %v2098_v13, 6 }
  0x48   :  { %v336_v36 = vmul.f32 %v328_v22, %v69_v14  ;;  %v321_v37 = vadd.f32 %v313_v12, %v297_v62  ;;  %v322_v41 = vadd.f32 %v314_v15, %v298_v63  ;;  %v323_v42 = vadd.f32 %v315_v16, %v299_v0  ;;  %v85_v22 = vld [vmem:[%s3311_s5 + $0x10] sm:$0xff] }
  0x49   :  { %v324_v43 = vadd.f32 %v316_v17, %v300_v6  ;;  %v325_v44 = vadd.f32 %v317_v18, %v301_v7  ;;  %v326_v45 = vadd.f32 %v318_v19, %v302_v10  ;;  %v327_v25 = vadd.f32 %v319_v20, %v303_v11  ;;  %v83_v20 = vld [vmem:[%s3311_s5] sm:$0xff] }
  0x4a   :  { %v337_v26 = vmul.f32 %v329_v23, %v69_v14  ;;  %v338_v31 = vmul.f32 %v330_v24, %v69_v14  ;;  %v339_v46 = vmul.f32 %v331_v29, %v69_v14  ;;  %v340_v47 = vmul.f32 %v332_v27, %v69_v14  ;;  %v86_v23 = vld [vmem:[%s3311_s5 + $0x18] sm:$0xff] }
  0x4b   :  { %v341_v48 = vmul.f32 %v333_v28, %v69_v14  ;;  %v342_v49 = vmul.f32 %v334_v34, %v69_v14  ;;  %v343_v51 = vmul.f32 %v335_v35, %v69_v14  ;;  %v344_v52 = vadd.f32 %v336_v36, %v320_v21  ;;  %v84_v21 = vld [vmem:[%s3311_s5 + $0x8] sm:$0xff] }
  0x4c   :  { %v352_v53 = vperm.slane %v2079_v1, 7  ;;  %v353_v55 = vperm.slane %v2081_v2, 7  ;;  %v354_v56 = vperm.slane %v2083_v3, 7  ;;  %v355_v57 = vperm.slane %v2085_v4, 7 }
  0x4d   :  { %v356_v58 = vperm.slane %v2087_v5, 7  ;;  %v345_v32 = vadd.f32 %v337_v26, %v321_v37  ;;  %v357_v33 = vperm.slane %v2091_v8, 7  ;;  %v358_v38 = vperm.slane %v2093_v9, 7 }
  0x4e   :  { %v359_v59 = vperm.slane %v2098_v13, 7  ;;  %v346_v60 = vadd.f32 %v338_v31, %v322_v41  ;;  %v347_v39 = vadd.f32 %v339_v46, %v323_v42  ;;  %v348_v40 = vadd.f32 %v340_v47, %v324_v43  ;;  %v87_v47 = vld [vmem:[%s3311_s5 + $0x20] sm:$0xf]  ;;  %s1839_s5 = sshll.u32 %s3315_s9, 4  ;;  %s1840_s5 = int_to_ptr.hbm [resolvable:$true] %s1839_s5 }
  0x4f   :  { %v349_v61 = vadd.f32 %v341_v48, %v325_v44  ;;  %v350_v62 = vadd.f32 %v342_v49, %v326_v45  ;;  %v360_v63 = vmul.f32 %v352_v53, %v70_v54  ;;  %v361_v0 = vmul.f32 %v353_v55, %v70_v54 }
  0x50   :  { %v362_v6 = vmul.f32 %v354_v56, %v70_v54  ;;  %v363_v7 = vmul.f32 %v355_v57, %v70_v54  ;;  %v364_v10 = vmul.f32 %v356_v58, %v70_v54  ;;  %v365_v11 = vmul.f32 %v357_v33, %v70_v54 }
  0x51   :  { %v366_v12 = vmul.f32 %v358_v38, %v70_v54  ;;  %v351_v5 = vadd.f32 %v343_v51, %v327_v25  ;;  %v367_v14 = vmul.f32 %v359_v59, %v70_v54  ;;  %v2231_v15 = vadd.f32 %v360_v63, %v344_v52 }
  0x52   :  { %v2233_v8 = vadd.f32 %v361_v0, %v345_v32  ;;  %v2235_v9 = vadd.f32 %v362_v6, %v346_v60  ;;  %v2237_v13 = vadd.f32 %v363_v7, %v347_v39  ;;  %v2239_v16 = vadd.f32 %v364_v10, %v348_v40 }
  0x53   :  { %v2241_v17 = vadd.f32 %v365_v11, %v349_v61  ;;  %v2243_v18 = vadd.f32 %v366_v12, %v350_v62  ;;  %v2245_v19 = vadd.f32 %v367_v14, %v351_v5  ;;  %v410_v24 = vmul.f32 %v2231_v15, %v2079_v1 }
  0x54   :  { %v411_v29 = vmul.f32 %v2233_v8, %v2079_v1  ;;  %v412_v27 = vmul.f32 %v2235_v9, %v2079_v1  ;;  %v413_v28 = vmul.f32 %v2237_v13, %v2079_v1  ;;  %v414_v34 = vmul.f32 %v2239_v16, %v2079_v1 }
  0x55   :  { %v415_v35 = vmul.f32 %v2241_v17, %v2079_v1  ;;  %v416_v36 = vmul.f32 %v2243_v18, %v2079_v1  ;;  %v385_v37 = vrot.slane %v83_v20, 6  ;;  %v386_v41 = vrot.slane %v84_v21, 6 }
  0x56   :  { %v417_v42 = vmul.f32 %v2245_v19, %v2079_v1  ;;  %v394_v43 = vrot.slane %v84_v21, 7  ;;  %v395_v44 = vrot.slane %v85_v22, 7  ;;  %v400_v45 = vrot.slane %v85_v22, 5 }
  0x57   :  { %v401_v25 = vrot.slane %v86_v23, 5  ;;  %v418_v26 = vrot.slane %v410_v24, 4  ;;  %v424_v31 = vrot.slane %v411_v29, 4  ;;  %v430_v46 = vrot.slane %v412_v27, 4 }
  0x58   :  { %v436_v48 = vrot.slane %v413_v28, 4  ;;  %v442_v49 = vrot.slane %v414_v34, 4  ;;  %v448_v51 = vrot.slane %v415_v35, 4  ;;  %v454_v52 = vrot.slane %v416_v36, 4 }
  0x59   :  { %v378_v53 = vrot.slane %v83_v20, 1  ;;  %v381_v54 = vrot.slane %v83_v20, 3  ;;  %v390_v55 = vrot.slane %v84_v21, 2  ;;  %v460_v56 = vrot.slane %v417_v42, 4 }
  0x5a   :  { %v387_v1 = vsel %vm148_vm1, %v385_v37, %v386_v41  ;;  %v396_v57 = vsel %vm146_vm0, %v394_v43, %v395_v44  ;;  %v402_v58 = vsel %vm150_vm2, %v400_v45, %v401_v25  ;;  %v406_v32 = vrot.slane %v86_v23, 4 }
  0x5b   :  { %v407_v33 = vrot.slane %v87_v47, 4  ;;  %v419_v38 = vadd.f32 %v418_v26, %v410_v24  ;;  %v425_v59 = vadd.f32 %v424_v31, %v411_v29  ;;  %v431_v60 = vadd.f32 %v430_v46, %v412_v27 }
  0x5c   :  { %v437_v39 = vadd.f32 %v436_v48, %v413_v28  ;;  %v443_v40 = vadd.f32 %v442_v49, %v414_v34  ;;  %v449_v61 = vadd.f32 %v448_v51, %v415_v35  ;;  %v455_v62 = vadd.f32 %v454_v52, %v416_v36 }
  0x5d   :  { %v2282_v63 = vsel %vm146_vm0, %v83_v20, 0.0  ;;  %v2285_v0 = vsel %vm148_vm1, %v378_v53, 0.0  ;;  %v2288_v6 = vsel %vm150_vm2, %v381_v54, 0.0  ;;  %v461_v7 = vadd.f32 %v460_v56, %v417_v42 }
  0x5e   :  { %3328 = vst [vmem:[#allocation17_spill] sm:$0xff] %v2282_v63  ;;  %v2291_v10 = vsel %vm152_vm3, %v387_v1, 0.0  ;;  %v2294_v11 = vsel %vm154_vm4, %v390_v55, 0.0  ;;  %v2297_v12 = vsel %vm156_vm5, %v396_v57, 0.0  ;;  %v2300_v5 = vsel %vm158_vm6, %v402_v58, 0.0 }
  0x5f   :  { %3329 = vst [vmem:[#allocation18_spill] sm:$0xff] %v2285_v0  ;;  %v2303_v14 = vsel %vm152_vm3, %v406_v32, %v407_v33  ;;  %v420_v20 = vrot.slane %v419_v38, 2  ;;  %v426_v21 = vrot.slane %v425_v59, 2  ;;  %v432_v22 = vrot.slane %v431_v60, 2 }
  0x60   :  { %3330 = vst [vmem:[#allocation19_spill] sm:$0xff] %v2288_v6  ;;  %v438_v23 = vrot.slane %v437_v39, 2  ;;  %v444_v24 = vrot.slane %v443_v40, 2  ;;  %v450_v29 = vrot.slane %v449_v61, 2  ;;  %v456_v27 = vrot.slane %v455_v62, 2 }
  0x61   :  { %3331 = vst [vmem:[#allocation20_spill] sm:$0xff] %v2291_v10  ;;  %v462_v28 = vrot.slane %v461_v7, 2  ;;  %v466_v34 = vmul.f32 %v2231_v15, %v2081_v2  ;;  %v467_v35 = vmul.f32 %v2233_v8, %v2081_v2  ;;  %v468_v36 = vmul.f32 %v2235_v9, %v2081_v2 }
  0x62   :  { %3332 = vst [vmem:[#allocation21_spill] sm:$0xff] %v2294_v11  ;;  %v469_v37 = vmul.f32 %v2237_v13, %v2081_v2  ;;  %v470_v41 = vmul.f32 %v2239_v16, %v2081_v2  ;;  %v471_v42 = vmul.f32 %v2241_v17, %v2081_v2  ;;  %v472_v43 = vmul.f32 %v2243_v18, %v2081_v2 }
  0x63   :  { %3333 = vst [vmem:[#allocation22_spill] sm:$0xff] %v2297_v12  ;;  %v421_v44 = vadd.f32 %v420_v20, %v419_v38  ;;  %v427_v45 = vadd.f32 %v426_v21, %v425_v59  ;;  %v433_v25 = vadd.f32 %v432_v22, %v431_v60  ;;  %v473_v26 = vmul.f32 %v2245_v19, %v2081_v2 }
  0x64   :  { %3334 = vst [vmem:[#allocation23_spill] sm:$0xff] %v2300_v5  ;;  %v439_v31 = vadd.f32 %v438_v23, %v437_v39  ;;  %v445_v46 = vadd.f32 %v444_v24, %v443_v40  ;;  %v451_v47 = vadd.f32 %v450_v29, %v449_v61  ;;  %v457_v48 = vadd.f32 %v456_v27, %v455_v62 }
  0x65   :  { %3335 = vst [vmem:[#allocation24_spill] sm:$0xff] %v2303_v14  ;;  %v463_v49 = vadd.f32 %v462_v28, %v461_v7  ;;  %v474_v51 = vrot.slane %v466_v34, 4  ;;  %v480_v52 = vrot.slane %v467_v35, 4  ;;  %v486_v53 = vrot.slane %v468_v36, 4 }
  0x66   :  { %v492_v54 = vrot.slane %v469_v37, 4  ;;  %v498_v55 = vrot.slane %v470_v41, 4  ;;  %v504_v56 = vrot.slane %v471_v42, 4  ;;  %v510_v1 = vrot.slane %v472_v43, 4 }
  0x67   :  { %v422_v57 = vrot.slane %v421_v44, 1  ;;  %v428_v58 = vrot.slane %v427_v45, 1  ;;  %v434_v32 = vrot.slane %v433_v25, 1  ;;  %v516_v33 = vrot.slane %v473_v26, 4 }
  0x68   :  { %v440_v38 = vrot.slane %v439_v31, 1  ;;  %v446_v59 = vrot.slane %v445_v46, 1  ;;  %v452_v60 = vrot.slane %v451_v47, 1  ;;  %v458_v2 = vrot.slane %v457_v48, 1 }
  0x69   :  { %v464_v39 = vrot.slane %v463_v49, 1  ;;  %v475_v40 = vadd.f32 %v474_v51, %v466_v34  ;;  %v481_v61 = vadd.f32 %v480_v52, %v467_v35  ;;  %v487_v62 = vadd.f32 %v486_v53, %v468_v36 }
  0x6a   :  { %v493_v7 = vadd.f32 %v492_v54, %v469_v37  ;;  %v499_v20 = vadd.f32 %v498_v55, %v470_v41  ;;  %v505_v21 = vadd.f32 %v504_v56, %v471_v42  ;;  %v511_v22 = vadd.f32 %v510_v1, %v472_v43 }
  0x6b   :  { %v2321_v23 = vadd.f32 %v422_v57, %v421_v44  ;;  %v2323_v24 = vadd.f32 %v428_v58, %v427_v45  ;;  %v2325_v29 = vadd.f32 %v434_v32, %v433_v25  ;;  %v517_v27 = vadd.f32 %v516_v33, %v473_v26 }
  0x6c   :  { %v2327_v28 = vadd.f32 %v440_v38, %v439_v31  ;;  %v2329_v30 = vadd.f32 %v446_v59, %v445_v46  ;;  %v2331_v50 = vadd.f32 %v452_v60, %v451_v47  ;;  %v2333_v34 = vadd.f32 %v458_v2, %v457_v48 }
  0x6d   :  { %v2335_v35 = vadd.f32 %v464_v39, %v463_v49  ;;  %v476_v36 = vrot.slane %v475_v40, 2  ;;  %v482_v37 = vrot.slane %v481_v61, 2  ;;  %v488_v41 = vrot.slane %v487_v62, 2 }
  0x6e   :  { %3336 = vst [vmem:[#allocation25_spill] sm:$0xff] %v2331_v50  ;;  %v494_v42 = vrot.slane %v493_v7, 2  ;;  %v500_v43 = vrot.slane %v499_v20, 2  ;;  %v506_v44 = vrot.slane %v505_v21, 2  ;;  %v512_v45 = vrot.slane %v511_v22, 2 }
  0x6f   :  { %3337 = vst [vmem:[#allocation26_spill] sm:$0xff] %v2333_v34  ;;  %v518_v25 = vrot.slane %v517_v27, 2  ;;  %v522_v26 = vmul.f32 %v2231_v15, %v2083_v3  ;;  %v523_v31 = vmul.f32 %v2233_v8, %v2083_v3  ;;  %v524_v46 = vmul.f32 %v2235_v9, %v2083_v3 }
  0x70   :  { %3338 = vst [vmem:[#allocation27_spill] sm:$0xff] %v2335_v35  ;;  %v525_v47 = vmul.f32 %v2237_v13, %v2083_v3  ;;  %v526_v48 = vmul.f32 %v2239_v16, %v2083_v3  ;;  %v527_v49 = vmul.f32 %v2241_v17, %v2083_v3  ;;  %v528_v51 = vmul.f32 %v2243_v18, %v2083_v3 }
  0x71   :  { %v477_v52 = vadd.f32 %v476_v36, %v475_v40  ;;  %v483_v53 = vadd.f32 %v482_v37, %v481_v61  ;;  %v489_v54 = vadd.f32 %v488_v41, %v487_v62  ;;  %v529_v55 = vmul.f32 %v2245_v19, %v2083_v3 }
  0x72   :  { %v495_v56 = vadd.f32 %v494_v42, %v493_v7  ;;  %v501_v1 = vadd.f32 %v500_v43, %v499_v20  ;;  %v507_v57 = vadd.f32 %v506_v44, %v505_v21  ;;  %v513_v58 = vadd.f32 %v512_v45, %v511_v22 }
  0x73   :  { %v519_v32 = vadd.f32 %v518_v25, %v517_v27  ;;  %v530_v33 = vrot.slane %v522_v26, 4  ;;  %v536_v38 = vrot.slane %v523_v31, 4  ;;  %v542_v59 = vrot.slane %v524_v46, 4 }
  0x74   :  { %v548_v60 = vrot.slane %v525_v47, 4  ;;  %v554_v2 = vrot.slane %v526_v48, 4  ;;  %v560_v39 = vrot.slane %v527_v49, 4  ;;  %v566_v14 = vrot.slane %v528_v51, 4 }
  0x75   :  { %v478_v5 = vrot.slane %v477_v52, 1  ;;  %v484_v12 = vrot.slane %v483_v53, 1  ;;  %v490_v40 = vrot.slane %v489_v54, 1  ;;  %v572_v61 = vrot.slane %v529_v55, 4 }
  0x76   :  { %v496_v62 = vrot.slane %v495_v56, 1  ;;  %v502_v36 = vrot.slane %v501_v1, 1  ;;  %v508_v37 = vrot.slane %v507_v57, 1  ;;  %v514_v3 = vrot.slane %v513_v58, 1 }
  0x77   :  { %v520_v7 = vrot.slane %v519_v32, 1  ;;  %v531_v20 = vadd.f32 %v530_v33, %v522_v26  ;;  %v537_v21 = vadd.f32 %v536_v38, %v523_v31  ;;  %v543_v22 = vadd.f32 %v542_v59, %v524_v46 }
  0x78   :  { %v549_v27 = vadd.f32 %v548_v60, %v525_v47  ;;  %v555_v41 = vadd.f32 %v554_v2, %v526_v48  ;;  %v561_v42 = vadd.f32 %v560_v39, %v527_v49  ;;  %v567_v43 = vadd.f32 %v566_v14, %v528_v51 }
  0x79   :  { %v2353_v44 = vadd.f32 %v478_v5, %v477_v52  ;;  %v2355_v45 = vadd.f32 %v484_v12, %v483_v53  ;;  %v2357_v25 = vadd.f32 %v490_v40, %v489_v54  ;;  %v573_v11 = vadd.f32 %v572_v61, %v529_v55 }
  0x7a   :  { %v2359_v10 = vadd.f32 %v496_v62, %v495_v56  ;;  %v2361_v6 = vadd.f32 %v502_v36, %v501_v1  ;;  %v2363_v0 = vadd.f32 %v508_v37, %v507_v57  ;;  %v2365_v26 = vadd.f32 %v514_v3, %v513_v58 }
  0x7b   :  { %v2367_v31 = vadd.f32 %v520_v7, %v519_v32  ;;  %v532_v46 = vrot.slane %v531_v20, 2  ;;  %v538_v47 = vrot.slane %v537_v21, 2  ;;  %v544_v14 = vrot.slane %v543_v22, 2 }
  0x7c   :  { %3339 = vst [vmem:[#allocation28_spill] sm:$0xff] %v2363_v0  ;;  %v550_v5 = vrot.slane %v549_v27, 2  ;;  %v556_v48 = vrot.slane %v555_v41, 2  ;;  %v562_v12 = vrot.slane %v561_v42, 2  ;;  %v568_v49 = vrot.slane %v567_v43, 2 }
  0x7d   :  { %3340 = vst [vmem:[#allocation29_spill] sm:$0xff] %v2365_v26  ;;  %v574_v51 = vrot.slane %v573_v11, 2  ;;  %v578_v52 = vmul.f32 %v2231_v15, %v2085_v4  ;;  %v579_v53 = vmul.f32 %v2233_v8, %v2085_v4  ;;  %v580_v54 = vmul.f32 %v2235_v9, %v2085_v4 }
  0x7e   :  { %3341 = vst [vmem:[#allocation30_spill] sm:$0xff] %v2367_v31  ;;  %v581_v55 = vmul.f32 %v2237_v13, %v2085_v4  ;;  %v582_v56 = vmul.f32 %v2239_v16, %v2085_v4  ;;  %v583_v1 = vmul.f32 %v2241_v17, %v2085_v4  ;;  %v584_v57 = vmul.f32 %v2243_v18, %v2085_v4 }
  0x7f   :  { %v533_v58 = vadd.f32 %v532_v46, %v531_v20  ;;  %v539_v32 = vadd.f32 %v538_v47, %v537_v21  ;;  %v545_v33 = vadd.f32 %v544_v14, %v543_v22  ;;  %v585_v38 = vmul.f32 %v2245_v19, %v2085_v4 }
  0x80   :  { %v551_v59 = vadd.f32 %v550_v5, %v549_v27  ;;  %v557_v60 = vadd.f32 %v556_v48, %v555_v41  ;;  %v563_v2 = vadd.f32 %v562_v12, %v561_v42  ;;  %v569_v39 = vadd.f32 %v568_v49, %v567_v43 }
  0x81   :  { %v575_v40 = vadd.f32 %v574_v51, %v573_v11  ;;  %v586_v61 = vrot.slane %v578_v52, 4  ;;  %v592_v62 = vrot.slane %v579_v53, 4  ;;  %v598_v36 = vrot.slane %v580_v54, 4 }
  0x82   :  { %v604_v37 = vrot.slane %v581_v55, 4  ;;  %v610_v3 = vrot.slane %v582_v56, 4  ;;  %v616_v7 = vrot.slane %v583_v1, 4  ;;  %v622_v63 = vrot.slane %v584_v57, 4 }
  0x83   :  { %v534_v35 = vrot.slane %v533_v58, 1  ;;  %v540_v31 = vrot.slane %v539_v32, 1  ;;  %v546_v20 = vrot.slane %v545_v33, 1  ;;  %v628_v21 = vrot.slane %v585_v38, 4 }
  0x84   :  { %v552_v22 = vrot.slane %v551_v59, 1  ;;  %v558_v46 = vrot.slane %v557_v60, 1  ;;  %v564_v47 = vrot.slane %v563_v2, 1  ;;  %v570_v4 = vrot.slane %v569_v39, 1 }
  0x85   :  { %v576_v27 = vrot.slane %v575_v40, 1  ;;  %v587_v41 = vadd.f32 %v586_v61, %v578_v52  ;;  %v593_v42 = vadd.f32 %v592_v62, %v579_v53  ;;  %v599_v43 = vadd.f32 %v598_v36, %v580_v54 }
  0x86   :  { %v605_v11 = vadd.f32 %v604_v37, %v581_v55  ;;  %v611_v14 = vadd.f32 %v610_v3, %v582_v56  ;;  %v617_v5 = vadd.f32 %v616_v7, %v583_v1  ;;  %v623_v48 = vadd.f32 %v622_v63, %v584_v57 }
  0x87   :  { %v2385_v12 = vadd.f32 %v534_v35, %v533_v58  ;;  %v2387_v49 = vadd.f32 %v540_v31, %v539_v32  ;;  %v2389_v51 = vadd.f32 %v546_v20, %v545_v33  ;;  %v629_v34 = vadd.f32 %v628_v21, %v585_v38  ;;  %v1877_v58 = vld [vmem:[#allocation5 + $0x20] sm:$0xff] }
  0x88   :  { %v2391_v26 = vadd.f32 %v552_v22, %v551_v59  ;;  %v2393_v50 = vadd.f32 %v558_v46, %v557_v60  ;;  %v2395_v0 = vadd.f32 %v564_v47, %v563_v2  ;;  %v2397_v52 = vadd.f32 %v570_v4, %v569_v39 }
  0x89   :  { %3342 = vst [vmem:[#allocation31_spill] sm:$0xff] %v2385_v12  ;;  %v2399_v53 = vadd.f32 %v576_v27, %v575_v40  ;;  %v588_v54 = vrot.slane %v587_v41, 2  ;;  %v594_v55 = vrot.slane %v593_v42, 2  ;;  %v600_v63 = vrot.slane %v599_v43, 2 }
  0x8a   :  { %3343 = vst [vmem:[#allocation32_spill] sm:$0xff] %v2387_v49  ;;  %v606_v35 = vrot.slane %v605_v11, 2  ;;  %v612_v56 = vrot.slane %v611_v14, 2  ;;  %v618_v31 = vrot.slane %v617_v5, 2  ;;  %v624_v1 = vrot.slane %v623_v48, 2 }
  0x8b   :  { %3344 = vst [vmem:[#allocation33_spill] sm:$0xff] %v2389_v51  ;;  %v630_v57 = vrot.slane %v629_v34, 2  ;;  %v634_v32 = vmul.f32 %v1877_v58, %v2231_v15  ;;  %v635_v33 = vmul.f32 %v1877_v58, %v2233_v8  ;;  %v636_v38 = vmul.f32 %v1877_v58, %v2235_v9 }
  0x8c   :  { %3345 = vst [vmem:[#allocation34_spill] sm:$0xff] %v2391_v26  ;;  %v637_v59 = vmul.f32 %v1877_v58, %v2237_v13  ;;  %v638_v60 = vmul.f32 %v1877_v58, %v2239_v16  ;;  %v639_v2 = vmul.f32 %v1877_v58, %v2241_v17  ;;  %v640_v39 = vmul.f32 %v1877_v58, %v2243_v18 }
  0x8d   :  { %3346 = vst [vmem:[#allocation35_spill] sm:$0xff] %v2393_v50  ;;  %v589_v40 = vadd.f32 %v588_v54, %v587_v41  ;;  %v595_v61 = vadd.f32 %v594_v55, %v593_v42  ;;  %v601_v62 = vadd.f32 %v600_v63, %v599_v43  ;;  %v641_v36 = vmul.f32 %v1877_v58, %v2245_v19 }
  0x8e   :  { %3347 = vst [vmem:[#allocation36_spill] sm:$0xff] %v2395_v0  ;;  %v607_v37 = vadd.f32 %v606_v35, %v605_v11  ;;  %v613_v3 = vadd.f32 %v612_v56, %v611_v14  ;;  %v619_v7 = vadd.f32 %v618_v31, %v617_v5  ;;  %v625_v20 = vadd.f32 %v624_v1, %v623_v48 }
  0x8f   :  { %3348 = vst [vmem:[#allocation37_spill] sm:$0xff] %v2397_v52  ;;  %v631_v21 = vadd.f32 %v630_v57, %v629_v34  ;;  %v642_v22 = vrot.slane %v634_v32, 4  ;;  %v648_v46 = vrot.slane %v635_v33, 4  ;;  %v654_v47 = vrot.slane %v636_v38, 4 }
  0x90   :  { %3349 = vst [vmem:[#allocation38_spill] sm:$0xff] %v2399_v53  ;;  %v660_v4 = vrot.slane %v637_v59, 4  ;;  %v666_v27 = vrot.slane %v638_v60, 4  ;;  %v672_v53 = vrot.slane %v639_v2, 4  ;;  %v678_v52 = vrot.slane %v640_v39, 4 }
  0x91   :  { %v590_v0 = vrot.slane %v589_v40, 1  ;;  %v596_v50 = vrot.slane %v595_v61, 1  ;;  %v602_v26 = vrot.slane %v601_v62, 1  ;;  %v684_v41 = vrot.slane %v641_v36, 4 }
  0x92   :  { %v608_v42 = vrot.slane %v607_v37, 1  ;;  %v614_v43 = vrot.slane %v613_v3, 1  ;;  %v620_v54 = vrot.slane %v619_v7, 1  ;;  %v626_v55 = vrot.slane %v625_v20, 1 }
  0x93   :  { %v632_v11 = vrot.slane %v631_v21, 1  ;;  %v643_v14 = vadd.f32 %v642_v22, %v634_v32  ;;  %v649_v5 = vadd.f32 %v648_v46, %v635_v33  ;;  %v655_v48 = vadd.f32 %v654_v47, %v636_v38 }
  0x94   :  { %v661_v34 = vadd.f32 %v660_v4, %v637_v59  ;;  %v667_v63 = vadd.f32 %v666_v27, %v638_v60  ;;  %v673_v35 = vadd.f32 %v672_v53, %v639_v2  ;;  %v679_v56 = vadd.f32 %v678_v52, %v640_v39  ;;  %v1878_v2 = vld [vmem:[#allocation5 + $0x28] sm:$0xff] }
  0x95   :  { %v2409_v31 = vadd.f32 %v590_v0, %v589_v40  ;;  %v2411_v1 = vadd.f32 %v596_v50, %v595_v61  ;;  %v2413_v57 = vadd.f32 %v602_v26, %v601_v62  ;;  %v685_v58 = vadd.f32 %v684_v41, %v641_v36 }
  0x96   :  { %v2415_v51 = vadd.f32 %v608_v42, %v607_v37  ;;  %v2417_v49 = vadd.f32 %v614_v43, %v613_v3  ;;  %v2419_v12 = vadd.f32 %v620_v54, %v619_v7  ;;  %v2421_v32 = vadd.f32 %v626_v55, %v625_v20 }
  0x97   :  { %3350 = vst [vmem:[#allocation39_spill] sm:$0xff] %v2409_v31  ;;  %v2423_v33 = vadd.f32 %v632_v11, %v631_v21  ;;  %v644_v38 = vrot.slane %v643_v14, 2  ;;  %v650_v53 = vrot.slane %v649_v5, 2  ;;  %v656_v52 = vrot.slane %v655_v48, 2 }
  0x98   :  { %3351 = vst [vmem:[#allocation40_spill] sm:$0xff] %v2411_v1  ;;  %v662_v0 = vrot.slane %v661_v34, 2  ;;  %v668_v59 = vrot.slane %v667_v63, 2  ;;  %v674_v50 = vrot.slane %v673_v35, 2  ;;  %v680_v60 = vrot.slane %v679_v56, 2 }
  0x99   :  { %3352 = vst [vmem:[#allocation41_spill] sm:$0xff] %v2413_v57  ;;  %v686_v26 = vrot.slane %v685_v58, 2  ;;  %v690_v39 = vmul.f32 %v1878_v2, %v2231_v15  ;;  %v691_v40 = vmul.f32 %v1878_v2, %v2233_v8  ;;  %v692_v61 = vmul.f32 %v1878_v2, %v2235_v9 }
  0x9a   :  { %3353 = vst [vmem:[#allocation42_spill] sm:$0xff] %v2415_v51  ;;  %v693_v62 = vmul.f32 %v1878_v2, %v2237_v13  ;;  %v694_v36 = vmul.f32 %v1878_v2, %v2239_v16  ;;  %v695_v37 = vmul.f32 %v1878_v2, %v2241_v17  ;;  %v696_v3 = vmul.f32 %v1878_v2, %v2243_v18 }
  0x9b   :  { %3354 = vst [vmem:[#allocation43_spill] sm:$0xff] %v2417_v49  ;;  %v645_v7 = vadd.f32 %v644_v38, %v643_v14  ;;  %v651_v20 = vadd.f32 %v650_v53, %v649_v5  ;;  %v657_v21 = vadd.f32 %v656_v52, %v655_v48  ;;  %v697_v22 = vmul.f32 %v1878_v2, %v2245_v19 }
  0x9c   :  { %3355 = vst [vmem:[#allocation44_spill] sm:$0xff] %v2419_v12  ;;  %v663_v46 = vadd.f32 %v662_v0, %v661_v34  ;;  %v669_v47 = vadd.f32 %v668_v59, %v667_v63  ;;  %v675_v4 = vadd.f32 %v674_v50, %v673_v35  ;;  %v681_v27 = vadd.f32 %v680_v60, %v679_v56 }
  0x9d   :  { %3356 = vst [vmem:[#allocation45_spill] sm:$0xff] %v2421_v32  ;;  %v687_v41 = vadd.f32 %v686_v26, %v685_v58  ;;  %v698_v42 = vrot.slane %v690_v39, 4  ;;  %v704_v43 = vrot.slane %v691_v40, 4  ;;  %v710_v54 = vrot.slane %v692_v61, 4 }
  0x9e   :  { %3357 = vst [vmem:[#allocation46_spill] sm:$0xff] %v2423_v33  ;;  %v716_v55 = vrot.slane %v693_v62, 4  ;;  %v722_v11 = vrot.slane %v694_v36, 4  ;;  %v728_v33 = vrot.slane %v695_v37, 4  ;;  %v734_v32 = vrot.slane %v696_v3, 4 }
  0x9f   :  { %v646_v12 = vrot.slane %v645_v7, 1  ;;  %v652_v49 = vrot.slane %v651_v20, 1  ;;  %v658_v51 = vrot.slane %v657_v21, 1  ;;  %v740_v14 = vrot.slane %v697_v22, 4 }
  0xa0   :  { %v664_v5 = vrot.slane %v663_v46, 1  ;;  %v670_v48 = vrot.slane %v669_v47, 1  ;;  %v676_v38 = vrot.slane %v675_v4, 1  ;;  %v682_v53 = vrot.slane %v681_v27, 1 }
  0xa1   :  { %v688_v34 = vrot.slane %v687_v41, 1  ;;  %v699_v63 = vadd.f32 %v698_v42, %v690_v39  ;;  %v705_v35 = vadd.f32 %v704_v43, %v691_v40  ;;  %v711_v56 = vadd.f32 %v710_v54, %v692_v61 }
  0xa2   :  { %v717_v58 = vadd.f32 %v716_v55, %v693_v62  ;;  %v723_v52 = vadd.f32 %v722_v11, %v694_v36  ;;  %v729_v0 = vadd.f32 %v728_v33, %v695_v37  ;;  %v735_v59 = vadd.f32 %v734_v32, %v696_v3  ;;  %v1879_v37 = vld [vmem:[#allocation5 + $0x30] sm:$0xff] }
  0xa3   :  { %v2433_v50 = vadd.f32 %v646_v12, %v645_v7  ;;  %v2435_v60 = vadd.f32 %v652_v49, %v651_v20  ;;  %v2437_v26 = vadd.f32 %v658_v51, %v657_v21  ;;  %v741_v2 = vadd.f32 %v740_v14, %v697_v22 }
  0xa4   :  { %v2439_v57 = vadd.f32 %v664_v5, %v663_v46  ;;  %v2441_v1 = vadd.f32 %v670_v48, %v669_v47  ;;  %v2443_v31 = vadd.f32 %v676_v38, %v675_v4  ;;  %v2445_v39 = vadd.f32 %v682_v53, %v681_v27 }
  0xa5   :  { %3358 = vst [vmem:[#allocation47_spill] sm:$0xff] %v2433_v50  ;;  %v2447_v40 = vadd.f32 %v688_v34, %v687_v41  ;;  %v700_v61 = vrot.slane %v699_v63, 2  ;;  %v706_v33 = vrot.slane %v705_v35, 2  ;;  %v712_v32 = vrot.slane %v711_v56, 2 }
  0xa6   :  { %3359 = vst [vmem:[#allocation48_spill] sm:$0xff] %v2435_v60  ;;  %v718_v12 = vrot.slane %v717_v58, 2  ;;  %v724_v62 = vrot.slane %v723_v52, 2  ;;  %v730_v49 = vrot.slane %v729_v0, 2  ;;  %v736_v36 = vrot.slane %v735_v59, 2 }
  0xa7   :  { %3360 = vst [vmem:[#allocation49_spill] sm:$0xff] %v2437_v26  ;;  %v742_v51 = vrot.slane %v741_v2, 2  ;;  %v746_v3 = vmul.f32 %v1879_v37, %v2231_v15  ;;  %v747_v7 = vmul.f32 %v1879_v37, %v2233_v8  ;;  %v748_v20 = vmul.f32 %v1879_v37, %v2235_v9 }
  0xa8   :  { %3361 = vst [vmem:[#allocation50_spill] sm:$0xff] %v2439_v57  ;;  %v749_v21 = vmul.f32 %v1879_v37, %v2237_v13  ;;  %v750_v22 = vmul.f32 %v1879_v37, %v2239_v16  ;;  %v751_v46 = vmul.f32 %v1879_v37, %v2241_v17  ;;  %v752_v47 = vmul.f32 %v1879_v37, %v2243_v18 }
  0xa9   :  { %3362 = vst [vmem:[#allocation51_spill] sm:$0xff] %v2441_v1  ;;  %v701_v4 = vadd.f32 %v700_v61, %v699_v63  ;;  %v707_v27 = vadd.f32 %v706_v33, %v705_v35  ;;  %v713_v41 = vadd.f32 %v712_v32, %v711_v56  ;;  %v753_v42 = vmul.f32 %v1879_v37, %v2245_v19 }
  0xaa   :  { %3363 = vst [vmem:[#allocation52_spill] sm:$0xff] %v2443_v31  ;;  %v719_v43 = vadd.f32 %v718_v12, %v717_v58  ;;  %v725_v54 = vadd.f32 %v724_v62, %v723_v52  ;;  %v731_v55 = vadd.f32 %v730_v49, %v729_v0  ;;  %v737_v11 = vadd.f32 %v736_v36, %v735_v59 }
  0xab   :  { %3364 = vst [vmem:[#allocation53_spill] sm:$0xff] %v2445_v39  ;;  %v743_v14 = vadd.f32 %v742_v51, %v741_v2  ;;  %v754_v5 = vrot.slane %v746_v3, 4  ;;  %v760_v48 = vrot.slane %v747_v7, 4  ;;  %v766_v38 = vrot.slane %v748_v20, 4 }
  0xac   :  { %3365 = vst [vmem:[#allocation54_spill] sm:$0xff] %v2447_v40  ;;  %v772_v53 = vrot.slane %v749_v21, 4  ;;  %v778_v34 = vrot.slane %v750_v22, 4  ;;  %v784_v40 = vrot.slane %v751_v46, 4  ;;  %v790_v39 = vrot.slane %v752_v47, 4 }
  0xad   :  { %v702_v31 = vrot.slane %v701_v4, 1  ;;  %v708_v1 = vrot.slane %v707_v27, 1  ;;  %v714_v57 = vrot.slane %v713_v41, 1  ;;  %v796_v63 = vrot.slane %v753_v42, 4 }
  0xae   :  { %v720_v35 = vrot.slane %v719_v43, 1  ;;  %v726_v56 = vrot.slane %v725_v54, 1  ;;  %v732_v61 = vrot.slane %v731_v55, 1  ;;  %v738_v33 = vrot.slane %v737_v11, 1 }
  0xaf   :  { %v744_v58 = vrot.slane %v743_v14, 1  ;;  %v755_v52 = vadd.f32 %v754_v5, %v746_v3  ;;  %v761_v0 = vadd.f32 %v760_v48, %v747_v7  ;;  %v767_v59 = vadd.f32 %v766_v38, %v748_v20 }
  0xb0   :  { %v773_v2 = vadd.f32 %v772_v53, %v749_v21  ;;  %v779_v32 = vadd.f32 %v778_v34, %v750_v22  ;;  %v785_v12 = vadd.f32 %v784_v40, %v751_v46  ;;  %v791_v62 = vadd.f32 %v790_v39, %v752_v47  ;;  %v1880_v46 = vld [vmem:[#allocation5 + $0x38] sm:$0xff] }
  0xb1   :  { %v2457_v49 = vadd.f32 %v702_v31, %v701_v4  ;;  %v2459_v36 = vadd.f32 %v708_v1, %v707_v27  ;;  %v2461_v51 = vadd.f32 %v714_v57, %v713_v41  ;;  %v797_v37 = vadd.f32 %v796_v63, %v753_v42 }
  0xb2   :  { %v2463_v26 = vadd.f32 %v720_v35, %v719_v43  ;;  %v2465_v60 = vadd.f32 %v726_v56, %v725_v54  ;;  %v2467_v50 = vadd.f32 %v732_v61, %v731_v55  ;;  %v2469_v3 = vadd.f32 %v738_v33, %v737_v11 }
  0xb3   :  { %v2471_v7 = vadd.f32 %v744_v58, %v743_v14  ;;  %v756_v20 = vrot.slane %v755_v52, 2  ;;  %v762_v40 = vrot.slane %v761_v0, 2  ;;  %v768_v39 = vrot.slane %v767_v59, 2 }
  0xb4   :  { %3366 = vst [vmem:[#allocation55_spill] sm:$0xff] %v2463_v26  ;;  %v774_v31 = vrot.slane %v773_v2, 2  ;;  %v780_v21 = vrot.slane %v779_v32, 2  ;;  %v786_v1 = vrot.slane %v785_v12, 2  ;;  %v792_v22 = vrot.slane %v791_v62, 2 }
  0xb5   :  { %3367 = vst [vmem:[#allocation56_spill] sm:$0xff] %v2465_v60  ;;  %v798_v57 = vrot.slane %v797_v37, 2  ;;  %v802_v47 = vmul.f32 %v1880_v46, %v2231_v15  ;;  %v803_v4 = vmul.f32 %v1880_v46, %v2233_v8  ;;  %v804_v27 = vmul.f32 %v1880_v46, %v2235_v9 }
  0xb6   :  { %3368 = vst [vmem:[#allocation57_spill] sm:$0xff] %v2467_v50  ;;  %v805_v41 = vmul.f32 %v1880_v46, %v2237_v13  ;;  %v806_v42 = vmul.f32 %v1880_v46, %v2239_v16  ;;  %v807_v43 = vmul.f32 %v1880_v46, %v2241_v17  ;;  %v808_v54 = vmul.f32 %v1880_v46, %v2243_v18 }
  0xb7   :  { %3369 = vst [vmem:[#allocation58_spill] sm:$0xff] %v2469_v3  ;;  %v809_v55 = vmul.f32 %v1880_v46, %v2245_v19  ;;  %v810_v11 = vrot.slane %v802_v47, 4  ;;  %v816_v14 = vrot.slane %v803_v4, 4  ;;  %v822_v5 = vrot.slane %v804_v27, 4 }
  0xb8   :  { %3370 = vst [vmem:[#allocation59_spill] sm:$0xff] %v2471_v7  ;;  %v828_v48 = vrot.slane %v805_v41, 4  ;;  %v834_v38 = vrot.slane %v806_v42, 4  ;;  %v840_v15 = vrot.slane %v807_v43, 4  ;;  %v846_v53 = vrot.slane %v808_v54, 4 }
  0xb9   :  { %v811_v8 = vadd.f32 %v810_v11, %v802_v47  ;;  %v817_v34 = vadd.f32 %v816_v14, %v803_v4  ;;  %v823_v9 = vadd.f32 %v822_v5, %v804_v27  ;;  %v852_v63 = vrot.slane %v809_v55, 4 }
  0xba   :  { %v757_v13 = vadd.f32 %v756_v20, %v755_v52  ;;  %v763_v35 = vadd.f32 %v762_v40, %v761_v0  ;;  %v769_v16 = vadd.f32 %v768_v39, %v767_v59  ;;  %v829_v56 = vadd.f32 %v828_v48, %v805_v41 }
  0xbb   :  { %v775_v17 = vadd.f32 %v774_v31, %v773_v2  ;;  %v781_v61 = vadd.f32 %v780_v21, %v779_v32  ;;  %v787_v18 = vadd.f32 %v786_v1, %v785_v12  ;;  %v793_v33 = vadd.f32 %v792_v22, %v791_v62 }
  0xbc   :  { %v799_v19 = vadd.f32 %v798_v57, %v797_v37  ;;  %v835_v58 = vadd.f32 %v834_v38, %v806_v42  ;;  %v841_v46 = vadd.f32 %v840_v15, %v807_v43  ;;  %v847_v7 = vadd.f32 %v846_v53, %v808_v54 }
  0xbd   :  { %v812_v3 = vrot.slane %v811_v8, 2  ;;  %v818_v50 = vrot.slane %v817_v34, 2  ;;  %v824_v60 = vrot.slane %v823_v9, 2  ;;  %v853_v26 = vadd.f32 %v852_v63, %v809_v55  ;;  %v3372_v63 = vld [vmem:[#allocation25_spill] sm:$0xff] }
  0xbe   :  { %v758_v47 = vrot.slane %v757_v13, 1  ;;  %v764_v4 = vrot.slane %v763_v35, 1  ;;  %v770_v27 = vrot.slane %v769_v16, 1  ;;  %v830_v11 = vrot.slane %v829_v56, 2 }
  0xbf   :  { %v776_v52 = vrot.slane %v775_v17, 1  ;;  %v782_v0 = vrot.slane %v781_v61, 1  ;;  %v788_v59 = vrot.slane %v787_v18, 1  ;;  %v794_v20 = vrot.slane %v793_v33, 1 }
  0xc0   :  { %v800_v2 = vrot.slane %v799_v19, 1  ;;  %v836_v32 = vrot.slane %v835_v58, 2  ;;  %v842_v12 = vrot.slane %v841_v46, 2  ;;  %v848_v62 = vrot.slane %v847_v7, 2 }
  0xc1   :  { %v813_v37 = vadd.f32 %v812_v3, %v811_v8  ;;  %v819_v40 = vadd.f32 %v818_v50, %v817_v34  ;;  %v825_v39 = vadd.f32 %v824_v60, %v823_v9  ;;  %v854_v31 = vrot.slane %v853_v26, 2  ;;  %v3371_v9 = vld [vmem:[#allocation28_spill] sm:$0xff] }
  0xc2   :  { %v2481_v21 = vadd.f32 %v758_v47, %v757_v13  ;;  %v2483_v1 = vadd.f32 %v764_v4, %v763_v35  ;;  %v2485_v22 = vadd.f32 %v770_v27, %v769_v16  ;;  %v831_v57 = vadd.f32 %v830_v11, %v829_v56  ;;  %v3374_v13 = vld [vmem:[#allocation26_spill] sm:$0xff]  ;;  %v3382_v47 = vld [vmem:[#allocation36_spill] sm:$0xff]  ;;  %v3383_v27 = vld [vmem:[#allocation37_spill] sm:$0xff] }
  0xc3   :  { %v2487_v41 = vadd.f32 %v776_v52, %v775_v17  ;;  %v2489_v42 = vadd.f32 %v782_v0, %v781_v61  ;;  %v2491_v43 = vadd.f32 %v788_v59, %v787_v18  ;;  %v2493_v54 = vadd.f32 %v794_v20, %v793_v33  ;;  %v3379_v61 = vld [vmem:[#allocation33_spill] sm:$0xff]  ;;  %v3380_v33 = vld [vmem:[#allocation34_spill] sm:$0xff] }
  0xc4   :  { %v2495_v55 = vadd.f32 %v800_v2, %v799_v19  ;;  %v837_v50 = vadd.f32 %v836_v32, %v835_v58  ;;  %v843_v60 = vadd.f32 %v842_v12, %v841_v46  ;;  %v849_v3 = vadd.f32 %v848_v62, %v847_v7  ;;  %v3381_v58 = vld [vmem:[#allocation35_spill] sm:$0xff]  ;;  %v3384_v20 = vld [vmem:[#allocation38_spill] sm:$0xff] }
  0xc5   :  { %v814_v14 = vrot.slane %v813_v37, 1  ;;  %v820_v5 = vrot.slane %v819_v40, 1  ;;  %v826_v48 = vrot.slane %v825_v39, 1  ;;  %v855_v38 = vadd.f32 %v854_v31, %v853_v26  ;;  %v3385_v12 = vld [vmem:[#allocation39_spill] sm:$0xff] }
  0xc6   :  { %v832_v15 = vrot.slane %v831_v57, 1  ;;  %v858_v53 = vsel %vm146_vm0, %v2321_v23, %v2353_v44  ;;  %v859_v8 = vsel %vm146_vm0, %v2323_v24, %v2355_v45  ;;  %v860_v34 = vsel %vm146_vm0, %v2325_v29, %v2357_v25  ;;  %v3373_v44 = vld [vmem:[#allocation29_spill] sm:$0xff]  ;;  %v3375_v29 = vld [vmem:[#allocation30_spill] sm:$0xff]  ;;  %v3376_v25 = vld [vmem:[#allocation27_spill] sm:$0xff] }
  0xc7   :  { %v861_v7 = vsel %vm146_vm0, %v2327_v28, %v2359_v10  ;;  %v862_v26 = vsel %vm146_vm0, %v2329_v30, %v2361_v6  ;;  %v863_v23 = vsel %vm146_vm0, %v3372_v63, %v3371_v9  ;;  %v864_v24 = vsel %vm146_vm0, %v3374_v13, %v3373_v44  ;;  %v3377_v28 = vld [vmem:[#allocation31_spill] sm:$0xff]  ;;  %v3378_v6 = vld [vmem:[#allocation32_spill] sm:$0xff]  ;;  %v3392_v63 = vld [vmem:[#allocation46_spill] sm:$0xff] }
  0xc8   :  { %v838_v45 = vrot.slane %v837_v50, 1  ;;  %v844_v35 = vrot.slane %v843_v60, 1  ;;  %v850_v16 = vrot.slane %v849_v3, 1  ;;  %v865_v56 = vsel %vm146_vm0, %v3376_v25, %v3375_v29  ;;  %v3394_v13 = vld [vmem:[#allocation47_spill] sm:$0xff]  ;;  %v3395_v29 = vld [vmem:[#allocation48_spill] sm:$0xff] }
  0xc9   :  { %v2521_v10 = vadd.f32 %v814_v14, %v813_v37  ;;  %v866_v30 = vsel %vm148_vm1, %v858_v53, %v3377_v28  ;;  %v867_v17 = vsel %vm148_vm1, %v859_v8, %v3378_v6  ;;  %v868_v18 = vsel %vm148_vm1, %v860_v34, %v3379_v61  ;;  %v3386_v37 = vld [vmem:[#allocation40_spill] sm:$0xff]  ;;  %v3387_v14 = vld [vmem:[#allocation41_spill] sm:$0xff]  ;;  %v3388_v8 = vld [vmem:[#allocation42_spill] sm:$0xff] }
  0xca   :  { %v869_v19 = vsel %vm148_vm1, %v861_v7, %v3380_v33  ;;  %v870_v46 = vsel %vm148_vm1, %v862_v26, %v3381_v58  ;;  %v871_v4 = vsel %vm148_vm1, %v863_v23, %v3382_v47  ;;  %v872_v11 = vsel %vm148_vm1, %v864_v24, %v3383_v27  ;;  %v3401_v6 = vld [vmem:[#allocation54_spill] sm:$0xff]  ;;  %v3402_v61 = vld [vmem:[#allocation17_spill] sm:$0xff]  ;;  %v3404_v58 = vld [vmem:[#allocation19_spill] sm:$0xff] }
  0xcb   :  { %v2537_v52 = vadd.f32 %v820_v5, %v819_v40  ;;  %v2539_v0 = vadd.f32 %v826_v48, %v825_v39  ;;  %v856_v59 = vrot.slane %v855_v38, 1  ;;  %v873_v2 = vsel %vm148_vm1, %v865_v56, %v3384_v20  ;;  %v3389_v39 = vld [vmem:[#allocation43_spill] sm:$0xff]  ;;  %v3390_v48 = vld [vmem:[#allocation44_spill] sm:$0xff]  ;;  %v3396_v56 = vld [vmem:[#allocation49_spill] sm:$0xff] }
  0xcc   :  { %v2543_v32 = vadd.f32 %v832_v15, %v831_v57  ;;  %v874_v62 = vsel %vm150_vm2, %v866_v30, %v3385_v12  ;;  %v875_v31 = vsel %vm150_vm2, %v867_v17, %v3386_v37  ;;  %v876_v53 = vsel %vm150_vm2, %v868_v18, %v3387_v14  ;;  %v3391_v57 = vld [vmem:[#allocation45_spill] sm:$0xff]  ;;  %v3397_v30 = vld [vmem:[#allocation50_spill] sm:$0xff]  ;;  %v3405_v47 = vld [vmem:[#allocation20_spill] sm:$0xff] }
  0xcd   :  { %v877_v40 = vsel %vm150_vm2, %v869_v19, %v3388_v8  ;;  %v878_v5 = vsel %vm150_vm2, %v870_v46, %v3389_v39  ;;  %v879_v34 = vsel %vm150_vm2, %v871_v4, %v3390_v48  ;;  %v880_v15 = vsel %vm150_vm2, %v872_v11, %v3391_v57  ;;  %v3403_v33 = vld [vmem:[#allocation18_spill] sm:$0xff]  ;;  %v3406_v27 = vld [vmem:[#allocation21_spill] sm:$0xff] }
  0xce   :  { %v839_v7 = vadd.f32 %v838_v45, %v837_v50  ;;  %v845_v26 = vadd.f32 %v844_v35, %v843_v60  ;;  %v2559_v9 = vadd.f32 %v850_v16, %v849_v3  ;;  %v881_v23 = vsel %vm150_vm2, %v873_v2, %v3392_v63  ;;  %v3398_v60 = vld [vmem:[#allocation51_spill] sm:$0xff]  ;;  %v3399_v45 = vld [vmem:[#allocation52_spill] sm:$0xff] }
  0xcf   :  { %v2563_v44 = vadd.f32 %v856_v59, %v855_v38  ;;  %v882_v24 = vsel %vm152_vm3, %v874_v62, %v3394_v13  ;;  %v883_v25 = vsel %vm152_vm3, %v875_v31, %v3395_v29  ;;  %v884_v28 = vsel %vm152_vm3, %v876_v53, %v3396_v56  ;;  %v3400_v38 = vld [vmem:[#allocation53_spill] sm:$0xff]  ;;  %v3407_v59 = vld [vmem:[#allocation22_spill] sm:$0xff]  ;;  %v3408_v2 = vld [vmem:[#allocation23_spill] sm:$0xff] }
  0xd0   :  { %v885_v50 = vsel %vm152_vm3, %v877_v40, %v3397_v30  ;;  %v886_v3 = vsel %vm152_vm3, %v878_v5, %v3398_v60  ;;  %v887_v35 = vsel %vm152_vm3, %v879_v34, %v3399_v45  ;;  %v888_v16 = vsel %vm152_vm3, %v880_v15, %v3400_v38  ;;  %v3409_v40 = vld [vmem:[#allocation55_spill] sm:$0xff]  ;;  %v3410_v5 = vld [vmem:[#allocation56_spill] sm:$0xff]  ;;  %v3411_v34 = vld [vmem:[#allocation57_spill] sm:$0xff] }
  0xd1   :  { %3393 = vst [vmem:[#allocation28_spill] sm:$0xff] %v2563_v44  ;;  %v889_v17 = vsel %vm152_vm3, %v881_v23, %v3401_v6  ;;  %v914_v18 = vmul.f32 %v3402_v61, %v3402_v61  ;;  %v915_v19 = vmul.f32 %v3403_v33, %v3402_v61  ;;  %v916_v46 = vmul.f32 %v3404_v58, %v3402_v61  ;;  %v3414_v56 = vld [vmem:[#allocation59_spill] sm:$0xff] }
  0xd2   :  { %v917_v4 = vmul.f32 %v3405_v47, %v3402_v61  ;;  %v918_v11 = vmul.f32 %v3406_v27, %v3402_v61  ;;  %v919_v20 = vmul.f32 %v3407_v59, %v3402_v61  ;;  %v920_v12 = vmul.f32 %v3408_v2, %v3402_v61 }
  0xd3   :  { %v890_v62 = vsel %vm154_vm4, %v882_v24, %v2457_v49  ;;  %v922_v37 = vrot.slane %v914_v18, 4  ;;  %v928_v31 = vrot.slane %v915_v19, 4  ;;  %v934_v14 = vrot.slane %v916_v46, 4  ;;  %v3412_v49 = vld [vmem:[#allocation24_spill] sm:$0xff] }
  0xd4   :  { %v891_v53 = vsel %vm154_vm4, %v883_v25, %v2459_v36  ;;  %v892_v8 = vsel %vm154_vm4, %v884_v28, %v2461_v51  ;;  %v893_v39 = vsel %vm154_vm4, %v885_v50, %v3409_v40  ;;  %v894_v48 = vsel %vm154_vm4, %v886_v3, %v3410_v5  ;;  %v3413_v25 = vld [vmem:[#allocation58_spill] sm:$0xff] }
  0xd5   :  { %v895_v57 = vsel %vm154_vm4, %v887_v35, %v3411_v34  ;;  %v921_v15 = vmul.f32 %v3412_v49, %v3402_v61  ;;  %v940_v63 = vrot.slane %v917_v4, 4  ;;  %v946_v23 = vrot.slane %v918_v11, 4 }
  0xd6   :  { %v923_v13 = vadd.f32 %v922_v37, %v914_v18  ;;  %v929_v24 = vadd.f32 %v928_v31, %v915_v19  ;;  %v952_v36 = vrot.slane %v919_v20, 4  ;;  %v958_v29 = vrot.slane %v920_v12, 4 }
  0xd7   :  { %v896_v51 = vsel %vm154_vm4, %v888_v16, %v3413_v25  ;;  %v897_v28 = vsel %vm154_vm4, %v889_v17, %v3414_v56  ;;  %v898_v30 = vsel %vm156_vm5, %v890_v62, %v2481_v21  ;;  %v935_v50 = vadd.f32 %v934_v14, %v916_v46 }
  0xd8   :  { %v899_v60 = vsel %vm156_vm5, %v891_v53, %v2483_v1  ;;  %v900_v3 = vsel %vm156_vm5, %v892_v8, %v2485_v22  ;;  %v901_v45 = vsel %vm156_vm5, %v893_v39, %v2487_v41  ;;  %v902_v35 = vsel %vm156_vm5, %v894_v48, %v2489_v42 }
  0xd9   :  { %v903_v38 = vsel %vm156_vm5, %v895_v57, %v2491_v43  ;;  %v941_v16 = vadd.f32 %v940_v63, %v917_v4  ;;  %v947_v6 = vadd.f32 %v946_v23, %v918_v11  ;;  %v964_v17 = vrot.slane %v921_v15, 4 }
  0xda   :  { %v924_v21 = vrot.slane %v923_v13, 2  ;;  %v930_v61 = vrot.slane %v929_v24, 2  ;;  %v953_v18 = vadd.f32 %v952_v36, %v919_v20  ;;  %v959_v19 = vadd.f32 %v958_v29, %v920_v12 }
  0xdb   :  { %v904_v1 = vsel %vm156_vm5, %v896_v51, %v2493_v54  ;;  %v2629_v22 = vsel %vm156_vm5, %v897_v28, %v2495_v55  ;;  %v2633_v41 = vsel %vm158_vm6, %v898_v30, %v2521_v10  ;;  %v936_v42 = vrot.slane %v935_v50, 2 }
  0xdc   :  { %3415 = vst [vmem:[#allocation25_spill] sm:$0xff] %v2629_v22  ;;  %v2637_v43 = vsel %vm158_vm6, %v899_v60, %v2537_v52  ;;  %v2641_v46 = vsel %vm158_vm6, %v900_v3, %v2539_v0  ;;  %v2645_v54 = vsel %vm158_vm6, %v901_v45, %v2543_v32  ;;  %v2648_v55 = vsel %vm158_vm6, %v902_v35, %v839_v7 }
  0xdd   :  { %3416 = vst [vmem:[#allocation29_spill] sm:$0xff] %v2641_v46  ;;  %v2651_v4 = vsel %vm158_vm6, %v903_v38, %v845_v26  ;;  %v942_v10 = vrot.slane %v941_v16, 2  ;;  %v948_v11 = vrot.slane %v947_v6, 2  ;;  %v965_v20 = vadd.f32 %v964_v17, %v921_v15 }
  0xde   :  { %3417 = vst [vmem:[#allocation26_spill] sm:$0xff] %v2645_v54  ;;  %v925_v12 = vadd.f32 %v924_v21, %v923_v13  ;;  %v931_v52 = vadd.f32 %v930_v61, %v929_v24  ;;  %v954_v62 = vrot.slane %v953_v18, 2  ;;  %v960_v37 = vrot.slane %v959_v19, 2 }
  0xdf   :  { %3418 = vst [vmem:[#allocation30_spill] sm:$0xff] %v2648_v55  ;;  %v937_v31 = vadd.f32 %v936_v42, %v935_v50  ;;  %v970_v0 = vmul.f32 %v3403_v33, %v3403_v33  ;;  %v971_v32 = vmul.f32 %v3404_v58, %v3403_v33  ;;  %v972_v7 = vmul.f32 %v3405_v47, %v3403_v33 }
  0xe0   :  { %3419 = vst [vmem:[#allocation27_spill] sm:$0xff] %v2651_v4  ;;  %v973_v26 = vmul.f32 %v3406_v27, %v3403_v33  ;;  %v974_v14 = vmul.f32 %v3407_v59, %v3403_v33  ;;  %v975_v53 = vmul.f32 %v3408_v2, %v3403_v33  ;;  %v976_v8 = vmul.f32 %v3412_v49, %v3403_v33 }
  0xe1   :  { %v966_v40 = vrot.slane %v965_v20, 2  ;;  %v977_v39 = vrot.slane %v970_v0, 4  ;;  %v983_v5 = vrot.slane %v971_v32, 4  ;;  %v989_v48 = vrot.slane %v972_v7, 4 }
  0xe2   :  { %v943_v34 = vadd.f32 %v942_v10, %v941_v16  ;;  %v949_v57 = vadd.f32 %v948_v11, %v947_v6  ;;  %v995_v15 = vrot.slane %v973_v26, 4  ;;  %v1001_v63 = vrot.slane %v974_v14, 4 }
  0xe3   :  { %v955_v23 = vadd.f32 %v954_v62, %v953_v18  ;;  %v961_v13 = vadd.f32 %v960_v37, %v959_v19  ;;  %v1007_v24 = vrot.slane %v975_v53, 4  ;;  %v1013_v36 = vrot.slane %v976_v8, 4 }
  0xe4   :  { %v926_v29 = vrot.slane %v925_v12, 1  ;;  %v932_v25 = vrot.slane %v931_v52, 1  ;;  %v938_v51 = vrot.slane %v937_v31, 1  ;;  %v978_v56 = vadd.f32 %v977_v39, %v970_v0 }
  0xe5   :  { %v2669_v28 = vsel %vm158_vm6, %v904_v1, %v2559_v9  ;;  %v967_v33 = vadd.f32 %v966_v40, %v965_v20  ;;  %v984_v30 = vadd.f32 %v983_v5, %v971_v32  ;;  %v990_v50 = vadd.f32 %v989_v48, %v972_v7 }
  0xe6   :  { %3420 = vst [vmem:[#allocation31_spill] sm:$0xff] %v2669_v28  ;;  %v944_v60 = vrot.slane %v943_v34, 1  ;;  %v950_v3 = vrot.slane %v949_v57, 1  ;;  %v996_v45 = vadd.f32 %v995_v15, %v973_v26  ;;  %v1002_v35 = vadd.f32 %v1001_v63, %v974_v14 }
  0xe7   :  { %v956_v38 = vrot.slane %v955_v23, 1  ;;  %v962_v16 = vrot.slane %v961_v13, 1  ;;  %v1008_v6 = vadd.f32 %v1007_v24, %v975_v53  ;;  %v1014_v17 = vadd.f32 %v1013_v36, %v976_v8 }
  0xe8   :  { %v2671_v21 = vadd.f32 %v926_v29, %v925_v12  ;;  %v2673_v61 = vadd.f32 %v932_v25, %v931_v52  ;;  %v2675_v18 = vadd.f32 %v938_v51, %v937_v31  ;;  %v979_v19 = vrot.slane %v978_v56, 2 }
  0xe9   :  { %v985_v9 = vrot.slane %v984_v30, 2  ;;  %v991_v1 = vrot.slane %v990_v50, 2  ;;  %v1019_v42 = vmul.f32 %v3404_v58, %v3404_v58  ;;  %v1020_v10 = vmul.f32 %v3405_v47, %v3404_v58 }
  0xea   :  { %v2681_v11 = vadd.f32 %v944_v60, %v943_v34  ;;  %v968_v20 = vrot.slane %v967_v33, 1  ;;  %v997_v62 = vrot.slane %v996_v45, 2  ;;  %v1003_v37 = vrot.slane %v1002_v35, 2 }
  0xeb   :  { %v1009_v12 = vrot.slane %v1008_v6, 2  ;;  %v1015_v0 = vrot.slane %v1014_v17, 2  ;;  %v1021_v52 = vmul.f32 %v3406_v27, %v3404_v58  ;;  %v1022_v31 = vmul.f32 %v3407_v59, %v3404_v58 }
  0xec   :  { %v2687_v32 = vadd.f32 %v950_v3, %v949_v57  ;;  %v980_v7 = vadd.f32 %v979_v19, %v978_v56  ;;  %v1023_v26 = vmul.f32 %v3408_v2, %v3404_v58  ;;  %v1024_v14 = vmul.f32 %v3412_v49, %v3404_v58 }
  0xed   :  { %v986_v53 = vadd.f32 %v985_v9, %v984_v30  ;;  %v992_v8 = vadd.f32 %v991_v1, %v990_v50  ;;  %v1025_v40 = vrot.slane %v1019_v42, 4  ;;  %v1031_v39 = vrot.slane %v1020_v10, 4 }
  0xee   :  { %v2693_v5 = vadd.f32 %v956_v38, %v955_v23  ;;  %v2695_v48 = vadd.f32 %v962_v16, %v961_v13  ;;  %v998_v34 = vadd.f32 %v997_v62, %v996_v45  ;;  %v1004_v15 = vadd.f32 %v1003_v37, %v1002_v35 }
  0xef   :  { %v1010_v63 = vadd.f32 %v1009_v12, %v1008_v6  ;;  %v1016_v57 = vadd.f32 %v1015_v0, %v1014_v17  ;;  %v1037_v24 = vrot.slane %v1021_v52, 4  ;;  %v1043_v36 = vrot.slane %v1022_v31, 4 }
  0xf0   :  { %v981_v29 = vrot.slane %v980_v7, 1  ;;  %v1026_v25 = vadd.f32 %v1025_v40, %v1019_v42  ;;  %v1049_v51 = vrot.slane %v1023_v26, 4  ;;  %v1055_v56 = vrot.slane %v1024_v14, 4 }
  0xf1   :  { %v2697_v60 = vadd.f32 %v968_v20, %v967_v33  ;;  %v987_v58 = vrot.slane %v986_v53, 1  ;;  %v993_v30 = vrot.slane %v992_v8, 1  ;;  %v1032_v50 = vadd.f32 %v1031_v39, %v1020_v10 }
  0xf2   :  { %v999_v3 = vrot.slane %v998_v34, 1  ;;  %v1005_v23 = vrot.slane %v1004_v15, 1  ;;  %v1061_v13 = vmul.f32 %v3405_v47, %v3405_v47  ;;  %v1062_v45 = vmul.f32 %v3406_v27, %v3405_v47 }
  0xf3   :  { %v1011_v35 = vrot.slane %v1010_v63, 1  ;;  %v1017_v38 = vrot.slane %v1016_v57, 1  ;;  %v1038_v16 = vadd.f32 %v1037_v24, %v1021_v52  ;;  %v1044_v6 = vadd.f32 %v1043_v36, %v1022_v31 }
  0xf4   :  { %v2703_v17 = vadd.f32 %v981_v29, %v980_v7  ;;  %v1027_v19 = vrot.slane %v1026_v25, 2  ;;  %v1050_v33 = vadd.f32 %v1049_v51, %v1023_v26  ;;  %v1056_v9 = vadd.f32 %v1055_v56, %v1024_v14 }
  0xf5   :  { %v2705_v1 = vadd.f32 %v987_v58, %v986_v53  ;;  %v1033_v42 = vrot.slane %v1032_v50, 2  ;;  %v1063_v10 = vmul.f32 %v3407_v59, %v3405_v47  ;;  %v1064_v20 = vmul.f32 %v3408_v2, %v3405_v47 }
  0xf6   :  { %v2711_v62 = vadd.f32 %v993_v30, %v992_v8  ;;  %v2713_v37 = vadd.f32 %v999_v3, %v998_v34  ;;  %v1066_v12 = vrot.slane %v1061_v13, 4  ;;  %v1072_v0 = vrot.slane %v1062_v45, 4 }
  0xf7   :  { %v2715_v52 = vadd.f32 %v1005_v23, %v1004_v15  ;;  %v1039_v31 = vrot.slane %v1038_v16, 2  ;;  %v1045_v7 = vrot.slane %v1044_v6, 2  ;;  %v1065_v26 = vmul.f32 %v3412_v49, %v3405_v47 }
  0xf8   :  { %v2719_v14 = vadd.f32 %v1011_v35, %v1010_v63  ;;  %v1028_v53 = vadd.f32 %v1027_v19, %v1026_v25  ;;  %v1051_v40 = vrot.slane %v1050_v33, 2  ;;  %v1057_v39 = vrot.slane %v1056_v9, 2 }
  0xf9   :  { %v1034_v24 = vadd.f32 %v1033_v42, %v1032_v50  ;;  %v1078_v36 = vrot.slane %v1063_v10, 4  ;;  %v1084_v8 = vrot.slane %v1064_v20, 4  ;;  %v1096_v34 = vmul.f32 %v3406_v27, %v3406_v27 }
  0xfa   :  { %v1067_v29 = vadd.f32 %v1066_v12, %v1061_v13  ;;  %v1073_v51 = vadd.f32 %v1072_v0, %v1062_v45  ;;  %v1097_v15 = vmul.f32 %v3407_v59, %v3406_v27  ;;  %v1098_v56 = vmul.f32 %v3408_v2, %v3406_v27 }
  0xfb   :  { %v1040_v47 = vadd.f32 %v1039_v31, %v1038_v16  ;;  %v1046_v63 = vadd.f32 %v1045_v7, %v1044_v6  ;;  %v1090_v58 = vrot.slane %v1065_v26, 4  ;;  %v1099_v25 = vmul.f32 %v3412_v49, %v3406_v27 }
  0xfc   :  { %v1052_v30 = vadd.f32 %v1051_v40, %v1050_v33  ;;  %v1079_v50 = vadd.f32 %v1078_v36, %v1063_v10  ;;  %v1100_v3 = vrot.slane %v1096_v34, 4  ;;  %v1106_v23 = vrot.slane %v1097_v15, 4 }
  0xfd   :  { %v2729_v35 = vadd.f32 %v1017_v38, %v1016_v57  ;;  %v1058_v13 = vadd.f32 %v1057_v39, %v1056_v9  ;;  %v1085_v45 = vadd.f32 %v1084_v8, %v1064_v20  ;;  %v1112_v19 = vrot.slane %v1098_v56, 4 }
  0xfe   :  { %v1029_v42 = vrot.slane %v1028_v53, 1  ;;  %v1068_v12 = vrot.slane %v1067_v29, 2  ;;  %v1074_v0 = vrot.slane %v1073_v51, 2  ;;  %v1118_v28 = vrot.slane %v1099_v25, 4 }
  0xff   :  { %v1035_v22 = vrot.slane %v1034_v24, 1  ;;  %v1041_v16 = vrot.slane %v1040_v47, 1  ;;  %v1047_v6 = vrot.slane %v1046_v63, 1  ;;  %v1091_v31 = vadd.f32 %v1090_v58, %v1065_v26 }
 0x100   :  { %v1053_v7 = vrot.slane %v1052_v30, 1  ;;  %v1080_v44 = vrot.slane %v1079_v50, 2  ;;  %v1101_v27 = vadd.f32 %v1100_v3, %v1096_v34  ;;  %v1107_v33 = vadd.f32 %v1106_v23, %v1097_v15 }
 0x101   :  { %v1086_v10 = vrot.slane %v1085_v45, 2  ;;  %v1113_v40 = vadd.f32 %v1112_v19, %v1098_v56  ;;  %v1119_v36 = vadd.f32 %v1118_v28, %v1099_v25  ;;  %v1124_v57 = vmul.f32 %v3407_v59, %v3407_v59 }
 0x102   :  { %v1059_v38 = vrot.slane %v1058_v13, 1  ;;  %v1069_v9 = vadd.f32 %v1068_v12, %v1067_v29  ;;  %v1075_v20 = vadd.f32 %v1074_v0, %v1073_v51  ;;  %v1125_v39 = vmul.f32 %v3408_v2, %v3407_v59 }
 0x103   :  { %v1030_v8 = vadd.f32 %v1029_v42, %v1028_v53  ;;  %v2735_v4 = vadd.f32 %v1035_v22, %v1034_v24  ;;  %v2737_v26 = vadd.f32 %v1041_v16, %v1040_v47  ;;  %v1092_v58 = vrot.slane %v1091_v31, 2 }
 0x104   :  { %v1081_v34 = vadd.f32 %v1080_v44, %v1079_v50  ;;  %v1102_v15 = vrot.slane %v1101_v27, 2  ;;  %v1108_v3 = vrot.slane %v1107_v33, 2  ;;  %v1126_v28 = vmul.f32 %v3412_v49, %v3407_v59 }
 0x105   :  { %v1087_v56 = vadd.f32 %v1086_v10, %v1085_v45  ;;  %v1114_v25 = vrot.slane %v1113_v40, 2  ;;  %v1120_v23 = vrot.slane %v1119_v36, 2  ;;  %v1127_v29 = vrot.slane %v1124_v57, 4 }
 0x106   :  { %v2741_v51 = vadd.f32 %v1047_v6, %v1046_v63  ;;  %v1070_v19 = vrot.slane %v1069_v9, 1  ;;  %v1076_v12 = vrot.slane %v1075_v20, 1  ;;  %v1133_v53 = vrot.slane %v1125_v39, 4 }
 0x107   :  { %v2743_v22 = vadd.f32 %v1053_v7, %v1052_v30  ;;  %v1093_v24 = vadd.f32 %v1092_v58, %v1091_v31  ;;  %v1139_v47 = vrot.slane %v1126_v28, 4  ;;  %v1145_v44 = vmul.f32 %v3408_v2, %v3408_v2 }
 0x108   :  { %v1082_v50 = vrot.slane %v1081_v34, 1  ;;  %v1103_v42 = vadd.f32 %v1102_v15, %v1101_v27  ;;  %v1109_v0 = vadd.f32 %v1108_v3, %v1107_v33  ;;  %v1128_v59 = vadd.f32 %v1127_v29, %v1124_v57 }
 0x109   :  { %v1088_v45 = vrot.slane %v1087_v56, 1  ;;  %v1115_v16 = vadd.f32 %v1114_v25, %v1113_v40  ;;  %v1121_v10 = vadd.f32 %v1120_v23, %v1119_v36  ;;  %v1146_v63 = vmul.f32 %v3412_v49, %v3408_v2 }
 0x10a   :  { %v2749_v6 = vadd.f32 %v1059_v38, %v1058_v13  ;;  %v1071_v55 = vadd.f32 %v1070_v19, %v1069_v9  ;;  %v1077_v30 = vadd.f32 %v1076_v12, %v1075_v20  ;;  %v1134_v7 = vadd.f32 %v1133_v53, %v1125_v39 }
 0x10b   :  { %v1094_v31 = vrot.slane %v1093_v24, 1  ;;  %v1140_v58 = vadd.f32 %v1139_v47, %v1126_v28  ;;  %v1147_v54 = vrot.slane %v1145_v44, 4  ;;  %v1159_v46 = vmul.f32 %v3412_v49, %v3412_v49 }
 0x10c   :  { %v2753_v27 = vadd.f32 %v1082_v50, %v1081_v34  ;;  %v1104_v33 = vrot.slane %v1103_v42, 1  ;;  %v1110_v57 = vrot.slane %v1109_v0, 1  ;;  %v1129_v40 = vrot.slane %v1128_v59, 2 }
 0x10d   :  { %v2755_v36 = vadd.f32 %v1088_v45, %v1087_v56  ;;  %v1116_v15 = vrot.slane %v1115_v16, 1  ;;  %v1122_v2 = vrot.slane %v1121_v10, 1  ;;  %v1153_v13 = vrot.slane %v1146_v63, 4 }
 0x10e   :  { %v1135_v38 = vrot.slane %v1134_v7, 2  ;;  %v1166_v9 = vsel %vm146_vm0, %v2671_v21, %v2673_v61  ;;  %v1167_v20 = vsel %vm146_vm0, %v2673_v61, %v2703_v17  ;;  %v1168_v49 = vsel %vm146_vm0, %v2675_v18, %v2705_v1 }
 0x10f   :  { %v1141_v39 = vrot.slane %v1140_v58, 2  ;;  %v1148_v34 = vadd.f32 %v1147_v54, %v1145_v44  ;;  %v1160_v3 = vrot.slane %v1159_v46, 4  ;;  %v1169_v28 = vsel %vm146_vm0, %v2681_v11, %v2711_v62 }
 0x110   :  { %v2769_v56 = vadd.f32 %v1094_v31, %v1093_v24  ;;  %v1105_v25 = vadd.f32 %v1104_v33, %v1103_v42  ;;  %v1111_v23 = vadd.f32 %v1110_v57, %v1109_v0  ;;  %v1130_v21 = vadd.f32 %v1129_v40, %v1128_v59 }
 0x111   :  { %v1154_v29 = vadd.f32 %v1153_v13, %v1146_v63  ;;  %v1174_v61 = vsel %vm148_vm1, %v1166_v9, %v2675_v18  ;;  %v1175_v17 = vsel %vm148_vm1, %v1167_v20, %v2705_v1  ;;  %v1176_v19 = vsel %vm148_vm1, %v1168_v49, %v1030_v8 }
 0x112   :  { %v2776_v54 = vadd.f32 %v1116_v15, %v1115_v16  ;;  %v1136_v12 = vadd.f32 %v1135_v38, %v1134_v7  ;;  %v1170_v53 = vsel %vm146_vm0, %v2687_v32, %v2713_v37  ;;  %v1177_v24 = vsel %vm148_vm1, %v1169_v28, %v2735_v4 }
 0x113   :  { %v2783_v47 = vadd.f32 %v1122_v2, %v1121_v10  ;;  %v1142_v44 = vadd.f32 %v1141_v39, %v1140_v58  ;;  %v1149_v50 = vrot.slane %v1148_v34, 2  ;;  %v1161_v18 = vadd.f32 %v1160_v3, %v1159_v46 }
 0x114   :  { %v1171_v1 = vsel %vm146_vm0, %v2693_v5, %v2715_v52  ;;  %v1182_v8 = vsel %vm150_vm2, %v1174_v61, %v2681_v11  ;;  %v1183_v42 = vsel %vm150_vm2, %v1175_v17, %v2711_v62  ;;  %v1184_v0 = vsel %vm150_vm2, %v1176_v19, %v2735_v4 }
 0x115   :  { %v1131_v59 = vrot.slane %v1130_v21, 1  ;;  %v1155_v45 = vrot.slane %v1154_v29, 2  ;;  %v1178_v16 = vsel %vm148_vm1, %v1170_v53, %v2737_v26  ;;  %v1185_v46 = vsel %vm150_vm2, %v1177_v24, %v1071_v55  ;;  %v3421_v24 = vld [vmem:[#allocation29_spill] sm:$0xff] }
 0x116   :  { %v1137_v10 = vrot.slane %v1136_v12, 1  ;;  %v1190_v63 = vsel %vm152_vm3, %v1182_v8, %v2687_v32  ;;  %v1191_v11 = vsel %vm152_vm3, %v1183_v42, %v2713_v37  ;;  %v1192_v62 = vsel %vm152_vm3, %v1184_v0, %v2737_v26 }
 0x117   :  { %v1150_v7 = vadd.f32 %v1149_v50, %v1148_v34  ;;  %v1162_v31 = vrot.slane %v1161_v18, 2  ;;  %v1172_v4 = vsel %vm146_vm0, %v2695_v48, %v2719_v14  ;;  %v1179_v58 = vsel %vm148_vm1, %v1171_v1, %v2741_v51  ;;  %v2874_v50 = vld [vmem:[%s3310_s4 + $0x8] sm:$0xff] }
 0x118   :  { %v1186_v55 = vsel %vm150_vm2, %v1178_v16, %v1077_v30  ;;  %v1193_v33 = vsel %vm152_vm3, %v1185_v46, %v1077_v30  ;;  %v1198_v32 = vsel %vm154_vm4, %v1190_v63, %v2693_v5  ;;  %v1199_v37 = vsel %vm154_vm4, %v1191_v11, %v2715_v52  ;;  %v2893_v11 = vld [vmem:[%s3310_s4 + $0x10] sm:$0xff] }
 0x119   :  { %v1132_v26 = vadd.f32 %v1131_v59, %v1130_v21  ;;  %v1143_v57 = vrot.slane %v1142_v44, 1  ;;  %v1156_v40 = vadd.f32 %v1155_v45, %v1154_v29  ;;  %v1200_v15 = vsel %vm154_vm4, %v1192_v62, %v2741_v51 }
 0x11a   :  { %v1173_v2 = vsel %vm146_vm0, %v2697_v60, %v2729_v35  ;;  %v1180_v13 = vsel %vm148_vm1, %v1172_v4, %v2743_v22  ;;  %v1206_v30 = vsel %vm156_vm5, %v1198_v32, %v2695_v48  ;;  %v1207_v5 = vsel %vm156_vm5, %v1199_v37, %v2719_v14 }
 0x11b   :  { %v1163_v52 = vadd.f32 %v1162_v31, %v1161_v18  ;;  %v1187_v38 = vsel %vm150_vm2, %v1179_v58, %v2753_v27  ;;  %v1194_v9 = vsel %vm152_vm3, %v1186_v55, %v1105_v25  ;;  %v1201_v51 = vsel %vm154_vm4, %v1193_v33, %v2753_v27 }
 0x11c   :  { %v1151_v20 = vrot.slane %v1150_v7, 1  ;;  %v1208_v49 = vsel %vm156_vm5, %v1200_v15, %v2743_v22  ;;  %v1214_v39 = vsel %vm158_vm6, %v1206_v30, %v2697_v60  ;;  %v1215_v48 = vsel %vm158_vm6, %v1207_v5, %v2729_v35  ;;  %v2911_v15 = vld [vmem:[%s3310_s4 + $0x18] sm:$0xff] }
 0x11d   :  { %v1138_v14 = vadd.f32 %v1137_v10, %v1136_v12  ;;  %v1144_v34 = vadd.f32 %v1143_v57, %v1142_v44  ;;  %v1181_v3 = vsel %vm148_vm1, %v1173_v2, %v2749_v6  ;;  %v1188_v28 = vsel %vm150_vm2, %v1180_v13, %v2755_v36  ;;  %v3422_v10 = vld [vmem:[#allocation26_spill] sm:$0xff] }
 0x11e   :  { %v1195_v27 = vsel %vm152_vm3, %v1187_v38, %v1111_v23  ;;  %v1202_v25 = vsel %vm154_vm4, %v1194_v9, %v1111_v23  ;;  %v1209_v22 = vsel %vm156_vm5, %v1201_v51, %v2755_v36  ;;  %v2845_v60 = vadd.f32 %v1214_v39, %v2633_v41  ;;  %v2859_v41 = vld [vmem:[%s3310_s4] sm:$0xff]  ;;  %v3423_v57 = vld [vmem:[#allocation30_spill] sm:$0xff] }
 0x11f   :  { %v1157_v21 = vrot.slane %v1156_v40, 1  ;;  %v1164_v35 = vrot.slane %v1163_v52, 1  ;;  %v1216_v29 = vsel %vm158_vm6, %v1208_v49, %v2749_v6  ;;  %v2850_v61 = vadd.f32 %v1215_v48, %v2637_v43 }
 0x120   :  { %v1152_v17 = vadd.f32 %v1151_v20, %v1150_v7  ;;  %v1189_v19 = vsel %vm150_vm2, %v1181_v3, %v2769_v56  ;;  %v1196_v23 = vsel %vm152_vm3, %v1188_v28, %v2776_v54  ;;  %v1230_v36 = vperm.slane %v2859_v41, 0 }
 0x121   :  { %v1203_v12 = vsel %vm154_vm4, %v1195_v27, %v1132_v26  ;;  %v1210_v43 = vsel %vm156_vm5, %v1202_v25, %v2776_v54  ;;  %v1217_v6 = vsel %vm158_vm6, %v1209_v22, %v2769_v56  ;;  %v1238_v53 = vperm.slane %v2859_v41, 1 }
 0x122   :  { %v2869_v44 = vadd.f32 %v1216_v29, %v3421_v24  ;;  %v1231_v18 = vperm.slane %v2874_v50, 0  ;;  %v1234_v1 = vmul.f32 %v1230_v36, %v2845_v60  ;;  %v1239_v8 = vperm.slane %v2874_v50, 1  ;;  %v3426_v36 = vld [vmem:[#allocation25_spill] sm:$0xff] }
 0x123   :  { %v1158_v54 = vadd.f32 %v1157_v21, %v1156_v40  ;;  %v1165_v42 = vadd.f32 %v1164_v35, %v1163_v52  ;;  %v1197_v56 = vsel %vm152_vm3, %v1189_v19, %v2783_v47  ;;  %v1242_v0 = vmul.f32 %v1238_v53, %v2850_v61 }
 0x124   :  { %v1204_v59 = vsel %vm154_vm4, %v1196_v23, %v1138_v14  ;;  %v1211_v45 = vsel %vm156_vm5, %v1203_v12, %v1138_v14  ;;  %v1218_v16 = vsel %vm158_vm6, %v1210_v43, %v2783_v47  ;;  %v1250_v46 = vperm.slane %v2859_v41, 2  ;;  %v3425_v23 = vld [vmem:[#allocation28_spill] sm:$0xff] }
 0x125   :  { %v2888_v63 = vadd.f32 %v1217_v6, %v3422_v10  ;;  %v1232_v62 = vperm.slane %v2893_v11, 0  ;;  %v1240_v7 = vperm.slane %v2893_v11, 1  ;;  %v1246_v31 = vadd.f32 %v1242_v0, %v1234_v1 }
 0x126   :  { %v1235_v4 = vmul.f32 %v1231_v18, %v2845_v60  ;;  %v1243_v58 = vmul.f32 %v1239_v8, %v2850_v61  ;;  %v1251_v47 = vperm.slane %v2874_v50, 2  ;;  %v1254_v55 = vmul.f32 %v1250_v46, %v2869_v44  ;;  %v3427_v18 = vld [vmem:[#allocation31_spill] sm:$0xff] }
 0x127   :  { %v1205_v33 = vsel %vm154_vm4, %v1197_v56, %v1144_v34  ;;  %v1212_v32 = vsel %vm156_vm5, %v1204_v59, %v1152_v17  ;;  %v1219_v37 = vsel %vm158_vm6, %v1211_v45, %v1144_v34  ;;  %v1262_v26 = vperm.slane %v2859_v41, 3  ;;  %v3424_v34 = vld [vmem:[#allocation27_spill] sm:$0xff] }
 0x128   :  { %v2906_v40 = vadd.f32 %v1218_v16, %v3423_v57  ;;  %v1233_v2 = vperm.slane %v2911_v15, 0  ;;  %v1241_v13 = vperm.slane %v2911_v15, 1  ;;  %v1258_v30 = vadd.f32 %v1254_v55, %v1246_v31 }
 0x129   :  { %v1236_v5 = vmul.f32 %v1232_v62, %v2845_v60  ;;  %v1244_v52 = vmul.f32 %v1240_v7, %v2850_v61  ;;  %v1252_v38 = vperm.slane %v2893_v11, 2  ;;  %v1266_v9 = vmul.f32 %v1262_v26, %v2888_v63 }
 0x12a   :  { %v1247_v51 = vadd.f32 %v1243_v58, %v1235_v4  ;;  %v1255_v20 = vmul.f32 %v1251_v47, %v2869_v44  ;;  %v1263_v49 = vperm.slane %v2874_v50, 3  ;;  %v1274_v39 = vperm.slane %v2859_v41, 4 }
 0x12b   :  { %v1213_v48 = vsel %vm156_vm5, %v1205_v33, %v1158_v54  ;;  %v1220_v14 = vsel %vm158_vm6, %v1212_v32, %v1158_v54  ;;  %v2925_v3 = vadd.f32 %v1219_v37, %v3424_v34  ;;  %v1270_v28 = vadd.f32 %v1266_v9, %v1258_v30 }
 0x12c   :  { %v1237_v27 = vmul.f32 %v1233_v2, %v2845_v60  ;;  %v1245_v25 = vmul.f32 %v1241_v13, %v2850_v61  ;;  %v1253_v22 = vperm.slane %v2911_v15, 2  ;;  %v1278_v21 = vmul.f32 %v1274_v39, %v2906_v40 }
 0x12d   :  { %v1248_v35 = vadd.f32 %v1244_v52, %v1236_v5  ;;  %v1256_v29 = vmul.f32 %v1252_v38, %v2869_v44  ;;  %v1264_v17 = vperm.slane %v2893_v11, 3  ;;  %v1286_v19 = vperm.slane %v2859_v41, 5 }
 0x12e   :  { %v913_v12 = vsel %vm158_vm6, %v3426_v36, %v3425_v23  ;;  %v1259_v43 = vadd.f32 %v1255_v20, %v1247_v51  ;;  %v1267_v6 = vmul.f32 %v1263_v49, %v2888_v63  ;;  %v1275_v53 = vperm.slane %v2874_v50, 4 }
 0x12f   :  { %v1221_v24 = vsel %vm158_vm6, %v1213_v48, %v1165_v42  ;;  %v2941_v1 = vadd.f32 %v1220_v14, %v3427_v18  ;;  %v1282_v8 = vadd.f32 %v1278_v21, %v1270_v28  ;;  %v1290_v54 = vmul.f32 %v1286_v19, %v2925_v3 }
 0x130   :  { %v1249_v56 = vadd.f32 %v1245_v25, %v1237_v27  ;;  %v1257_v0 = vmul.f32 %v1253_v22, %v2869_v44  ;;  %v1265_v59 = vperm.slane %v2911_v15, 3  ;;  %v1298_v45 = vperm.slane %v2859_v41, 6 }
 0x131   :  { %v1260_v16 = vadd.f32 %v1256_v29, %v1248_v35  ;;  %v1268_v46 = vmul.f32 %v1264_v17, %v2888_v63  ;;  %v1276_v10 = vperm.slane %v2893_v11, 4  ;;  %v1271_v62 = vadd.f32 %v1267_v6, %v1259_v43 }
 0x132   :  { %v1279_v42 = vmul.f32 %v1275_v53, %v2906_v40  ;;  %v1287_v7 = vperm.slane %v2874_v50, 5  ;;  %v2951_v31 = vadd.f32 %v1221_v24, %v913_v12  ;;  %v1294_v4 = vadd.f32 %v1290_v54, %v1282_v8 }
 0x133   :  { %v1302_v58 = vmul.f32 %v1298_v45, %v2941_v1  ;;  %v1310_v47 = vperm.slane %v2859_v41, 7  ;;  %v1261_v55 = vadd.f32 %v1257_v0, %v1249_v56  ;;  %v1269_v33 = vmul.f32 %v1265_v59, %v2888_v63 }
 0x134   :  { %v1272_v32 = vadd.f32 %v1268_v46, %v1260_v16  ;;  %v1277_v37 = vperm.slane %v2911_v15, 4  ;;  %v1280_v26 = vmul.f32 %v1276_v10, %v2906_v40  ;;  %v1288_v57 = vperm.slane %v2893_v11, 5 }
 0x135   :  { %v1283_v2 = vadd.f32 %v1279_v42, %v1271_v62  ;;  %v1291_v13 = vmul.f32 %v1287_v7, %v2925_v3  ;;  %v1299_v30 = vperm.slane %v2874_v50, 6  ;;  %v1306_v5 = vadd.f32 %v1302_v58, %v1294_v4 }
 0x136   :  { %v1314_v52 = vmul.f32 %v1310_v47, %v2951_v31  ;;  %v1273_v38 = vadd.f32 %v1269_v33, %v1261_v55  ;;  %v1281_v9 = vmul.f32 %v1277_v37, %v2906_v40  ;;  %v1284_v51 = vadd.f32 %v1280_v26, %v1272_v32  ;;  %v88_v32 = vld [vmem:[%s3312_s6] sm:$0xff] }
 0x137   :  { %v1289_v20 = vperm.slane %v2911_v15, 5  ;;  %v1292_v49 = vmul.f32 %v1288_v57, %v2925_v3  ;;  %v1295_v39 = vadd.f32 %v1291_v13, %v1283_v2  ;;  %v1300_v48 = vperm.slane %v2893_v11, 6  ;;  %v89_v2 = vld [vmem:[%s3312_s6 + $0x8] sm:$0x3]  ;;  %s2017_s6 = smov [#allocation7]  }
 0x138   :  { %v1303_v14 = vmul.f32 %v1299_v30, %v2941_v1  ;;  %v1311_v34 = vperm.slane %v2874_v50, 7  ;;  %v2968_v28 = vadd.f32 %v1314_v52, %v1306_v5  ;;  %v1285_v27 = vadd.f32 %v1281_v9, %v1273_v38  ;;  %s1816_s3 = sshll.u32 %s2017_s6, 4  ;;  %s1817_s3 = int_to_ptr.vmem [resolvable:$true] %s1816_s3 }
 0x139   :  { %v1293_v25 = vmul.f32 %v1289_v20, %v2925_v3  ;;  %v1296_v22 = vadd.f32 %v1292_v49, %v1284_v51  ;;  %v1301_v21 = vperm.slane %v2911_v15, 6  ;;  %v1304_v35 = vmul.f32 %v1300_v48, %v2941_v1  ;;  %1821 = dma.vmem_to_hbm [thread:$0]  %s1817_s3, 64, %s1819_s22, [#allocation4]  }
 0x13a   :  { %v1307_v29 = vadd.f32 %v1303_v14, %v1295_v39  ;;  %v1312_v17 = vperm.slane %v2893_v11, 7  ;;  %v1315_v19 = vmul.f32 %v1311_v34, %v2951_v31  ;;  %v1335_v23 = vmul.f32 %v2859_v41, %v2968_v28 }
 0x13b   :  { %v1363_v36 = vmul.f32 %v2874_v50, %v2968_v28  ;;  %v1297_v12 = vadd.f32 %v1293_v25, %v1285_v27  ;;  %v1305_v43 = vmul.f32 %v1301_v21, %v2941_v1  ;;  %v1313_v6 = vperm.slane %v2911_v15, 7 }
 0x13c   :  { %v1308_v53 = vadd.f32 %v1304_v35, %v1296_v22  ;;  %v1316_v24 = vmul.f32 %v1312_v17, %v2951_v31  ;;  %v2982_v18 = vadd.f32 %v1315_v19, %v1307_v29  ;;  %v1339_v8 = vrot.slane %v1335_v23, 4 }
 0x13d   :  { %v1367_v54 = vrot.slane %v1363_v36, 4  ;;  %v1309_v56 = vadd.f32 %v1305_v43, %v1297_v12  ;;  %v1317_v0 = vmul.f32 %v1313_v6, %v2951_v31  ;;  %v1391_v42 = vmul.f32 %v2893_v11, %v2968_v28 }
 0x13e   :  { %v2985_v59 = vadd.f32 %v1316_v24, %v1308_v53  ;;  %v1336_v45 = vmul.f32 %v2859_v41, %v2982_v18  ;;  %v1364_v16 = vmul.f32 %v2874_v50, %v2982_v18  ;;  %v1340_v46 = vadd.f32 %v1339_v8, %v1335_v23 }
 0x13f   :  { %v1368_v10 = vadd.f32 %v1367_v54, %v1363_v36  ;;  %v2991_v62 = vadd.f32 %v1317_v0, %v1309_v56  ;;  %v1419_v33 = vmul.f32 %v2911_v15, %v2968_v28  ;;  %v1395_v57 = vrot.slane %v1391_v42, 4 }
 0x140   :  { %v1337_v7 = vmul.f32 %v2859_v41, %v2985_v59  ;;  %v1345_v4 = vrot.slane %v1336_v45, 4  ;;  %v1373_v58 = vrot.slane %v1364_v16, 4  ;;  %v1341_v47 = vrot.slane %v1340_v46, 2 }
 0x141   :  { %v1369_v55 = vrot.slane %v1368_v10, 2  ;;  %v1338_v37 = vmul.f32 %v2859_v41, %v2991_v62  ;;  %v1365_v26 = vmul.f32 %v2874_v50, %v2985_v59  ;;  %v1366_v5 = vmul.f32 %v2874_v50, %v2991_v62 }
 0x142   :  { %v1346_v13 = vadd.f32 %v1345_v4, %v1336_v45  ;;  %v1351_v30 = vrot.slane %v1337_v7, 4  ;;  %v1374_v52 = vadd.f32 %v1373_v58, %v1364_v16  ;;  %v1342_v38 = vadd.f32 %v1341_v47, %v1340_v46 }
 0x143   :  { %v1370_v9 = vadd.f32 %v1369_v55, %v1368_v10  ;;  %v1324_v51 = vrot.slane %v88_v32, 1  ;;  %v1327_v20 = vrot.slane %v88_v32, 3  ;;  %v1331_v49 = vrot.slane %v88_v32, 6 }
 0x144   :  { %v1423_v41 = vrot.slane %v1419_v33, 4  ;;  %v1332_v39 = vrot.slane %v89_v2, 6  ;;  %v1357_v48 = vrot.slane %v1338_v37, 4  ;;  %v1379_v14 = vrot.slane %v1365_v26, 4 }
 0x145   :  { %v1396_v34 = vadd.f32 %v1395_v57, %v1391_v42  ;;  %v1347_v27 = vrot.slane %v1346_v13, 2  ;;  %v3011_v25 = vadd.f32 %v1351_v30, %v1337_v7  ;;  %v1375_v22 = vrot.slane %v1374_v52, 2 }
 0x146   :  { %v1385_v21 = vrot.slane %v1366_v5, 4  ;;  %v1343_v35 = vrot.slane %v1342_v38, 1  ;;  %v1371_v29 = vrot.slane %v1370_v9, 1  ;;  %v1392_v50 = vmul.f32 %v2893_v11, %v2982_v18 }
 0x147   :  { %v1322_v17 = vsel %vm146_vm0, %v88_v32, 0.0  ;;  %v1326_v19 = vsel %vm148_vm1, %v1324_v51, 0.0  ;;  %v3018_v23 = vsel %vm150_vm2, %v1327_v20, 0.0  ;;  %v1424_v36 = vadd.f32 %v1423_v41, %v1419_v33 }
 0x148   :  { %v3021_v12 = vsel %vm148_vm1, %v1331_v49, %v1332_v39  ;;  %v3023_v43 = vadd.f32 %v1357_v48, %v1338_v37  ;;  %v3025_v6 = vadd.f32 %v1379_v14, %v1365_v26  ;;  %v1397_v53 = vrot.slane %v1396_v34, 2 }
 0x149   :  { %v3027_v24 = vadd.f32 %v1347_v27, %v1346_v13  ;;  %v1353_v8 = vrot.slane %v3011_v25, 2  ;;  %v3030_v54 = vadd.f32 %v1375_v22, %v1374_v52  ;;  %v3032_v56 = vadd.f32 %v1385_v21, %v1366_v5 }
 0x14a   :  { %v1344_v0 = vadd.f32 %v1343_v35, %v1342_v38  ;;  %v1372_v45 = vadd.f32 %v1371_v29, %v1370_v9  ;;  %v1401_v16 = vrot.slane %v1392_v50, 4  ;;  %v1420_v46 = vmul.f32 %v2911_v15, %v2982_v18 }
 0x14b   :  { %v1425_v10 = vrot.slane %v1424_v36, 2  ;;  %v1459_v42 = vmul.f32 %v1322_v17, %v1322_v17  ;;  %v1460_v7 = vmul.f32 %v1326_v19, %v1322_v17  ;;  %v1461_v4 = vmul.f32 %v3018_v23, %v1322_v17 }
 0x14c   :  { %v1398_v58 = vadd.f32 %v1397_v53, %v1396_v34  ;;  %v1462_v47 = vmul.f32 %v3021_v12, %v1322_v17  ;;  %v1491_v55 = vmul.f32 %v1326_v19, %v1326_v19  ;;  %v1492_v33 = vmul.f32 %v3018_v23, %v1326_v19 }
 0x14d   :  { %v1463_v32 = vsel %vm152_vm3, %v1459_v42, 0.0  ;;  %v1470_v37 = vsel %vm152_vm3, %v1460_v7, 0.0  ;;  %v1477_v26 = vsel %vm152_vm3, %v1461_v4, 0.0  ;;  %v1493_v57 = vmul.f32 %v3021_v12, %v1326_v19 }
 0x14e   :  { %v1464_v2 = vrot.slane %v1463_v32, 4  ;;  %v1471_v13 = vrot.slane %v1470_v37, 4  ;;  %v1478_v30 = vrot.slane %v1477_v26, 4  ;;  %v1484_v5 = vsel %vm152_vm3, %v1462_v47, 0.0 }
 0x14f   :  { %v1426_v52 = vadd.f32 %v1425_v10, %v1424_v36  ;;  %v1485_v38 = vrot.slane %v1484_v5, 4  ;;  %v1494_v9 = vsel %vm152_vm3, %v1491_v55, 0.0  ;;  %v1501_v51 = vsel %vm152_vm3, %v1492_v33, 0.0 }
 0x150   :  { %v1465_v20 = vadd.f32 %v1464_v2, %v1463_v32  ;;  %v1472_v49 = vadd.f32 %v1471_v13, %v1470_v37  ;;  %v1479_v41 = vadd.f32 %v1478_v30, %v1477_v26  ;;  %v1495_v39 = vrot.slane %v1494_v9, 4 }
 0x151   :  { %v1393_v48 = vmul.f32 %v2893_v11, %v2985_v59  ;;  %v1399_v14 = vrot.slane %v1398_v58, 1  ;;  %v1486_v34 = vadd.f32 %v1485_v38, %v1484_v5  ;;  %v1508_v27 = vsel %vm152_vm3, %v1493_v57, 0.0 }
 0x152   :  { %v1466_v22 = vrot.slane %v1465_v20, 2  ;;  %v1473_v21 = vrot.slane %v1472_v49, 2  ;;  %v1480_v35 = vrot.slane %v1479_v41, 2  ;;  %v1502_v29 = vrot.slane %v1501_v51, 4 }
 0x153   :  { %v1402_v17 = vadd.f32 %v1401_v16, %v1392_v50  ;;  %v1429_v19 = vrot.slane %v1420_v46, 4  ;;  %v1487_v36 = vrot.slane %v1486_v34, 2  ;;  %v1496_v53 = vadd.f32 %v1495_v39, %v1494_v9 }
 0x154   :  { %v1427_v10 = vrot.slane %v1426_v52, 1  ;;  %v1467_v42 = vadd.f32 %v1466_v22, %v1465_v20  ;;  %v1474_v7 = vadd.f32 %v1473_v21, %v1472_v49  ;;  %v1481_v4 = vadd.f32 %v1480_v35, %v1479_v41 }
 0x155   :  { %v1400_v47 = vadd.f32 %v1399_v14, %v1398_v58  ;;  %v1488_v55 = vadd.f32 %v1487_v36, %v1486_v34  ;;  %v1509_v33 = vrot.slane %v1508_v27, 4  ;;  %v1515_v32 = vmul.f32 %v3018_v23, %v3018_v23 }
 0x156   :  { %v1468_v37 = vrot.slane %v1467_v42, 1  ;;  %v1475_v26 = vrot.slane %v1474_v7, 1  ;;  %v1482_v57 = vrot.slane %v1481_v4, 1  ;;  %v1503_v2 = vadd.f32 %v1502_v29, %v1501_v51 }
 0x157   :  { %v1430_v13 = vadd.f32 %v1429_v19, %v1420_v46  ;;  %v1447_v50 = vsel %vm146_vm0, %v1344_v0, %v1372_v45  ;;  %v1489_v16 = vrot.slane %v1488_v55, 1  ;;  %v1497_v30 = vrot.slane %v1496_v53, 2 }
 0x158   :  { %v1469_v5 = vadd.f32 %v1468_v37, %v1467_v42  ;;  %v3052_v38 = vadd.f32 %v1475_v26, %v1474_v7  ;;  %v3054_v9 = vadd.f32 %v1482_v57, %v1481_v4  ;;  %v1516_v58 = vmul.f32 %v3021_v12, %v3018_v23 }
 0x159   :  { %v1403_v20 = vrot.slane %v1402_v17, 2  ;;  %v1428_v49 = vadd.f32 %v1427_v10, %v1426_v52  ;;  %v1510_v41 = vadd.f32 %v1509_v33, %v1508_v27  ;;  %v1517_v39 = vsel %vm152_vm3, %v1515_v32, 0.0 }
 0x15a   :  { %v1451_v51 = vsel %vm148_vm1, %v1447_v50, %v1400_v47  ;;  %v3060_v46 = vadd.f32 %v1489_v16, %v1488_v55  ;;  %v1504_v0 = vrot.slane %v1503_v2, 2  ;;  %v1539_v45 = vsel %vm146_vm0, %v1469_v5, %v3052_v38 }
 0x15b   :  { %v1381_v14 = vrot.slane %v3025_v6, 2  ;;  %v1407_v34 = vrot.slane %v1393_v48, 4  ;;  %v1421_v22 = vmul.f32 %v2911_v15, %v2985_v59  ;;  %v1498_v23 = vadd.f32 %v1497_v30, %v1496_v53 }
 0x15c   :  { %v1431_v21 = vrot.slane %v1430_v13, 2  ;;  %v1518_v52 = vrot.slane %v1517_v39, 4  ;;  %v1524_v27 = vsel %vm152_vm3, %v1516_v58, 0.0  ;;  %v1543_v35 = vsel %vm148_vm1, %v1539_v45, %v3054_v9 }
 0x15d   :  { %v1349_v29 = vrot.slane %v3027_v24, 1  ;;  %v1404_v19 = vadd.f32 %v1403_v20, %v1402_v17  ;;  %v1455_v36 = vsel %vm150_vm2, %v1451_v51, %v1428_v49  ;;  %v1511_v10 = vrot.slane %v1510_v41, 2 }
 0x15e   :  { %v1354_v42 = vadd.f32 %v1353_v8, %v3011_v25  ;;  %v1377_v7 = vrot.slane %v3030_v54, 1  ;;  %v1505_v53 = vadd.f32 %v1504_v0, %v1503_v2  ;;  %v1547_v4 = vsel %vm150_vm2, %v1543_v35, %v3060_v46 }
 0x15f   :  { %v1382_v47 = vadd.f32 %v1381_v14, %v3025_v6  ;;  %v1435_v55 = vrot.slane %v1421_v22, 4  ;;  %v1499_v33 = vrot.slane %v1498_v23, 1  ;;  %v1525_v32 = vrot.slane %v1524_v27, 4 }
 0x160   :  { %v1408_v37 = vadd.f32 %v1407_v34, %v1393_v48  ;;  %v1432_v17 = vadd.f32 %v1431_v21, %v1430_v13  ;;  %v1519_v26 = vadd.f32 %v1518_v52, %v1517_v39  ;;  %v3079_v57 = vadd.f32 %v1547_v4, %v1455_v36 }
 0x161   :  { %v1350_v50 = vadd.f32 %v1349_v29, %v3027_v24  ;;  %v1405_v16 = vrot.slane %v1404_v19, 1  ;;  %v1512_v25 = vadd.f32 %v1511_v10, %v1510_v41  ;;  %v1531_v8 = vmul.f32 %v3021_v12, %v3021_v12 }
 0x162   :  { %v1378_v2 = vadd.f32 %v1377_v7, %v3030_v54  ;;  %v1394_v6 = vmul.f32 %v2893_v11, %v2991_v62  ;;  %v1506_v30 = vrot.slane %v1505_v53, 1  ;;  %1869 = vrsqrt.f32 %v3079_v57 }
 0x163   :  { %v1422_v48 = vmul.f32 %v2911_v15, %v2991_v62  ;;  %v1436_v13 = vadd.f32 %v1435_v55, %v1421_v22  ;;  %v1500_v5 = vadd.f32 %v1499_v33, %v1498_v23  ;;  %v1526_v58 = vadd.f32 %v1525_v32, %v1524_v27 }
 0x164   :  { %v1359_v24 = vrot.slane %v3023_v43, 2  ;;  %v1409_v20 = vrot.slane %v1408_v37, 2  ;;  %v1433_v49 = vrot.slane %v1432_v17, 1  ;;  %v1520_v41 = vrot.slane %v1519_v26, 2 }
 0x165   :  { %v1355_v12 = vrot.slane %v1354_v42, 1  ;;  %v1406_v39 = vadd.f32 %v1405_v16, %v1404_v19  ;;  %v1513_v54 = vrot.slane %v1512_v25, 1  ;;  %v1532_v51 = vsel %vm152_vm3, %v1531_v8, 0.0 }
 0x166   :  { %v1383_v11 = vrot.slane %v1382_v47, 1  ;;  %v1413_v0 = vrot.slane %v1394_v6, 4  ;;  %v1448_v45 = vsel %vm146_vm0, %v1350_v50, %v1378_v2  ;;  %v1507_v14 = vadd.f32 %v1506_v30, %v1505_v53 }
 0x167   :  { %v1437_v34 = vrot.slane %v1436_v13, 2  ;;  %v1441_v15 = vrot.slane %v1422_v48, 4  ;;  %v1527_v22 = vrot.slane %v1526_v58, 2  ;;  %v1540_v23 = vsel %vm146_vm0, %v3052_v38, %v1500_v5 }
 0x168   :  { %v1870_v21 = vpop.eup %1869  ;;  %v1410_v52 = vadd.f32 %v1409_v20, %v1408_v37  ;;  %v1434_v27 = vadd.f32 %v1433_v49, %v1432_v17  ;;  %v1521_v35 = vadd.f32 %v1520_v41, %v1519_v26  ;;  %v1533_v29 = vrot.slane %v1532_v51, 4 }
 0x169   :  { %v1387_v19 = vrot.slane %v3032_v56, 2  ;;  %v1452_v36 = vsel %vm148_vm1, %v1448_v45, %v1406_v39  ;;  %v3097_v10 = vadd.f32 %v1513_v54, %v1512_v25  ;;  %v1556_v7 = vmul.f32 %v1870_v21, %v3079_v57 }
 0x16a   :  { %v1356_v53 = vadd.f32 %v1355_v12, %v1354_v42  ;;  %v1384_v4 = vadd.f32 %v1383_v11, %v1382_v47  ;;  %v1414_v55 = vadd.f32 %v1413_v0, %v1394_v6  ;;  %v1544_v33 = vsel %vm148_vm1, %v1540_v23, %v1507_v14 }
 0x16b   :  { %v1438_v32 = vadd.f32 %v1437_v34, %v1436_v13  ;;  %v1442_v38 = vadd.f32 %v1441_v15, %v1422_v48  ;;  %v1528_v50 = vadd.f32 %v1527_v22, %v1526_v58  ;;  %v1557_v37 = vmul.f32 %v1870_v21, %v1556_v7 }
 0x16c   :  { %v1411_v17 = vrot.slane %v1410_v52, 1  ;;  %v1456_v26 = vsel %vm150_vm2, %v1452_v36, %v1434_v27  ;;  %v1522_v16 = vrot.slane %v1521_v35, 1  ;;  %v1534_v8 = vadd.f32 %v1533_v29, %v1532_v51 }
 0x16d   :  { %v1548_v25 = vsel %vm150_vm2, %v1544_v33, %v3097_v10  ;;  %v1558_v2 = vmul.f32 0.5, %v1557_v37  ;;  %vm1561_vm7 = vweird.f32 %v3079_v57  ;;  %vm1562_vm8 = vweird.f32 %v1870_v21 }
 0x16e   :  { %v1360_v42 = vadd.f32 %v1359_v24, %v3023_v43  ;;  %v1415_v47 = vrot.slane %v1414_v55, 2  ;;  %v1388_v6 = vadd.f32 %v1387_v19, %v3032_v56  ;;  %v1439_v30 = vrot.slane %v1438_v32, 1  ;;  %vm1563_vm9 = vmor %vm1561_vm7, %vm1562_vm8 }
 0x16f   :  { %v1529_v48 = vrot.slane %v1528_v50, 1  ;;  %v1559_v13 = vsub.f32 1.5, %v1558_v2  ;;  %v1412_v5 = vadd.f32 %v1411_v17, %v1410_v52  ;;  %v1443_v58 = vrot.slane %v1442_v38, 2 }
 0x170   :  { %v1523_v20 = vadd.f32 %v1522_v16, %v1521_v35  ;;  %v1552_v49 = vadd.f32 %v1548_v25, %v1456_v26  ;;  %v1449_v41 = vsel %vm146_vm0, %v1356_v53, %v1384_v4  ;;  %v1535_v12 = vrot.slane %v1534_v8, 2 }
 0x171   :  { %v1541_v57 = vsel %vm146_vm0, %v3054_v9, %v1507_v14  ;;  %v1560_v39 = vmul.f32 %v1870_v21, %v1559_v13  ;;  %v1361_v54 = vrot.slane %v1360_v42, 1  ;;  %v1416_v43 = vadd.f32 %v1415_v47, %v1414_v55 }
 0x172   :  { %v1389_v24 = vrot.slane %v1388_v6, 1  ;;  %v1440_v51 = vadd.f32 %v1439_v30, %v1438_v32  ;;  %v1530_v56 = vadd.f32 %v1529_v48, %v1528_v50  ;;  %v1453_v0 = vsel %vm148_vm1, %v1449_v41, %v1412_v5 }
 0x173   :  { %v3110_v11 = vsel %vm1563_vm9, %v1870_v21, %v1560_v39  ;;  %v1545_v45 = vsel %vm148_vm1, %v1541_v57, %v1523_v20  ;;  %v1444_v15 = vadd.f32 %v1443_v58, %v1442_v38  ;;  %v1536_v22 = vadd.f32 %v1535_v12, %v1534_v8 }
 0x174   :  { %v3115_v34 = vmul.f32 %v3110_v11, %v1552_v49  ;;  %v1417_v9 = vrot.slane %v1416_v43, 1  ;;  %v1362_v23 = vadd.f32 %v1361_v54, %v1360_v42  ;;  %v1390_v21 = vadd.f32 %v1389_v24, %v1388_v6 }
 0x175   :  { %v1457_v52 = vsel %vm150_vm2, %v1453_v0, %v1440_v51  ;;  %v1549_v27 = vsel %vm150_vm2, %v1545_v45, %v1530_v56  ;;  %v1445_v29 = vrot.slane %v1444_v15, 1  ;;  %v1537_v19 = vrot.slane %v1536_v22, 1 }
 0x176   :  { %v1568_v14 = vmul.f32 %v3115_v34, %v3115_v34  ;;  %v1418_v36 = vadd.f32 %v1417_v9, %v1416_v43  ;;  %v1553_v7 = vadd.f32 %v1549_v27, %v1457_v52  ;;  %v1450_v4 = vsel %vm146_vm0, %v1362_v23, %v1390_v21 }
 0x177   :  { %v1542_v55 = vsel %vm146_vm0, %v3060_v46, %v3097_v10  ;;  %v1446_v33 = vadd.f32 %v1445_v29, %v1444_v15  ;;  %v1538_v32 = vadd.f32 %v1537_v19, %v1536_v22  ;;  %v1651_v15 = vperm.slane %v3110_v11, 0 }
 0x178   :  { %v1570_v35 = vrot.slane %v1568_v14, 7  ;;  %v1454_v38 = vsel %vm148_vm1, %v1450_v4, %v1418_v36  ;;  %v1546_v50 = vsel %vm148_vm1, %v1542_v55, %v1530_v56  ;;  %v3131_v37 = vmul.f32 %v3110_v11, %v1553_v7 }
 0x179   :  { %v1458_v17 = vsel %vm150_vm2, %v1454_v38, %v1446_v33  ;;  %v1550_v26 = vsel %vm150_vm2, %v1546_v50, %v1538_v32  ;;  %v3164_v52 = vmul.f32 %v1651_v15, %v2968_v28  ;;  %v1653_v27 = vperm.slane %v3115_v34, 0 }
 0x17a   :  { %v1572_v53 = vsub.f32 %v1552_v49, %v1570_v35  ;;  %v1583_v8 = vmul.f32 %v3131_v37, %v3115_v34  ;;  %v1554_v46 = vadd.f32 %v1550_v26, %v1458_v17  ;;  %v1595_v6 = vmul.f32 %v3131_v37, %v3131_v37 }
 0x17b   :  { %v1658_v26 = vperm.slane %v3131_v37, 0 }
 0x17c   :  { %1871 = vrsqrt.f32 %v1572_v53  ;;  %v1585_v2 = vrot.slane %v1583_v8, 7  ;;  %vm1579_vm10 = vweird.f32 %v1572_v53  ;;  %v3138_v47 = vmul.f32 %v3110_v11, %v1554_v46 }
 0x17d   :  { %v1597_v58 = vrot.slane %v1595_v6, 6 }
 0x17e   :  { %v1587_v48 = vsub.f32 %v1553_v7, %v1585_v2  ;;  %v1589_v5 = vmul.f32 %v3138_v47, %v3115_v34  ;;  %v1615_v51 = vmul.f32 %v3138_v47, %v3131_v37  ;;  %v1626_v9 = vmul.f32 %v3138_v47, %v3138_v47 }
 0x17f   :  { %v1599_v12 = vsub.f32 %v1553_v7, %v1597_v58  ;;  %v1659_v2 = vmul.f32 %v1658_v26, %v3164_v52 }
 0x180   :  { %v1591_v41 = vrot.slane %v1589_v5, 7  ;;  %v1617_v0 = vrot.slane %v1615_v51, 6  ;;  %v1628_v29 = vrot.slane %v1626_v9, 5 }
 0x181   :  { %v1660_v6 = vsub.f32 %v2985_v59, %v1659_v2 }
 0x182   :  { %v1872_v16 = vpop.eup %1871  ;;  %v1593_v54 = vsub.f32 %v1554_v46, %v1591_v41  ;;  %v1619_v23 = vsub.f32 %v1554_v46, %v1617_v0  ;;  %v1630_v55 = vsub.f32 %v1554_v46, %v1628_v29 }
 0x183   :  { %v1574_v25 = vmul.f32 %v1872_v16, %v1572_v53  ;;  %vm1580_vm11 = vweird.f32 %v1872_v16  ;;  %v1654_v53 = vmul.f32 %v1653_v27, %v3164_v52 }
 0x184   :  { %vm1581_vm12 = vmor %vm1579_vm10, %vm1580_vm11 }
 0x185   :  { %v1575_v10 = vmul.f32 %v1872_v16, %v1574_v25  ;;  %v1655_v50 = vsub.f32 %v2982_v18, %v1654_v53 }
 0x187   :  { %v1576_v42 = vmul.f32 0.5, %v1575_v10 }
 0x189   :  { %v1577_v30 = vsub.f32 1.5, %v1576_v42 }
 0x18b   :  { %v1578_v13 = vmul.f32 %v1872_v16, %v1577_v30 }
 0x18d   :  { %v3144_v20 = vsel %vm1581_vm12, %v1872_v16, %v1578_v13 }
 0x18e   :  { %v3147_v49 = vmul.f32 %v1587_v48, %v3144_v20  ;;  %v3152_v24 = vmul.f32 %v1593_v54, %v3144_v20  ;;  %v1656_v17 = vperm.slane %v3144_v20, 1  ;;  %v1666_v48 = vperm.slane %v3138_v47, 0 }
 0x190   :  { %v1600_v57 = vmul.f32 %v3147_v49, %v3147_v49  ;;  %v1620_v45 = vmul.f32 %v3152_v24, %v3147_v49  ;;  %v1631_v19 = vmul.f32 %v3152_v24, %v3152_v24  ;;  %v1657_v10 = vmul.f32 %v1656_v17, %v1655_v50 }
 0x191   :  { %v1661_v42 = vperm.slane %v3147_v49, 1  ;;  %v1667_v58 = vmul.f32 %v1666_v48, %v3164_v52  ;;  %v1669_v20 = vperm.slane %v3152_v24, 1 }
 0x192   :  { %v1602_v39 = vrot.slane %v1600_v57, 7  ;;  %v1622_v21 = vrot.slane %v1620_v45, 7  ;;  %v1633_v33 = vrot.slane %v1631_v19, 6 }
 0x193   :  { %v1662_v30 = vmul.f32 %v1661_v42, %v1657_v10  ;;  %v1670_v54 = vmul.f32 %v1669_v20, %v1657_v10 }
 0x194   :  { %v1604_v43 = vsub.f32 %v1599_v12, %v1602_v39  ;;  %v1624_v7 = vsub.f32 %v1619_v23, %v1622_v21  ;;  %v1635_v16 = vsub.f32 %v1630_v55, %v1633_v33  ;;  %v1668_v39 = vsub.f32 %v2991_v62, %v1667_v58 }
 0x195   :  { %v1663_v13 = vsub.f32 %v1660_v6, %v1662_v30 }
 0x196   :  { %1873 = vrsqrt.f32 %v1604_v43  ;;  %vm1611_vm13 = vweird.f32 %v1604_v43 }
 0x19c   :  { %v1874_v56 = vpop.eup %1873 }
 0x19d   :  { %v1606_v22 = vmul.f32 %v1874_v56, %v1604_v43  ;;  %vm1612_vm14 = vweird.f32 %v1874_v56 }
 0x19e   :  { %vm1613_vm15 = vmor %vm1611_vm13, %vm1612_vm14 }
 0x19f   :  { %v1607_v14 = vmul.f32 %v1874_v56, %v1606_v22 }
 0x1a1   :  { %v1608_v35 = vmul.f32 0.5, %v1607_v14 }
 0x1a3   :  { %v1609_v36 = vsub.f32 1.5, %v1608_v35  ;;  %v61_v35 = vld [vmem:[%s3306_s0] sm:$0xf]  ;;  %s2018_s0 = smov [#allocation8]  }
 0x1a4   :  { %s1827_s24 = sshll.u32 %s2018_s0, 4  ;;  %s1828_s24 = int_to_ptr.vmem [resolvable:$true] %s1827_s24 }
 0x1a5   :  { %v1610_v4 = vmul.f32 %v1874_v56, %v1609_v36  ;;  %v3428_v36 = vld [vmem:[#allocation16_spill] sm:$0xff] }
 0x1a7   :  { %v1614_v32 = vsel %vm1613_vm15, %v1874_v56, %v1610_v4  ;;  %v1671_v56 = vsub.f32 %v1668_v39, %v1670_v54 }
 0x1a8   :  { %v1625_v38 = vmul.f32 %v1624_v7, %v1614_v32  ;;  %v1664_v5 = vperm.slane %v1614_v32, 2  ;;  %v3193_v7 = vsub.f32 %v61_v35, %v3428_v36 }
 0x1aa   :  { %v1636_v8 = vmul.f32 %v1625_v38, %v1625_v38  ;;  %v1665_v57 = vmul.f32 %v1664_v5, %v1663_v13  ;;  %v1672_v49 = vperm.slane %v1625_v38, 2  ;;  %v1701_v55 = vperm.slane %v3193_v7, 3 }
 0x1ab   :  { %v1693_v50 = vperm.slane %v3193_v7, 0  ;;  %v1698_v2 = vperm.slane %v3193_v7, 2 }
 0x1ac   :  { %v1638_v25 = vrot.slane %v1636_v8, 7  ;;  %v1673_v0 = vmul.f32 %v1672_v49, %v1665_v57 }
 0x1ae   :  { %v1640_v46 = vsub.f32 %v1635_v16, %v1638_v25  ;;  %v1674_v22 = vsub.f32 %v1671_v56, %v1673_v0  ;;  %v1695_v16 = vperm.slane %v3193_v7, 1 }
 0x1b0   :  { %1875 = vrsqrt.f32 %v1640_v46  ;;  %vm1647_vm0 = vweird.f32 %v1640_v46 }
 0x1b6   :  { %v1876_v41 = vpop.eup %1875 }
 0x1b7   :  { %v1642_v12 = vmul.f32 %v1876_v41, %v1640_v46  ;;  %vm1648_vm1 = vweird.f32 %v1876_v41 }
 0x1b8   :  { %vm1649_vm2 = vmor %vm1647_vm0, %vm1648_vm1 }
 0x1b9   :  { %v1643_v43 = vmul.f32 %v1876_v41, %v1642_v12 }
 0x1bb   :  { %v1644_v51 = vmul.f32 0.5, %v1643_v43 }
 0x1bd   :  { %v1645_v47 = vsub.f32 1.5, %v1644_v51 }
 0x1bf   :  { %v1646_v45 = vmul.f32 %v1876_v41, %v1645_v47 }
 0x1c1   :  { %v1650_v9 = vsel %vm1649_vm2, %v1876_v41, %v1646_v45 }
 0x1c2   :  { %v1675_v14 = vperm.slane %v1650_v9, 3 }
 0x1c4   :  { %v1676_v24 = vmul.f32 %v1675_v14, %v1674_v22 }
 0x1c6   :  { %v3184_v23 = vmul.f32 %v1676_v24, %v1675_v14 }
 0x1c8   :  { %v1678_v21 = vmul.f32 %v3184_v23, %v1672_v49  ;;  %v1683_v4 = vmul.f32 %v3184_v23, %v1669_v20  ;;  %v1713_v32 = vperm.slane %v3184_v23, 0  ;;  %v1724_v38 = vperm.slane %v3184_v23, 1 }
 0x1c9   :  { %v1735_v8 = vperm.slane %v3184_v23, 2  ;;  %v1757_v46 = vperm.slane %v3184_v23, 4  ;;  %v1690_v6 = vmul.f32 %v3184_v23, %v1666_v48  ;;  %v1768_v30 = vperm.slane %v3184_v23, 5 }
 0x1ca   :  { %v1679_v29 = vsub.f32 %v1665_v57, %v1678_v21  ;;  %v1779_v13 = vperm.slane %v3184_v23, 6  ;;  %v3214_v20 = vmul.f32 %v1713_v32, %v2991_v62  ;;  %v3217_v41 = vmul.f32 %v1724_v38, %v2991_v62 }
 0x1cb   :  { %v3222_v57 = vmul.f32 %v1735_v8, %v2991_v62  ;;  %v3234_v43 = vmul.f32 %v1757_v46, %v2991_v62  ;;  %v3239_v0 = vmul.f32 %v1768_v30, %v2991_v62 }
 0x1cc   :  { %v3190_v19 = vmul.f32 %v1679_v29, %v1664_v5  ;;  %v3242_v34 = vmul.f32 %v1779_v13, %v2991_v62 }
 0x1ce   :  { %v1681_v53 = vmul.f32 %v3190_v19, %v1661_v42  ;;  %v1746_v42 = vperm.slane %v3184_v23, 3  ;;  %v1710_v58 = vperm.slane %v3190_v19, 0  ;;  %v1721_v12 = vperm.slane %v3190_v19, 1 }
 0x1cf   :  { %v1732_v48 = vperm.slane %v3190_v19, 2  ;;  %v1743_v39 = vperm.slane %v3190_v19, 3  ;;  %v1688_v54 = vmul.f32 %v3190_v19, %v1658_v26  ;;  %v1699_v51 = vmul.f32 %v1698_v2, %v3190_v19 }
 0x1d0   :  { %v1682_v33 = vsub.f32 %v1657_v10, %v1681_v53  ;;  %v3208_v10 = vmul.f32 %v1701_v55, %v3184_v23  ;;  %v3231_v49 = vmul.f32 %v1746_v42, %v2991_v62  ;;  %v1754_v56 = vperm.slane %v3190_v19, 4 }
 0x1d1   :  { %v1765_v26 = vperm.slane %v3190_v19, 5  ;;  %v1776_v47 = vperm.slane %v3190_v19, 6  ;;  %v1722_v22 = vmul.f32 %v1721_v12, %v2985_v59  ;;  %v1733_v9 = vmul.f32 %v1732_v48, %v2985_v59 }
 0x1d2   :  { %v1684_v25 = vsub.f32 %v1682_v33, %v1683_v4  ;;  %v1744_v14 = vmul.f32 %v1743_v39, %v2985_v59  ;;  %v1755_v55 = vmul.f32 %v1754_v56, %v2985_v59  ;;  %v1790_v2 = vperm.slane %v3184_v23, 7 }
 0x1d3   :  { %v1766_v33 = vmul.f32 %v1765_v26, %v2985_v59  ;;  %v1777_v32 = vmul.f32 %v1776_v47, %v2985_v59 }
 0x1d4   :  { %v1685_v5 = vmul.f32 %v1684_v25, %v1656_v17  ;;  %v1787_v25 = vperm.slane %v3190_v19, 7 }
 0x1d6   :  { %v1686_v17 = vmul.f32 %v1685_v5, %v1653_v27  ;;  %v1711_v27 = vmul.f32 %v1710_v58, %v2985_v59  ;;  %v1707_v45 = vperm.slane %v1685_v5, 0  ;;  %v1718_v21 = vperm.slane %v1685_v5, 1 }
 0x1d7   :  { %v1729_v35 = vperm.slane %v1685_v5, 2  ;;  %v1740_v29 = vperm.slane %v1685_v5, 3  ;;  %v1751_v36 = vperm.slane %v1685_v5, 4  ;;  %v1762_v7 = vperm.slane %v1685_v5, 5 }
 0x1d8   :  { %v1687_v37 = vsub.f32 %v3164_v52, %v1686_v17  ;;  %v1773_v52 = vperm.slane %v1685_v5, 6  ;;  %v1784_v53 = vperm.slane %v1685_v5, 7  ;;  %v1696_v38 = vmul.f32 %v1695_v16, %v1685_v5 }
 0x1d9   :  { %v1708_v8 = vmul.f32 %v1707_v45, %v2982_v18  ;;  %v1719_v46 = vmul.f32 %v1718_v21, %v2982_v18  ;;  %v1741_v30 = vmul.f32 %v1740_v29, %v2982_v18  ;;  %v1752_v13 = vmul.f32 %v1751_v36, %v2982_v18 }
 0x1da   :  { %v1689_v24 = vsub.f32 %v1687_v37, %v1688_v54  ;;  %v1763_v58 = vmul.f32 %v1762_v7, %v2982_v18  ;;  %v1774_v16 = vmul.f32 %v1773_v52, %v2982_v18  ;;  %v1785_v5 = vmul.f32 %v1784_v53, %v2982_v18 }
 0x1dc   :  { %v1691_v4 = vsub.f32 %v1689_v24, %v1690_v6  ;;  %v1730_v6 = vmul.f32 %v1729_v35, %v2982_v18 }
 0x1de   :  { %v1692_v42 = vmul.f32 %v1691_v4, %v1651_v15 }
 0x1e0   :  { %v1694_v12 = vmul.f32 %v1693_v50, %v1692_v42  ;;  %v1705_v48 = vperm.slane %v1692_v42, 0  ;;  %v1716_v39 = vperm.slane %v1692_v42, 1  ;;  %v1727_v17 = vperm.slane %v1692_v42, 2 }
 0x1e1   :  { %v1738_v11 = vperm.slane %v1692_v42, 3  ;;  %v1749_v15 = vperm.slane %v1692_v42, 4  ;;  %v1760_v54 = vperm.slane %v1692_v42, 5  ;;  %v1771_v56 = vperm.slane %v1692_v42, 6 }
 0x1e2   :  { %v1697_v37 = vadd.f32 %v1696_v38, %v1694_v12  ;;  %v1706_v26 = vmul.f32 %v1705_v48, %v2968_v28  ;;  %v1717_v47 = vmul.f32 %v1716_v39, %v2968_v28  ;;  %v1728_v45 = vmul.f32 %v1727_v17, %v2968_v28 }
 0x1e3   :  { %v1739_v24 = vmul.f32 %v1738_v11, %v2968_v28  ;;  %v1750_v21 = vmul.f32 %v1749_v15, %v2968_v28  ;;  %v1761_v18 = vmul.f32 %v1760_v54, %v2968_v28  ;;  %v1772_v50 = vmul.f32 %v1771_v56, %v2968_v28 }
 0x1e4   :  { %v1700_v35 = vadd.f32 %v1699_v51, %v1697_v37  ;;  %v1709_v29 = vadd.f32 %v1708_v8, %v1706_v26  ;;  %v1720_v36 = vadd.f32 %v1719_v46, %v1717_v47  ;;  %v1731_v7 = vadd.f32 %v1730_v6, %v1728_v45  ;;  %v3429_v6 = vld [vmem:[#allocation15_spill] sm:$0xff] }
 0x1e5   :  { %v1742_v52 = vadd.f32 %v1741_v30, %v1739_v24  ;;  %v1753_v53 = vadd.f32 %v1752_v13, %v1750_v21  ;;  %v1764_v4 = vadd.f32 %v1763_v58, %v1761_v18  ;;  %v1775_v38 = vadd.f32 %v1774_v16, %v1772_v50 }
 0x1e6   :  { %v1703_v12 = vadd.f32 %v3208_v10, %v1700_v35  ;;  %v1712_v48 = vadd.f32 %v1711_v27, %v1709_v29  ;;  %v1723_v39 = vadd.f32 %v1722_v22, %v1720_v36  ;;  %v1734_v17 = vadd.f32 %v1733_v9, %v1731_v7 }
 0x1e7   :  { %v1745_v11 = vadd.f32 %v1744_v14, %v1742_v52  ;;  %v1756_v51 = vadd.f32 %v1755_v55, %v1753_v53  ;;  %v1767_v8 = vadd.f32 %v1766_v33, %v1764_v4  ;;  %v1778_v46 = vadd.f32 %v1777_v32, %v1775_v38 }
 0x1e8   :  { %v1704_v30 = vadd.f32 %v1703_v12, %v3429_v6  ;;  %v1715_v13 = vadd.f32 %v3214_v20, %v1712_v48  ;;  %v1726_v58 = vadd.f32 %v3217_v41, %v1723_v39  ;;  %v1737_v16 = vadd.f32 %v3222_v57, %v1734_v17 }
 0x1e9   :  { %v1748_v15 = vadd.f32 %v3231_v49, %v1745_v11  ;;  %v1759_v10 = vadd.f32 %v3234_v43, %v1756_v51  ;;  %v1770_v27 = vadd.f32 %v3239_v0, %v1767_v8  ;;  %v1781_v22 = vadd.f32 %v3242_v34, %v1778_v46 }
 0x1ea   :  { %1802 = vst [vmem:[#allocation8] sm:$0xff] %v1704_v30  ;;  %v1782_v9 = vperm.slane %v1692_v42, 7  ;;  %v1793_v14 = vsub.f32 %v2845_v60, %v1715_v13  ;;  %v1794_v20 = vsub.f32 %v2850_v61, %v1726_v58  ;;  %v1795_v41 = vsub.f32 %v2869_v44, %v1737_v16 }
 0x1eb   :  { %v1796_v57 = vsub.f32 %v2888_v63, %v1748_v15  ;;  %1832 = dma.vmem_to_hbm [thread:$0]  %s1828_s24, 128, %s1830_s27, [#allocation9]   ;;  %v1788_v49 = vmul.f32 %v1787_v25, %v2985_v59  ;;  %v1797_v43 = vsub.f32 %v2906_v40, %v1759_v10  ;;  %v1798_v0 = vsub.f32 %v2925_v3, %v1770_v27 }
 0x1ec   :  { %v1783_v55 = vmul.f32 %v1782_v9, %v2968_v28  ;;  %1803 = vst [vmem:[#allocation10] sm:$0xff] %v1793_v14  ;;  %v1791_v61 = vmul.f32 %v1790_v2, %v2991_v62  ;;  %v1799_v44 = vsub.f32 %v2941_v1, %v1781_v22 }
 0x1ed   :  { %1804 = vst [vmem:[#allocation10 + $0x8] sm:$0xff] %v1794_v20 }
 0x1ee   :  { %v1786_v60 = vadd.f32 %v1785_v5, %v1783_v55  ;;  %1805 = vst [vmem:[#allocation10 + $0x10] sm:$0xff] %v1795_v41 }
 0x1ef   :  { %1806 = vst [vmem:[#allocation10 + $0x18] sm:$0xff] %v1796_v57 }
 0x1f0   :  { %v1789_v63 = vadd.f32 %v1788_v49, %v1786_v60  ;;  %1807 = vst [vmem:[#allocation10 + $0x20] sm:$0xff] %v1797_v43 }
 0x1f1   :  { %1808 = vst [vmem:[#allocation10 + $0x28] sm:$0xff] %v1798_v0 }
 0x1f2   :  { %v1792_v40 = vadd.f32 %v1791_v61, %v1789_v63  ;;  %1809 = vst [vmem:[#allocation10 + $0x30] sm:$0xff] %v1799_v44 }
 0x1f4   :  { %v1800_v3 = vsub.f32 %v2951_v31, %v1792_v40 }
 0x1f6   :  { %1810 = vst [vmem:[#allocation10 + $0x38] sm:$0xff] %v1800_v3 }
 0x1f7   :  { %1845 = dma.vmem_to_hbm [thread:$0]  %s1838_s28, 1024, %s1840_s5, [#allocation9], %s2015_s19, %s2015_s19, %s2016_s20  }
 0x1f8   :  { %2009 = dma.done.wait [#allocation4], 64  }
 0x1f9   :  { %2010 = vsyncadd [#allocation4], 4294967232 }
 0x1fa   :  { %2011 = dma.done.wait [#allocation9], 1152  }
 0x1fb   :  { %2012 = vsyncadd [#allocation9], 4294966144 }
 0x1fc   :  { %1858 = vsyncpa [#allocation3], 1 }
 0x1fd   :  { %1859 = vsyncpa [#allocation6], 1 }
 0x1fe   :  { %1860 = vsyncpa [#allocation4], 1 }
 0x1ff   :  { %1861 = vsyncpa [#allocation9], 1 }

</bundles_post_ra>
